<compile_context>
chip_gen: v6e
topology: v6e:2x2x1
jax: 0.10.0
libtpu: 0.0.40
codegen_flags: <defaults>
</compile_context>

<pallas_src>
import numpy as np
import jax
import jax.numpy as jnp
from jax import lax
from jax.experimental import pallas as pl
from jax.experimental.pallas import tpu as pltpu


_IMG = 28 * 28            # 784 raw input pixels per sample
_SLAB = 384               # per-pool-branch column slab (294 real lanes padded to 3*128)
_NCONV_COLS = 4 * _SLAB   # 1536 conv-matrix columns (4 pool branches)

# ---- static conv-matrix tap geometry (numpy, computed once at import) ----
_QI, _QJ, _PH, _PW, _KH, _KW = np.meshgrid(
    np.arange(2), np.arange(2), np.arange(7), np.arange(7),
    np.arange(5), np.arange(5), indexing="ij")
_IH = 4 * _PH + 2 * _QI + _KH            # padded-image row coord, 0..31
_IW = 4 * _PW + 2 * _QJ + _KW            # padded-image col coord, 0..31
_VALID = ((_IH >= 2) & (_IH <= 29) & (_IW >= 2) & (_IW <= 29)).reshape(-1)
_ROWS = (((_IH - 2) * 28 + (_IW - 2)).reshape(-1)[_VALID]).astype(np.int32)
_COL0 = (((_QI * 2 + _QJ) * _SLAB + (_PH * 7 + _PW) * 6).reshape(-1)[_VALID]).astype(np.int32)
_KHF = _KH.reshape(-1)[_VALID]
_KWF = _KW.reshape(-1)[_VALID]
_NTAPS = int(_ROWS.size)
_SCAT_ROWS = np.ascontiguousarray(np.broadcast_to(_ROWS, (6, _NTAPS))).reshape(-1)
_SCAT_COLS = (_COL0[None, :] + np.arange(6, dtype=np.int32)[:, None]).reshape(-1)


def _build_conv_matrix(conv_w):
    """[6,1,5,5] conv weight -> [784, 1536] dense conv matrix (stride 2, pad 2)."""
    w = conv_w.reshape(6, 5, 5)
    vals = w[:, _KHF, _KWF].reshape(-1)                      # [6 * ntaps]
    m = jnp.zeros((_IMG, _NCONV_COLS), jnp.float32)
    m = m.at[_SCAT_ROWS, _SCAT_COLS].set(vals)               # unique (row,col) pairs
    return m.astype(jnp.bfloat16)


def _shadow_fused_kernel(x_ref, wc_ref, bc_ref, w1_ref, b1_ref, w2_ref, b2_ref, o_ref):
    # x_ref : [TB, 784]    bf16  raw image, row-major (ih*28 + iw)
    # wc_ref: [784, 1536]  bf16  dense conv matrix, col = q*384 + pos*6 + c
    # bc_ref: [1, 384]     f32   conv bias tiled to (pos*6 + c), zeros past 294
    # w1_ref: [384, 40]    bf16  fc1 weight, rows in (pos*6 + c) order, zero rows past 294
    # b1_ref: [1, 40]      f32
    # w2_ref: [40, 128]    bf16  fc2 weight, columns 10..127 zero
    # b2_ref: [1, 128]     f32   fc2 bias, lanes 10..127 = -1e30
    # o_ref : [TB, 128]    f32   log-probabilities in lanes 0..9

    # conv1 for all 4 pool branches / 49 positions / 6 channels: one MXU push.
    z = jnp.dot(x_ref[...], wc_ref[...], preferred_element_type=jnp.float32)   # [TB, 1536]

    # 2x2 max-pool = lanewise max of four 128-aligned 384-lane slabs (no relayout).
    pooled = jnp.maximum(jnp.maximum(z[:, 0:_SLAB], z[:, _SLAB:2 * _SLAB]),
                         jnp.maximum(z[:, 2 * _SLAB:3 * _SLAB], z[:, 3 * _SLAB:4 * _SLAB]))
    # conv bias + ReLU hoisted after the max (per-channel bias, monotone ReLU).
    xf = jnp.maximum(pooled + bc_ref[...], 0.0)                                 # [TB, 384]

    h = jnp.dot(xf.astype(jnp.bfloat16), w1_ref[...],
                preferred_element_type=jnp.float32) + b1_ref[...]
    h = jnp.maximum(h, 0.0)                                                     # [TB, 40]
    logits = jnp.dot(h.astype(jnp.bfloat16), w2_ref[...],
                     preferred_element_type=jnp.float32) + b2_ref[...]          # [TB, 128]

    # numerically stable log_softmax; pad lanes hold -1e30 so exp underflows to 0.
    m = jnp.max(logits, axis=-1, keepdims=True)
    s = logits - m
    lse = jnp.log(jnp.sum(jnp.exp(s), axis=-1, keepdims=True))
    o_ref[...] = s - lse                                                        # full-slab store


def _round_up(n, m):
    return -(-n // m) * m


def _pick_batch_tiling(b, tb_max=256):
    """Batch tile TB (multiple of 8) and grid size G; G >= 2 once the batch is
    non-trivial so v7x's two TensorCores both get work (no-op on v5e/v6e)."""
    b8 = _round_up(max(b, 1), 8)
    g = max(-(-b8 // tb_max), 2 if b8 >= 16 else 1)
    tb = _round_up(-(-b8 // g), 8)
    g = -(-b8 // tb)
    return tb, g


def init_params(key):
    k = jax.random.split(key, 6)

    def u(kk, shape, fan_in):
        bound = 1.0 / jnp.sqrt(fan_in)
        return jax.random.uniform(kk, shape, jnp.float32, -bound, bound)

    return dict(
        conv_w=u(k[0], (6, 1, 5, 5), 25.0),
        conv_b=u(k[1], (6,), 25.0),
        fc1_w=u(k[2], (40, 6 * 7 * 7), 294.0),
        fc1_b=u(k[3], (40,), 294.0),
        fc2_w=u(k[4], (10, 40), 40.0),
        fc2_b=u(k[5], (10,), 40.0),
    )


def shadow_model_forward(x, params, *, tb_max=256):
    B = x.shape[0]
    TB, G = _pick_batch_tiling(B, tb_max)
    B_pad = TB * G

    # Raw image -> [B_pad, 784] bf16 (batch zero-padded to a whole number of tiles).
    x_flat = x.reshape(B, _IMG).astype(jnp.bfloat16)
    if B_pad != B:
        x_flat = jnp.pad(x_flat, ((0, B_pad - B), (0, 0)))

    # ---- trace-time weight/bias re-layout (cheap; fused/fetched once) ----
    wc = _build_conv_matrix(params['conv_w'])                                   # [784, 1536] bf16
    bc = jnp.pad(jnp.tile(params['conv_b'], 49), (0, _SLAB - 294)).reshape(1, _SLAB)
    # fc1 rows: PyTorch flatten order (c*49 + pos) -> pooled lane order (pos*6 + c)
    w1 = params['fc1_w'].T.reshape(6, 49, 40).transpose(1, 0, 2).reshape(294, 40)
    w1 = jnp.pad(w1, ((0, _SLAB - 294), (0, 0))).astype(jnp.bfloat16)           # [384, 40]
    b1 = params['fc1_b'].reshape(1, 40)
    w2 = jnp.pad(params['fc2_w'].T, ((0, 0), (0, 118))).astype(jnp.bfloat16)    # [40, 128]
    b2 = jnp.pad(params['fc2_b'], (0, 118), constant_values=-1e30).reshape(1, 128)

    flops = 2 * B_pad * (_IMG * _NCONV_COLS + _SLAB * 40 + 40 * 128)
    bytes_accessed = (B_pad * _IMG * 2 + _IMG * _NCONV_COLS * 2 + _SLAB * 40 * 2
                      + 40 * 128 * 2 + (_SLAB + 40 + 128) * 4 + B_pad * 128 * 4)

    out = pl.pallas_call(
        _shadow_fused_kernel,
        out_shape=jax.ShapeDtypeStruct((B_pad, 128), jnp.float32),
        grid=(G,),
        in_specs=[
            pl.BlockSpec((TB, _IMG), lambda i: (i, 0)),            # image tile (only per-step DMA)
            pl.BlockSpec((_IMG, _NCONV_COLS), lambda i: (0, 0)),   # dense conv matrix (fetched once)
            pl.BlockSpec((1, _SLAB), lambda i: (0, 0)),            # tiled conv bias
            pl.BlockSpec((_SLAB, 40), lambda i: (0, 0)),           # fc1 weight (permuted, padded)
            pl.BlockSpec((1, 40), lambda i: (0, 0)),               # fc1 bias
            pl.BlockSpec((40, 128), lambda i: (0, 0)),             # fc2 weight (lane-dense)
            pl.BlockSpec((1, 128), lambda i: (0, 0)),              # fc2 bias (pad lanes = -1e30)
        ],
        out_specs=pl.BlockSpec((TB, 128), lambda i: (i, 0)),       # lane-dense output slab
        compiler_params=pltpu.CompilerParams(
            dimension_semantics=("parallel",)),                    # batch tiles shard across TCs
        cost_estimate=pl.CostEstimate(
            flops=flops, transcendentals=B_pad * 129, bytes_accessed=bytes_accessed),
    )(x_flat, wc, bc, w1, b1, w2, b2)

    return out[:B, :10]


def reference_forward(x, params):
    B = x.shape[0]
    y = lax.conv_general_dilated(
        x, params['conv_w'], window_strides=(2, 2), padding=((2, 2), (2, 2)),
        dimension_numbers=('NCHW', 'OIHW', 'NCHW'))
    y = jnp.maximum(y + params['conv_b'].reshape(1, 6, 1, 1), 0.0)
    y = lax.reduce_window(y, -jnp.inf, lax.max, (1, 1, 2, 2), (1, 1, 2, 2), 'VALID')
    y = y.reshape(B, 6 * 7 * 7)
    h = jnp.maximum(y @ params['fc1_w'].T + params['fc1_b'], 0.0)
    logits = h @ params['fc2_w'].T + params['fc2_b']
    return jax.nn.log_softmax(logits, axis=1)


if __name__ == "__main__":
    key = jax.random.PRNGKey(0)
    kx, kp = jax.random.split(key)
    B = 2
    x = jax.random.normal(kx, (B, 1, 28, 28), jnp.float32)   # MNIST-like input
    params = init_params(kp)

    out = jax.jit(shadow_model_forward)(x, params)
    out = jax.block_until_ready(out)

    ref = reference_forward(x, params)
    assert out.shape == (B, 10)
    assert bool(jnp.allclose(out, ref, atol=2e-2, rtol=2e-2)), (out, ref)
    print("KERNEL_OK")
</pallas_src>

<mosaic_0001>
module attributes {stable_mosaic.version = 11 : i64} {
  func.func @_shadow_fused_kernel(%arg0: i32, %arg1: memref<8x784xbf16, #tpu.memory_space<vmem>>, %arg2: memref<784x1536xbf16, #tpu.memory_space<vmem>>, %arg3: memref<1x384xf32, #tpu.memory_space<vmem>>, %arg4: memref<384x40xbf16, #tpu.memory_space<vmem>>, %arg5: memref<1x40xf32, #tpu.memory_space<vmem>>, %arg6: memref<40x128xbf16, #tpu.memory_space<vmem>>, %arg7: memref<1x128xf32, #tpu.memory_space<vmem>>, %arg8: memref<8x128xf32, #tpu.memory_space<vmem>>) attributes {dimension_semantics = [#tpu.dimension_semantics<parallel>], iteration_bounds = array<i64: 1>, scalar_prefetch = 0 : i64, scratch_operands = 0 : i64, tpu.core_type = #tpu.core_type<tc>, window_params = [{transform_indices = @transform_0, window_bounds = array<i64: 8, 784>}, {pipeline_mode = #tpu.pipeline_mode<synchronous>, transform_indices = @transform_1, window_bounds = array<i64: 784, 1536>}, {pipeline_mode = #tpu.pipeline_mode<synchronous>, transform_indices = @transform_2, window_bounds = array<i64: 1, 384>}, {pipeline_mode = #tpu.pipeline_mode<synchronous>, transform_indices = @transform_3, window_bounds = array<i64: 384, 40>}, {pipeline_mode = #tpu.pipeline_mode<synchronous>, transform_indices = @transform_4, window_bounds = array<i64: 1, 40>}, {pipeline_mode = #tpu.pipeline_mode<synchronous>, transform_indices = @transform_5, window_bounds = array<i64: 40, 128>}, {pipeline_mode = #tpu.pipeline_mode<synchronous>, transform_indices = @transform_6, window_bounds = array<i64: 1, 128>}, {transform_indices = @transform_7, window_bounds = array<i64: 8, 128>}]} {
    %c0 = arith.constant 0 : index
    %c0_0 = arith.constant 0 : index
    %0 = vector.load %arg1[%c0, %c0_0] : memref<8x784xbf16, #tpu.memory_space<vmem>>, vector<8x784xbf16>
    %c0_1 = arith.constant 0 : index
    %c0_2 = arith.constant 0 : index
    %1 = vector.load %arg2[%c0_1, %c0_2] : memref<784x1536xbf16, #tpu.memory_space<vmem>>, vector<784x1536xbf16>
    %cst = arith.constant dense<0.000000e+00> : vector<8x1536xf32>
    %2 = tpu.matmul %0, %1, %cst {dimension_numbers = #tpu.dot_dimension_numbers<[1], [0], [0], [1], [0, 0, 1, 1], [], []>} : vector<8x784xbf16>, vector<784x1536xbf16>, vector<8x1536xf32> -> vector<8x1536xf32>
    %3 = vector.extract_strided_slice %2 {offsets = [0, 0], sizes = [8, 384], strides = [1, 1]} : vector<8x1536xf32> to vector<8x384xf32>
    %4 = vector.extract_strided_slice %2 {offsets = [0, 384], sizes = [8, 384], strides = [1, 1]} : vector<8x1536xf32> to vector<8x384xf32>
    %5 = arith.maximumf %3, %4 : vector<8x384xf32>
    %6 = vector.extract_strided_slice %2 {offsets = [0, 768], sizes = [8, 384], strides = [1, 1]} : vector<8x1536xf32> to vector<8x384xf32>
    %7 = vector.extract_strided_slice %2 {offsets = [0, 1152], sizes = [8, 384], strides = [1, 1]} : vector<8x1536xf32> to vector<8x384xf32>
    %8 = arith.maximumf %6, %7 : vector<8x384xf32>
    %9 = arith.maximumf %5, %8 : vector<8x384xf32>
    %c0_3 = arith.constant 0 : index
    %c0_4 = arith.constant 0 : index
    %10 = vector.load %arg3[%c0_3, %c0_4] : memref<1x384xf32, #tpu.memory_space<vmem>>, vector<1x384xf32>
    %11 = vector.broadcast %10 : vector<1x384xf32> to vector<8x384xf32>
    %12 = arith.addf %9, %11 : vector<8x384xf32>
    %cst_5 = arith.constant 0.000000e+00 : f32
    %13 = vector.broadcast %cst_5 : f32 to vector<8x384xf32>
    %14 = arith.maximumf %12, %13 : vector<8x384xf32>
    %15 = arith.truncf %14 : vector<8x384xf32> to vector<8x384xbf16>
    %c0_6 = arith.constant 0 : index
    %c0_7 = arith.constant 0 : index
    %16 = vector.load %arg4[%c0_6, %c0_7] : memref<384x40xbf16, #tpu.memory_space<vmem>>, vector<384x40xbf16>
    %cst_8 = arith.constant dense<0.000000e+00> : vector<8x40xf32>
    %17 = tpu.matmul %15, %16, %cst_8 {dimension_numbers = #tpu.dot_dimension_numbers<[1], [0], [0], [1], [0, 0, 1, 1], [], []>} : vector<8x384xbf16>, vector<384x40xbf16>, vector<8x40xf32> -> vector<8x40xf32>
    %c0_9 = arith.constant 0 : index
    %c0_10 = arith.constant 0 : index
    %18 = vector.load %arg5[%c0_9, %c0_10] : memref<1x40xf32, #tpu.memory_space<vmem>>, vector<1x40xf32>
    %19 = vector.broadcast %18 : vector<1x40xf32> to vector<8x40xf32>
    %20 = arith.addf %17, %19 : vector<8x40xf32>
    %cst_11 = arith.constant 0.000000e+00 : f32
    %21 = vector.broadcast %cst_11 : f32 to vector<8x40xf32>
    %22 = arith.maximumf %20, %21 : vector<8x40xf32>
    %23 = arith.truncf %22 : vector<8x40xf32> to vector<8x40xbf16>
    %c0_12 = arith.constant 0 : index
    %c0_13 = arith.constant 0 : index
    %24 = vector.load %arg6[%c0_12, %c0_13] : memref<40x128xbf16, #tpu.memory_space<vmem>>, vector<40x128xbf16>
    %cst_14 = arith.constant dense<0.000000e+00> : vector<8x128xf32>
    %25 = tpu.matmul %23, %24, %cst_14 {dimension_numbers = #tpu.dot_dimension_numbers<[1], [0], [0], [1], [0, 0, 1, 1], [], []>} : vector<8x40xbf16>, vector<40x128xbf16>, vector<8x128xf32> -> vector<8x128xf32>
    %c0_15 = arith.constant 0 : index
    %c0_16 = arith.constant 0 : index
    %26 = vector.load %arg7[%c0_15, %c0_16] : memref<1x128xf32, #tpu.memory_space<vmem>>, vector<1x128xf32>
    %27 = vector.broadcast %26 : vector<1x128xf32> to vector<8x128xf32>
    %28 = arith.addf %25, %27 : vector<8x128xf32>
    %cst_17 = arith.constant dense<0xFF800000> : vector<8xf32>
    %29 = vector.multi_reduction <maximumf>, %28, %cst_17 [1] : vector<8x128xf32> to vector<8xf32>
    %30 = vector.shape_cast %29 : vector<8xf32> to vector<8x1xf32>
    %31 = vector.broadcast %30 : vector<8x1xf32> to vector<8x128xf32>
    %32 = arith.subf %28, %31 : vector<8x128xf32>
    %33 = math.exp %32 : vector<8x128xf32>
    %cst_18 = arith.constant dense<0.000000e+00> : vector<8xf32>
    %34 = vector.multi_reduction <add>, %33, %cst_18 [1] : vector<8x128xf32> to vector<8xf32>
    %35 = vector.shape_cast %34 : vector<8xf32> to vector<8x1xf32>
    %36 = math.log %35 : vector<8x1xf32>
    %37 = vector.broadcast %36 : vector<8x1xf32> to vector<8x128xf32>
    %38 = arith.subf %32, %37 : vector<8x128xf32>
    %c0_19 = arith.constant 0 : index
    %c0_20 = arith.constant 0 : index
    %39 = vector.load %arg8[%c0_19, %c0_20] : memref<8x128xf32, #tpu.memory_space<vmem>>, vector<8x128xf32>
    tpu.vector_store %arg8[%c0_19, %c0_20], %38 {strides = array<i32>} : memref<8x128xf32, #tpu.memory_space<vmem>>, vector<8x128xf32>,
    return
  }
  func.func @transform_0(%arg0: i32) -> (i32, i32) {
    %c0_i32 = arith.constant 0 : i32
    %c0_i32_0 = arith.constant 0 : i32
    return %arg0, %c0_i32 : i32, i32
  }
  func.func @transform_1(%arg0: i32) -> (i32, i32) {
    %c0_i32 = arith.constant 0 : i32
    %c0_i32_0 = arith.constant 0 : i32
    %c0_i32_1 = arith.constant 0 : i32
    return %c0_i32, %c0_i32_0 : i32, i32
  }
  func.func @transform_2(%arg0: i32) -> (i32, i32) {
    %c0_i32 = arith.constant 0 : i32
    %c0_i32_0 = arith.constant 0 : i32
    %c0_i32_1 = arith.constant 0 : i32
    return %c0_i32, %c0_i32_0 : i32, i32
  }
  func.func @transform_3(%arg0: i32) -> (i32, i32) {
    %c0_i32 = arith.constant 0 : i32
    %c0_i32_0 = arith.constant 0 : i32
    %c0_i32_1 = arith.constant 0 : i32
    return %c0_i32, %c0_i32_0 : i32, i32
  }
  func.func @transform_4(%arg0: i32) -> (i32, i32) {
    %c0_i32 = arith.constant 0 : i32
    %c0_i32_0 = arith.constant 0 : i32
    %c0_i32_1 = arith.constant 0 : i32
    return %c0_i32, %c0_i32_0 : i32, i32
  }
  func.func @transform_5(%arg0: i32) -> (i32, i32) {
    %c0_i32 = arith.constant 0 : i32
    %c0_i32_0 = arith.constant 0 : i32
    %c0_i32_1 = arith.constant 0 : i32
    return %c0_i32, %c0_i32_0 : i32, i32
  }
  func.func @transform_6(%arg0: i32) -> (i32, i32) {
    %c0_i32 = arith.constant 0 : i32
    %c0_i32_0 = arith.constant 0 : i32
    %c0_i32_1 = arith.constant 0 : i32
    return %c0_i32, %c0_i32_0 : i32, i32
  }
  func.func @transform_7(%arg0: i32) -> (i32, i32) {
    %c0_i32 = arith.constant 0 : i32
    %c0_i32_0 = arith.constant 0 : i32
    return %arg0, %c0_i32 : i32, i32
  }
}

</mosaic_0001>

<bundles_post_ra>
// kernel: tile.8
= control target key start
LH: loop header
LB: loop body
LE: loop exit
PB: predicated region body
PF: predicated region fallthrough
CT: control target
= control target key end

     0   :  { %s58_s0 = inlined_call_operand.vmem [shape: f32[6], index: 0, kind: input, shape index: {}]   ;;  %s59_s1 = inlined_call_operand.vmem [shape: f32[49,6], index: 1, kind: output, shape index: {}]  }
   0x1   :  { %v4_v0 = vld [vmem:[%s58_s0] ss:$0 sm:$0xff] }
   0x2   :  { %5 = vst [vmem:[%s59_s1] sm:$0xff] %v4_v0  ;;  %18 = vst [vmem:[%s59_s1 + $0x8] sm:$0xff] %v4_v0 }
   0x3   :  { %19 = vst [vmem:[%s59_s1 + $0x10] sm:$0xff] %v4_v0  ;;  %20 = vst [vmem:[%s59_s1 + $0x18] sm:$0xff] %v4_v0 }
   0x4   :  { %21 = vst [vmem:[%s59_s1 + $0x20] sm:$0xff] %v4_v0  ;;  %22 = vst [vmem:[%s59_s1 + $0x28] sm:$0xff] %v4_v0 }
   0x5   :  { %23 = vst [vmem:[%s59_s1 + $0x30] sm:$0xff] %v4_v0 }

// kernel: tile.9
= control target key start
LH: loop header
LB: loop body
LE: loop exit
PB: predicated region body
PF: predicated region fallthrough
CT: control target
= control target key end

     0   :  { %vm9_vm0 = vcmask 15360   ;;  %s440_s10 = smov 120   ;;  %vm13_vm1 = vcmask 31744   ;;  %s441_s19 = smov 126   ;;  %vm3_vm2 = vcmask 48128   ;;  %vm16_vm3 = vcmask 1048560   ;;  %s658_s0 = inlined_call_operand.vmem [shape: f32[49,6], index: 0, kind: input, shape index: {}]   ;;  %s659_s1 = inlined_call_operand.vmem [shape: f32[294], index: 1, kind: output, shape index: {}]  }
   0x1   :  { %v346_v0 = vld [vmem:[%s658_s0 + $0x14] sm:$0x1]   ;;  %v342_v1 = vld [vmem:[%s658_s0 + $0x15] sm:$0x1]   ;;  %v347_v3 = vld [vmem:[%s658_s0 + $0x29] sm:$0x1]  }
   0x2   :  { %34 = vrot.lane.b32.xlu1 %v346_v0, %s440_s10  ;;  %v343_v2 = vld [vmem:[%s658_s0 + $0x15] sm:$0x1]   ;;  %v344_v5 = vld [vmem:[%s658_s0 + $0x2a] sm:$0x1]   ;;  %s442_s20 = smov 118   ;;  %s443_s23 = smov 124  }
   0x3   :  { %v10_v4 = vsel %vm9_vm0, %v343_v2, %v342_v1  ;;  %v345_v6 = vld [vmem:[%s658_s0 + $0x2a] sm:$0x1]   ;;  %v349_v8 = vld [vmem:[%s658_s0 + $0x28] sm:$0x1]   ;;  %v348_v9 = vld [vmem:[%s658_s0 + $0x13] sm:$0x1]  }
   0x4   :  { %11 = vrot.lane.b32.xlu0 %v10_v4, %s441_s19  ;;  %v23_v7 = vsel %vm13_vm1, %v345_v6, %v344_v5  ;;  %s444_s26 = smov 112   ;;  %v351_v10 = vld [vmem:[%s658_s0 + $0x27] sm:$0x1]   ;;  %s445_s29 = smov 114   ;;  %v350_v11 = vld [vmem:[%s658_s0 + $0x12] sm:$0x1]  }
   0x5   :  { %s446_s3 = smov 106   ;;  %v353_v12 = vld [vmem:[%s658_s0 + $0x26] sm:$0x1]   ;;  %s447_s6 = smov 108   ;;  %v352_v13 = vld [vmem:[%s658_s0 + $0x11] sm:$0x1]  }
   0x6   :  { %40 = vrot.lane.b32.xlu1 %v347_v3, %s442_s20  ;;  %s448_s9 = smov 100   ;;  %v355_v14 = vld [vmem:[%s658_s0 + $0x25] sm:$0x1]   ;;  %s449_s12 = smov 102   ;;  %v354_v15 = vld [vmem:[%s658_s0 + $0x10] sm:$0x1]  }
   0x7   :  { %s450_s15 = smov 94   ;;  %v357_v16 = vld [vmem:[%s658_s0 + $0x24] sm:$0x1]   ;;  %s451_s18 = smov 96   ;;  %v356_v17 = vld [vmem:[%s658_s0 + $0xf] sm:$0x1]  }
   0x8   :  { %24 = vrot.lane.b32.xlu0 %v23_v7, %s443_s23  ;;  %s452_s21 = smov 88   ;;  %v2_v18 = vld [vmem:[%s658_s0] sm:$0x1]   ;;  %v359_v19 = vld [vmem:[%s658_s0 + $0x23] sm:$0x1]   ;;  %s462_s24 = smov 58  }
   0x9   :  { %4 = vst.msk [vmem:[#allocation0] sm:$0x1] %vm3_vm2, %v2_v18   ;;  %v358_v20 = vld [vmem:[%s658_s0 + $0xe] sm:$0x1]   ;;  %v361_v21 = vld [vmem:[%s658_s0 + $0x22] sm:$0x1]  }
   0xa   :  { %53 = vrot.lane.b32.xlu1 %v349_v8, %s444_s26  ;;  %s453_s26 = smov 90   ;;  %v360_v22 = vld [vmem:[%s658_s0 + $0xd] sm:$0x1]   ;;  %v363_v23 = vld [vmem:[%s658_s0 + $0x21] sm:$0x1]   ;;  %s463_s27 = smov 60  }
   0xb   :  { %v362_v24 = vld [vmem:[%s658_s0 + $0xc] sm:$0x1]   ;;  %v365_v25 = vld [vmem:[%s658_s0 + $0x20] sm:$0x1]   ;;  %v364_v26 = vld [vmem:[%s658_s0 + $0xb] sm:$0x1]  }
   0xc   :  { %47 = vrot.lane.b32.xlu0 %v348_v9, %s445_s29  ;;  %s454_s29 = smov 82   ;;  %v367_v27 = vld [vmem:[%s658_s0 + $0x1f] sm:$0x1]   ;;  %v366_v28 = vld [vmem:[%s658_s0 + $0xa] sm:$0x1]   ;;  %s464_s30 = smov 52  }
   0xd   :  { %v369_v29 = vld [vmem:[%s658_s0 + $0x1e] sm:$0x1]   ;;  %v368_v30 = vld [vmem:[%s658_s0 + $0x9] sm:$0x1]   ;;  %v371_v31 = vld [vmem:[%s658_s0 + $0x1d] sm:$0x1]  }
   0xe   :  { %66 = vrot.lane.b32.xlu1 %v351_v10, %s446_s3  ;;  %s455_s3 = smov 84   ;;  %s465_s4 = smov 54   ;;  %v370_v32 = vld [vmem:[%s658_s0 + $0x8] sm:$0x1]   ;;  %v373_v33 = vld [vmem:[%s658_s0 + $0x1c] sm:$0x1]  }
   0xf   :  { %s466_s7 = smov 46   ;;  %s467_s10 = smov 48   ;;  %v372_v34 = vld [vmem:[%s658_s0 + $0x7] sm:$0x1]   ;;  %v375_v35 = vld [vmem:[%s658_s0 + $0x1b] sm:$0x1]  }
  0x10   :  { %60 = vrot.lane.b32.xlu0 %v350_v11, %s447_s6  ;;  %s456_s6 = smov 76   ;;  %s468_s13 = smov 40   ;;  %v374_v36 = vld [vmem:[%s658_s0 + $0x6] sm:$0x1]   ;;  %v377_v37 = vld [vmem:[%s658_s0 + $0x5] sm:$0x1]  }
  0x11   :  { %s469_s16 = smov 42   ;;  %s470_s19 = smov 34   ;;  %v376_v38 = vld [vmem:[%s658_s0 + $0x30] sm:$0x1]   ;;  %v379_v39 = vld [vmem:[%s658_s0 + $0x2f] sm:$0x1]  }
  0x12   :  { %79 = vrot.lane.b32.xlu1 %v353_v12, %s448_s9  ;;  %s457_s9 = smov 78   ;;  %s471_s22 = smov 36   ;;  %v378_v40 = vld [vmem:[%s658_s0 + $0x1a] sm:$0x1]   ;;  %v381_v41 = vld [vmem:[%s658_s0 + $0x19] sm:$0x1]  }
  0x13   :  { %s472_s25 = smov 30   ;;  %s473_s28 = smov 32   ;;  %v380_v42 = vld [vmem:[%s658_s0 + $0x4] sm:$0x1]   ;;  %v383_v43 = vld [vmem:[%s658_s0 + $0x3] sm:$0x1]  }
  0x14   :  { %73 = vrot.lane.b32.xlu0 %v352_v13, %s449_s12  ;;  %s458_s12 = smov 70   ;;  %s474_s2 = smov 26   ;;  %v382_v44 = vld [vmem:[%s658_s0 + $0x2e] sm:$0x1]   ;;  %v385_v45 = vld [vmem:[%s658_s0 + $0x2d] sm:$0x1]  }
  0x15   :  { %s475_s5 = smov 28   ;;  %s476_s8 = smov 22   ;;  %v384_v46 = vld [vmem:[%s658_s0 + $0x18] sm:$0x1]   ;;  %v387_v47 = vld [vmem:[%s658_s0 + $0x17] sm:$0x1]  }
  0x16   :  { %92 = vrot.lane.b32.xlu1 %v355_v14, %s450_s15  ;;  %s459_s15 = smov 72   ;;  %s477_s11 = smov 24   ;;  %v386_v48 = vld [vmem:[%s658_s0 + $0x2] sm:$0x1]   ;;  %v389_v49 = vld [vmem:[%s658_s0 + $0x1] sm:$0x1]  }
  0x17   :  { %s478_s14 = smov 18   ;;  %s479_s17 = smov 20   ;;  %v388_v50 = vld [vmem:[%s658_s0 + $0x2c] sm:$0x1]   ;;  %v391_v51 = vld [vmem:[%s658_s0 + $0x2b] sm:$0x1]  }
  0x18   :  { %86 = vrot.lane.b32.xlu0 %v354_v15, %s451_s18  ;;  %s460_s18 = smov 64   ;;  %s480_s20 = smov 14   ;;  %v390_v52 = vld [vmem:[%s658_s0 + $0x16] sm:$0x1]   ;;  %vm36_vm4 = vcmask 1032128   ;;  %vm29_vm5 = vcmask 1048544  }
  0x19   :  { %s481_s23 = smov 16   ;;  %s486_s0 = smov 2   ;;  %vm42_vm6 = vcmask 1015728   ;;  %vm55_vm7 = vcmask 966528   ;;  %vm49_vm8 = vcmask 982928   ;;  %vm68_vm9 = vcmask 917328  }
  0x1a   :  { %105 = vrot.lane.b32.xlu1 %v357_v16, %s452_s21  ;;  %s461_s21 = smov 66   ;;  %vm62_vm10 = vcmask 933728   ;;  %vm81_vm11 = vcmask 868128   ;;  %vm75_vm12 = vcmask 884528   ;;  %vm94_vm13 = vcmask 818928  }
  0x1b   :  { %vm88_vm14 = vcmask 835328   ;;  %vm107_vm15 = vcmask 769728   ;;  %vm114_vm2 = vcmask 736928  }
  0x1c   :  { %99 = vrot.lane.b32.xlu0 %v356_v17, %s453_s26  ;;  %s482_s26 = smov 10  }
  0x1e   :  { %118 = vrot.lane.b32.xlu1 %v359_v19, %s454_s29  ;;  %s483_s29 = smov 12  }
  0x20   :  { %112 = vrot.lane.b32.xlu0 %v358_v20, %s455_s3  ;;  %s484_s3 = smov 6  }
  0x22   :  { %131 = vrot.lane.b32.xlu1 %v361_v21, %s456_s6  ;;  %s485_s6 = smov 8  }
  0x24   :  { %125 = vrot.lane.b32.xlu0 %v360_v22, %s457_s9  ;;  %s487_s9 = smov 4  }
  0x26   :  { %144 = vrot.lane.b32.xlu1 %v363_v23, %s458_s12 }
  0x28   :  { %138 = vrot.lane.b32.xlu0 %v362_v24, %s459_s15 }
  0x2a   :  { %157 = vrot.lane.b32.xlu1 %v365_v25, %s460_s18 }
  0x2c   :  { %151 = vrot.lane.b32.xlu0 %v364_v26, %s461_s21 }
  0x2e   :  { %170 = vrot.lane.b32.xlu1 %v367_v27, %s462_s24 }
  0x30   :  { %164 = vrot.lane.b32.xlu0 %v366_v28, %s463_s27 }
  0x32   :  { %183 = vrot.lane.b32.xlu1 %v369_v29, %s464_s30 }
  0x34   :  { %177 = vrot.lane.b32.xlu0 %v368_v30, %s465_s4 }
  0x36   :  { %196 = vrot.lane.b32.xlu1 %v371_v31, %s466_s7 }
  0x38   :  { %190 = vrot.lane.b32.xlu0 %v370_v32, %s467_s10 }
  0x3a   :  { %209 = vrot.lane.b32.xlu1 %v373_v33, %s468_s13 }
  0x3c   :  { %203 = vrot.lane.b32.xlu0 %v372_v34, %s469_s16 }
  0x3e   :  { %222 = vrot.lane.b32.xlu1 %v375_v35, %s470_s19 }
  0x40   :  { %216 = vrot.lane.b32.xlu0 %v374_v36, %s471_s22 }
  0x42   :  { %236 = vrot.lane.b32.xlu1 %v377_v37, %s472_s25 }
  0x44   :  { %229 = vrot.lane.b32.xlu0 %v376_v38, %s473_s28 }
  0x46   :  { %249 = vrot.lane.b32.xlu1 %v379_v39, %s474_s2 }
  0x48   :  { %242 = vrot.lane.b32.xlu0 %v378_v40, %s475_s5 }
  0x4a   :  { %262 = vrot.lane.b32.xlu1 %v381_v41, %s476_s8 }
  0x4c   :  { %256 = vrot.lane.b32.xlu0 %v380_v42, %s477_s11 }
  0x4e   :  { %276 = vrot.lane.b32.xlu1 %v383_v43, %s478_s14 }
  0x50   :  { %269 = vrot.lane.b32.xlu0 %v382_v44, %s479_s17 }
  0x52   :  { %289 = vrot.lane.b32.xlu1 %v385_v45, %s480_s20 }
  0x54   :  { %282 = vrot.lane.b32.xlu0 %v384_v46, %s481_s23 }
  0x56   :  { %302 = vrot.lane.b32.xlu1 %v387_v47, %s482_s26 }
  0x58   :  { %296 = vrot.lane.b32.xlu0 %v386_v48, %s483_s29 }
  0x5a   :  { %316 = vrot.lane.b32.xlu1 %v389_v49, %s484_s3 }
  0x5c   :  { %309 = vrot.lane.b32.xlu0 %v388_v50, %s485_s6 }
  0x5e   :  { %329 = vrot.lane.b32.xlu1 %v391_v51, %s486_s0 }
  0x60   :  { %322 = vrot.lane.b32.xlu0 %v390_v52, %s487_s9 }
  0x74   :  { %v35_v53 = vpop.permute.xlu1 %34  }
  0x76   :  { %v12_v54 = vpop.permute.xlu0 %11  }
  0x77   :  { %15 = vst.msk [vmem:[#allocation0 + $0x1] sm:$0x1] %vm13_vm1, %v12_v54   ;;  %vm120_vm1 = vcmask 720528  }
  0x78   :  { %17 = vst.msk [vmem:[#allocation0] sm:$0x1] %vm16_vm3, %v12_v54   ;;  %v41_v55 = vpop.permute.xlu1 %40   ;;  %vm133_vm3 = vcmask 671328  }
  0x79   :  { %37 = vst.msk [vmem:[#allocation0] sm:$0x1] %vm36_vm4, %v35_v53   ;;  %vm127_vm4 = vcmask 687728  }
  0x7a   :  { %v25_v56 = vpop.permute.xlu0 %24  }
  0x7b   :  { %28 = vst.msk [vmem:[#allocation0 + $0x2] sm:$0x1] %vm9_vm0, %v25_v56   ;;  %vm101_vm0 = vcmask 786128  }
  0x7c   :  { %31 = vst.msk [vmem:[#allocation0 + $0x1] sm:$0x1] %vm29_vm5, %v25_v56   ;;  %v54_v57 = vpop.permute.xlu1 %53   ;;  %vm146_vm5 = vcmask 622128  }
  0x7d   :  { %44 = vst.msk [vmem:[#allocation0 + $0x1] sm:$0x1] %vm42_vm6, %v41_v55   ;;  %vm140_vm6 = vcmask 638528  }
  0x7e   :  { %57 = vst.msk [vmem:[#allocation0 + $0x1] sm:$0x1] %vm55_vm7, %v54_v57   ;;  %v48_v58 = vpop.permute.xlu0 %47   ;;  %vm159_vm7 = vcmask 572928  }
  0x7f   :  { %50 = vst.msk [vmem:[#allocation0] sm:$0x1] %vm49_vm8, %v48_v58   ;;  %vm153_vm8 = vcmask 589328  }
  0x80   :  { %v67_v59 = vpop.permute.xlu1 %66  }
  0x81   :  { %70 = vst.msk [vmem:[#allocation0 + $0x1] sm:$0x1] %vm68_vm9, %v67_v59   ;;  %vm172_vm9 = vcmask 523728  }
  0x82   :  { %v61_v60 = vpop.permute.xlu0 %60  }
  0x83   :  { %63 = vst.msk [vmem:[#allocation0] sm:$0x1] %vm62_vm10, %v61_v60   ;;  %vm166_vm10 = vcmask 540128  }
  0x84   :  { %v80_v61 = vpop.permute.xlu1 %79  }
  0x85   :  { %83 = vst.msk [vmem:[#allocation0 + $0x1] sm:$0x1] %vm81_vm11, %v80_v61   ;;  %vm185_vm11 = vcmask 474528  }
  0x86   :  { %v74_v62 = vpop.permute.xlu0 %73  }
  0x87   :  { %76 = vst.msk [vmem:[#allocation0] sm:$0x1] %vm75_vm12, %v74_v62   ;;  %vm179_vm12 = vcmask 490928  }
  0x88   :  { %v93_v63 = vpop.permute.xlu1 %92  }
  0x89   :  { %96 = vst.msk [vmem:[#allocation0 + $0x1] sm:$0x1] %vm94_vm13, %v93_v63   ;;  %vm198_vm13 = vcmask 425328  }
  0x8a   :  { %v87_v0 = vpop.permute.xlu0 %86  }
  0x8b   :  { %89 = vst.msk [vmem:[#allocation0] sm:$0x1] %vm88_vm14, %v87_v0   ;;  %vm192_vm14 = vcmask 441728  }
  0x8c   :  { %v106_v1 = vpop.permute.xlu1 %105  }
  0x8d   :  { %109 = vst.msk [vmem:[#allocation0 + $0x1] sm:$0x1] %vm107_vm15, %v106_v1   ;;  %vm211_vm15 = vcmask 376128  }
  0x8e   :  { %v100_v2 = vpop.permute.xlu0 %99  }
  0x8f   :  { %102 = vst.msk [vmem:[#allocation0] sm:$0x1] %vm101_vm0, %v100_v2   ;;  %vm205_vm0 = vcmask 392528  }
  0x90   :  { %v119_v3 = vpop.permute.xlu1 %118  }
  0x91   :  { %122 = vst.msk [vmem:[#allocation0 + $0x1] sm:$0x1] %vm120_vm1, %v119_v3   ;;  %vm224_vm1 = vcmask 326928  }
  0x92   :  { %v113_v4 = vpop.permute.xlu0 %112  }
  0x93   :  { %115 = vst.msk [vmem:[#allocation0] sm:$0x1] %vm114_vm2, %v113_v4   ;;  %vm218_vm2 = vcmask 343328  }
  0x94   :  { %v132_v5 = vpop.permute.xlu1 %131  }
  0x95   :  { %135 = vst.msk [vmem:[#allocation0 + $0x1] sm:$0x1] %vm133_vm3, %v132_v5   ;;  %vm238_vm3 = vcmask 294128  }
  0x96   :  { %v126_v6 = vpop.permute.xlu0 %125  }
  0x97   :  { %128 = vst.msk [vmem:[#allocation0] sm:$0x1] %vm127_vm4, %v126_v6   ;;  %vm231_vm4 = vcmask 310528  }
  0x98   :  { %v145_v7 = vpop.permute.xlu1 %144  }
  0x99   :  { %148 = vst.msk [vmem:[#allocation0 + $0x1] sm:$0x1] %vm146_vm5, %v145_v7   ;;  %vm251_vm5 = vcmask 261328  }
  0x9a   :  { %v139_v8 = vpop.permute.xlu0 %138  }
  0x9b   :  { %141 = vst.msk [vmem:[#allocation0] sm:$0x1] %vm140_vm6, %v139_v8   ;;  %vm244_vm6 = vcmask 277728  }
  0x9c   :  { %v158_v9 = vpop.permute.xlu1 %157  }
  0x9d   :  { %161 = vst.msk [vmem:[#allocation0 + $0x1] sm:$0x1] %vm159_vm7, %v158_v9   ;;  %vm264_vm7 = vcmask 228528  }
  0x9e   :  { %v152_v10 = vpop.permute.xlu0 %151  }
  0x9f   :  { %154 = vst.msk [vmem:[#allocation0] sm:$0x1] %vm153_vm8, %v152_v10   ;;  %vm258_vm8 = vcmask 244928  }
  0xa0   :  { %v171_v11 = vpop.permute.xlu1 %170  }
  0xa1   :  { %174 = vst.msk [vmem:[#allocation0 + $0x1] sm:$0x1] %vm172_vm9, %v171_v11   ;;  %vm278_vm9 = vcmask 195728  }
  0xa2   :  { %v165_v12 = vpop.permute.xlu0 %164  }
  0xa3   :  { %167 = vst.msk [vmem:[#allocation0] sm:$0x1] %vm166_vm10, %v165_v12   ;;  %vm271_vm10 = vcmask 212128  }
  0xa4   :  { %v184_v13 = vpop.permute.xlu1 %183  }
  0xa5   :  { %187 = vst.msk [vmem:[#allocation0 + $0x1] sm:$0x1] %vm185_vm11, %v184_v13   ;;  %vm291_vm11 = vcmask 162928  }
  0xa6   :  { %v178_v14 = vpop.permute.xlu0 %177  }
  0xa7   :  { %180 = vst.msk [vmem:[#allocation0] sm:$0x1] %vm179_vm12, %v178_v14   ;;  %vm284_vm12 = vcmask 179328  }
  0xa8   :  { %v197_v15 = vpop.permute.xlu1 %196  }
  0xa9   :  { %200 = vst.msk [vmem:[#allocation0 + $0x1] sm:$0x1] %vm198_vm13, %v197_v15   ;;  %vm304_vm13 = vcmask 130128  }
  0xaa   :  { %v191_v16 = vpop.permute.xlu0 %190  }
  0xab   :  { %193 = vst.msk [vmem:[#allocation0] sm:$0x1] %vm192_vm14, %v191_v16   ;;  %vm298_vm14 = vcmask 146528  }
  0xac   :  { %v210_v17 = vpop.permute.xlu1 %209  }
  0xad   :  { %213 = vst.msk [vmem:[#allocation0 + $0x1] sm:$0x1] %vm211_vm15, %v210_v17   ;;  %vm318_vm15 = vcmask 97328  }
  0xae   :  { %v204_v18 = vpop.permute.xlu0 %203  }
  0xaf   :  { %206 = vst.msk [vmem:[#allocation0] sm:$0x1] %vm205_vm0, %v204_v18   ;;  %vm311_vm0 = vcmask 113728  }
  0xb0   :  { %v223_v19 = vpop.permute.xlu1 %222  }
  0xb1   :  { %226 = vst.msk [vmem:[#allocation0 + $0x1] sm:$0x1] %vm224_vm1, %v223_v19   ;;  %vm331_vm1 = vcmask 64528  }
  0xb2   :  { %v217_v20 = vpop.permute.xlu0 %216  }
  0xb3   :  { %219 = vst.msk [vmem:[#allocation0] sm:$0x1] %vm218_vm2, %v217_v20   ;;  %vm324_vm2 = vcmask 80928  }
  0xb4   :  { %v237_v21 = vpop.permute.xlu1 %236  }
  0xb5   :  { %239 = vst.msk [vmem:[#allocation0] sm:$0x1] %vm238_vm3, %v237_v21  }
  0xb6   :  { %v230_v22 = vpop.permute.xlu0 %229  }
  0xb7   :  { %233 = vst.msk [vmem:[#allocation0 + $0x2] sm:$0x1] %vm231_vm4, %v230_v22  }
  0xb8   :  { %v250_v23 = vpop.permute.xlu1 %249  }
  0xb9   :  { %253 = vst.msk [vmem:[#allocation0 + $0x2] sm:$0x1] %vm251_vm5, %v250_v23  }
  0xba   :  { %v243_v24 = vpop.permute.xlu0 %242  }
  0xbb   :  { %246 = vst.msk [vmem:[#allocation0 + $0x1] sm:$0x1] %vm244_vm6, %v243_v24  }
  0xbc   :  { %v263_v25 = vpop.permute.xlu1 %262  }
  0xbd   :  { %266 = vst.msk [vmem:[#allocation0 + $0x1] sm:$0x1] %vm264_vm7, %v263_v25  }
  0xbe   :  { %v257_v26 = vpop.permute.xlu0 %256  }
  0xbf   :  { %259 = vst.msk [vmem:[#allocation0] sm:$0x1] %vm258_vm8, %v257_v26  }
  0xc0   :  { %v277_v27 = vpop.permute.xlu1 %276  }
  0xc1   :  { %279 = vst.msk [vmem:[#allocation0] sm:$0x1] %vm278_vm9, %v277_v27  }
  0xc2   :  { %v270_v28 = vpop.permute.xlu0 %269  }
  0xc3   :  { %273 = vst.msk [vmem:[#allocation0 + $0x2] sm:$0x1] %vm271_vm10, %v270_v28  }
  0xc4   :  { %v290_v29 = vpop.permute.xlu1 %289  }
  0xc5   :  { %293 = vst.msk [vmem:[#allocation0 + $0x2] sm:$0x1] %vm291_vm11, %v290_v29  }
  0xc6   :  { %v283_v30 = vpop.permute.xlu0 %282  }
  0xc7   :  { %286 = vst.msk [vmem:[#allocation0 + $0x1] sm:$0x1] %vm284_vm12, %v283_v30  }
  0xc8   :  { %v303_v31 = vpop.permute.xlu1 %302  }
  0xc9   :  { %306 = vst.msk [vmem:[#allocation0 + $0x1] sm:$0x1] %vm304_vm13, %v303_v31  }
  0xca   :  { %v297_v32 = vpop.permute.xlu0 %296  }
  0xcb   :  { %299 = vst.msk [vmem:[#allocation0] sm:$0x1] %vm298_vm14, %v297_v32  }
  0xcc   :  { %v317_v33 = vpop.permute.xlu1 %316  }
  0xcd   :  { %319 = vst.msk [vmem:[#allocation0] sm:$0x1] %vm318_vm15, %v317_v33  }
  0xce   :  { %v310_v34 = vpop.permute.xlu0 %309  }
  0xcf   :  { %313 = vst.msk [vmem:[#allocation0 + $0x2] sm:$0x1] %vm311_vm0, %v310_v34  }
  0xd0   :  { %v330_v35 = vpop.permute.xlu1 %329  }
  0xd1   :  { %333 = vst.msk [vmem:[#allocation0 + $0x2] sm:$0x1] %vm331_vm1, %v330_v35  }
  0xd2   :  { %v323_v36 = vpop.permute.xlu0 %322  }
  0xd3   :  { %326 = vst.msk [vmem:[#allocation0 + $0x1] sm:$0x1] %vm324_vm2, %v323_v36  }
  0xda   :  { %v338_v37 = vld [vmem:[#allocation0] sm:$0xf] }
  0xdb   :  { %341 = vst [vmem:[%s659_s1] sm:$0xf] %v338_v37 }

// kernel: shadow_model_forward.1
= control target key start
LH: loop header
LB: loop body
LE: loop exit
PB: predicated region body
PF: predicated region fallthrough
CT: control target
= control target key end

     0   :  { %vm3583_vm0 = vcmask 130048   ;;  %vm6600_vm1 = vmmov 0   ;;  %vm4918_vm2 = vcmask 1043456   ;;  %vm4914_vm3 = vcmask 326656   ;;  %s8678_s1 = inlined_call_operand.vmem [shape: bf16[784,1536], index: 1, kind: input, shape index: {}]   ;;  %s8679_s0 = inlined_call_operand.vmem [shape: bf16[8,784], index: 0, kind: input, shape index: {}]   ;;  %s8680_s3 = inlined_call_operand.vmem [shape: bf16[384,40], index: 3, kind: input, shape index: {}]   ;;  %s8681_s2 = inlined_call_operand.vmem [shape: f32[1,384], index: 2, kind: input, shape index: {}]   ;;  %s8682_s5 = inlined_call_operand.vmem [shape: bf16[40,128], index: 5, kind: input, shape index: {}]   ;;  %s8683_s4 = inlined_call_operand.vmem [shape: f32[1,40], index: 4, kind: input, shape index: {}]   ;;  %s8684_s6 = inlined_call_operand.vmem [shape: f32[1,128], index: 6, kind: input, shape index: {}]   ;;  %s8685_s7 = inlined_call_operand.vmem [shape: f32[8,128], index: 7, kind: output, shape index: {}]  }
   0x1   :  { %v5676_v0 = vld [vmem:[%s8678_s1 + $0x2a4] ss:$48 sps:$4 sm:$0xff]   ;;  %v5680_v2 = vld [vmem:[%s8678_s1 + $0x2a0] ss:$48 sps:$4 sm:$0xff]   ;;  %v28_v48 = vld [vmem:[%s8679_s0 + $0x8] sm:$0xff] }
   0x2   :  { %v5678_v1 = vld [vmem:[%s8678_s1 + $0x8a4] ss:$48 sps:$4 sm:$0xff]   ;;  %3587 = vmatprep.subr.bf16.mxu0 %v5676_v0  ;;  %v5681_v3 = vld [vmem:[%s8678_s1 + $0x8a0] ss:$48 sps:$4 sm:$0xff]   ;;  %v6793_v51 = vcombine.high %v28_v48, %v28_v48 }
   0x3   :  { %3628 = vmatprep.subr.bf16.mxu1 %v5678_v1  ;;  %v5682_v4 = vld [vmem:[%s8678_s1 + $0x244] ss:$48 sps:$4 sm:$0xff]   ;;  %3588 = vmatpush1.bf16.msra.mxu0 %v5680_v2  ;;  %v5686_v6 = vld [vmem:[%s8678_s1 + $0x240] ss:$48 sps:$4 sm:$0xff]  }
   0x4   :  { %3629 = vmatpush1.bf16.msra.mxu1 %v5681_v3  ;;  %v5684_v5 = vld [vmem:[%s8678_s1 + $0x844] ss:$48 sps:$4 sm:$0xff]   ;;  %3589 = vmatprep.subr.bf16.mxu0 %v5682_v4  ;;  %v5687_v7 = vld [vmem:[%s8678_s1 + $0x840] ss:$48 sps:$4 sm:$0xff]  }
   0x5   :  { %3630 = vmatprep.subr.bf16.mxu1 %v5684_v5  ;;  %v5688_v8 = vld [vmem:[%s8678_s1 + $0x1e4] ss:$48 sps:$4 sm:$0xff]   ;;  %v5692_v10 = vld [vmem:[%s8678_s1 + $0x1e0] ss:$48 sps:$4 sm:$0xff]   ;;  %3660 = vmatprep.mubr.bf16.mxu1 %v6793_v51 }
   0x6   :  { %v5690_v9 = vld [vmem:[%s8678_s1 + $0x7e4] ss:$48 sps:$4 sm:$0xff]   ;;  %v5693_v11 = vld [vmem:[%s8678_s1 + $0x7e0] ss:$48 sps:$4 sm:$0xff]  }
   0x7   :  { %3590 = vmatpush1.bf16.msra.mxu0 %v5686_v6  ;;  %v5694_v12 = vld [vmem:[%s8678_s1 + $0x184] ss:$48 sps:$4 sm:$0xff]   ;;  %v5698_v14 = vld [vmem:[%s8678_s1 + $0x180] ss:$48 sps:$4 sm:$0xff]  }
   0x8   :  { %3631 = vmatpush1.bf16.msra.mxu1 %v5687_v7  ;;  %3591 = vmatprep.subr.bf16.mxu0 %v5688_v8  ;;  %v5696_v13 = vld [vmem:[%s8678_s1 + $0x784] ss:$48 sps:$4 sm:$0xff]   ;;  %v5699_v15 = vld [vmem:[%s8678_s1 + $0x780] ss:$48 sps:$4 sm:$0xff]   ;;  %v6853_v7 = vcombine.low %v28_v48, %v28_v48 }
   0x9   :  { %3632 = vmatprep.subr.bf16.mxu1 %v5690_v9  ;;  %v5700_v16 = vld [vmem:[%s8678_s1 + $0x124] ss:$48 sps:$4 sm:$0xff]   ;;  %v5704_v18 = vld [vmem:[%s8678_s1 + $0x120] ss:$48 sps:$4 sm:$0xff]  }
   0xa   :  { %v5702_v17 = vld [vmem:[%s8678_s1 + $0x724] ss:$48 sps:$4 sm:$0xff]   ;;  %v5705_v19 = vld [vmem:[%s8678_s1 + $0x720] ss:$48 sps:$4 sm:$0xff]  }
   0xb   :  { %3592 = vmatpush1.bf16.msra.mxu0 %v5692_v10  ;;  %v5706_v20 = vld [vmem:[%s8678_s1 + $0xc4] ss:$48 sps:$4 sm:$0xff]   ;;  %v5710_v22 = vld [vmem:[%s8678_s1 + $0xc0] ss:$48 sps:$4 sm:$0xff]  }
   0xc   :  { %3633 = vmatpush1.bf16.msra.mxu1 %v5693_v11  ;;  %3593 = vmatprep.subr.bf16.mxu0 %v5694_v12  ;;  %v5708_v21 = vld [vmem:[%s8678_s1 + $0x6c4] ss:$48 sps:$4 sm:$0xff]   ;;  %v5711_v23 = vld [vmem:[%s8678_s1 + $0x6c0] ss:$48 sps:$4 sm:$0xff]   ;;  %v5787_v11 = vld [vmem:[%s8678_s1 + $0x2ac] ss:$48 sps:$4 sm:$0xff]  }
   0xd   :  { %3634 = vmatprep.subr.bf16.mxu1 %v5696_v13  ;;  %v5712_v24 = vld [vmem:[%s8678_s1 + $0x64] ss:$48 sps:$4 sm:$0xff]   ;;  %v5716_v26 = vld [vmem:[%s8678_s1 + $0x60] ss:$48 sps:$4 sm:$0xff]   ;;  %v6598_v13 = vmov 0  }
   0xe   :  { %v5714_v25 = vld [vmem:[%s8678_s1 + $0x664] ss:$48 sps:$4 sm:$0xff]   ;;  %v5717_v27 = vld [vmem:[%s8678_s1 + $0x660] ss:$48 sps:$4 sm:$0xff]  }
   0xf   :  { %3594 = vmatpush1.bf16.msra.mxu0 %v5698_v14  ;;  %v5718_v28 = vld [vmem:[%s8678_s1 + $0x4] ss:$48 sps:$4 sm:$0xff]   ;;  %v5722_v30 = vld [vmem:[%s8678_s1] ss:$48 sps:$4 sm:$0xff]  }
  0x10   :  { %3635 = vmatpush1.bf16.msra.mxu1 %v5699_v15  ;;  %3595 = vmatprep.subr.bf16.mxu0 %v5700_v16  ;;  %v5720_v29 = vld [vmem:[%s8678_s1 + $0x604] ss:$48 sps:$4 sm:$0xff]   ;;  %v5723_v31 = vld [vmem:[%s8678_s1 + $0x600] ss:$48 sps:$4 sm:$0xff]   ;;  %v5785_v15 = vld [vmem:[%s8678_s1 + $0x2a8] ss:$48 sps:$4 sm:$0xff]  }
  0x11   :  { %3636 = vmatprep.subr.bf16.mxu1 %v5702_v17  ;;  %v5724_v32 = vld [vmem:[%s8678_s1 + $0x5a4] ss:$48 sps:$4 sm:$0xff]   ;;  %v5728_v34 = vld [vmem:[%s8678_s1 + $0x5a0] ss:$48 sps:$4 sm:$0xff]   ;;  %v6885_v17 = vld [vmem:[%s8679_s0 + $0x18] ss:$0 sps:$4 sm:$0xff]  }
  0x12   :  { %v5726_v33 = vld [vmem:[%s8678_s1 + $0xba4] ss:$48 sps:$4 sm:$0xff]   ;;  %v5729_v35 = vld [vmem:[%s8678_s1 + $0xba0] ss:$48 sps:$4 sm:$0xff]  }
  0x13   :  { %3596 = vmatpush1.bf16.msra.mxu0 %v5704_v18  ;;  %v5730_v36 = vld [vmem:[%s8678_s1 + $0x544] ss:$48 sps:$4 sm:$0xff]   ;;  %v5734_v38 = vld [vmem:[%s8678_s1 + $0x540] ss:$48 sps:$4 sm:$0xff]   ;;  %v5794_v18 = vld [vmem:[%s8678_s1 + $0x24c] ss:$48 sps:$4 sm:$0xff]  }
  0x14   :  { %3637 = vmatpush1.bf16.msra.mxu1 %v5705_v19  ;;  %3597 = vmatprep.subr.bf16.mxu0 %v5706_v20  ;;  %v5732_v37 = vld [vmem:[%s8678_s1 + $0xb44] ss:$48 sps:$4 sm:$0xff]   ;;  %v5735_v39 = vld [vmem:[%s8678_s1 + $0xb40] ss:$48 sps:$4 sm:$0xff]   ;;  %v5792_v20 = vld [vmem:[%s8678_s1 + $0x248] ss:$48 sps:$4 sm:$0xff]  }
  0x15   :  { %3638 = vmatprep.subr.bf16.mxu1 %v5708_v21  ;;  %v5736_v40 = vld [vmem:[%s8678_s1 + $0x4e4] ss:$48 sps:$4 sm:$0xff]   ;;  %v5740_v42 = vld [vmem:[%s8678_s1 + $0x4e0] ss:$48 sps:$4 sm:$0xff]  }
  0x16   :  { %v5738_v41 = vld [vmem:[%s8678_s1 + $0xae4] ss:$48 sps:$4 sm:$0xff]   ;;  %v5741_v43 = vld [vmem:[%s8678_s1 + $0xae0] ss:$48 sps:$4 sm:$0xff]  }
  0x17   :  { %3598 = vmatpush1.bf16.msra.mxu0 %v5710_v22  ;;  %v5742_v44 = vld [vmem:[%s8678_s1 + $0x484] ss:$48 sps:$4 sm:$0xff]   ;;  %v5746_v49 = vld [vmem:[%s8678_s1 + $0x480] ss:$48 sps:$4 sm:$0xff]   ;;  %v5800_v22 = vld [vmem:[%s8678_s1 + $0x1ec] ss:$48 sps:$4 sm:$0xff]  }
  0x18   :  { %3639 = vmatpush1.bf16.msra.mxu1 %v5711_v23  ;;  %3599 = vmatprep.subr.bf16.mxu0 %v5712_v24  ;;  %v5744_v45 = vld [vmem:[%s8678_s1 + $0xa84] ss:$48 sps:$4 sm:$0xff]   ;;  %v5747_v50 = vld [vmem:[%s8678_s1 + $0xa80] ss:$48 sps:$4 sm:$0xff]   ;;  %v5798_v24 = vld [vmem:[%s8678_s1 + $0x1e8] ss:$48 sps:$4 sm:$0xff]  }
  0x19   :  { %3640 = vmatprep.subr.bf16.mxu1 %v5714_v25  ;;  %v27_v46 = vld [vmem:[%s8679_s0] sm:$0xff] }
  0x1a   :  { %v6782_v47 = vcombine.high %v27_v46, %v27_v46  ;;  %v5748_v52 = vld [vmem:[%s8678_s1 + $0x424] ss:$48 sps:$4 sm:$0xff]   ;;  %v5752_v54 = vld [vmem:[%s8678_s1 + $0x420] ss:$48 sps:$4 sm:$0xff]   ;;  %v6851_v6 = vcombine.low %v27_v46, %v27_v46  ;;  %v5828_v46 = vld [vmem:[%s8678_s1 + $0x8] ss:$48 sps:$4 sm:$0xff]  }
  0x1b   :  { %3600 = vmatpush1.bf16.msra.mxu0 %v5716_v26  ;;  %v5750_v53 = vld [vmem:[%s8678_s1 + $0xa24] ss:$48 sps:$4 sm:$0xff]   ;;  %v5753_v55 = vld [vmem:[%s8678_s1 + $0xa20] ss:$48 sps:$4 sm:$0xff]   ;;  %v5806_v26 = vld [vmem:[%s8678_s1 + $0x18c] ss:$48 sps:$4 sm:$0xff]  }
  0x1c   :  { %3641 = vmatpush1.bf16.msra.mxu1 %v5717_v27  ;;  %3601 = vmatprep.subr.bf16.mxu0 %v5718_v28  ;;  %v5754_v56 = vld [vmem:[%s8678_s1 + $0x3c4] ss:$48 sps:$4 sm:$0xff]   ;;  %v5758_v58 = vld [vmem:[%s8678_s1 + $0x3c0] ss:$48 sps:$4 sm:$0xff]   ;;  %v5804_v28 = vld [vmem:[%s8678_s1 + $0x188] ss:$48 sps:$4 sm:$0xff]  }
  0x1d   :  { %3642 = vmatprep.subr.bf16.mxu1 %v5720_v29  ;;  %3619 = vmatprep.mubr.bf16.mxu0 %v6782_v47  ;;  %v5756_v57 = vld [vmem:[%s8678_s1 + $0x9c4] ss:$48 sps:$4 sm:$0xff]   ;;  %v5759_v59 = vld [vmem:[%s8678_s1 + $0x9c0] ss:$48 sps:$4 sm:$0xff]  }
  0x1e   :  { %v5760_v60 = vld [vmem:[%s8678_s1 + $0x364] ss:$48 sps:$4 sm:$0xff]   ;;  %v5764_v62 = vld [vmem:[%s8678_s1 + $0x360] ss:$48 sps:$4 sm:$0xff]  }
  0x1f   :  { %3602 = vmatpush1.bf16.msra.mxu0 %v5722_v30  ;;  %v5762_v61 = vld [vmem:[%s8678_s1 + $0x964] ss:$48 sps:$4 sm:$0xff]   ;;  %v5765_v63 = vld [vmem:[%s8678_s1 + $0x960] ss:$48 sps:$4 sm:$0xff]   ;;  %v5812_v30 = vld [vmem:[%s8678_s1 + $0x12c] ss:$48 sps:$4 sm:$0xff]  }
  0x20   :  { %3643 = vmatpush1.bf16.msra.mxu1 %v5723_v31  ;;  %3603 = vmatprep.subr.bf16.mxu0 %v5724_v32  ;;  %v5766_v0 = vld [vmem:[%s8678_s1 + $0x304] ss:$48 sps:$4 sm:$0xff]   ;;  %v5770_v2 = vld [vmem:[%s8678_s1 + $0x300] ss:$48 sps:$4 sm:$0xff]  }
  0x21   :  { %3644 = vmatprep.subr.bf16.mxu1 %v5726_v33  ;;  %v5768_v1 = vld [vmem:[%s8678_s1 + $0x904] ss:$48 sps:$4 sm:$0xff]   ;;  %v5771_v3 = vld [vmem:[%s8678_s1 + $0x900] ss:$48 sps:$4 sm:$0xff]  }
  0x22   :  { %v5778_v4 = vld [vmem:[%s8678_s1 + $0xea4] ss:$48 sps:$4 sm:$0xff]   ;;  %v5776_v8 = vld [vmem:[%s8678_s1 + $0xea0] ss:$48 sps:$4 sm:$0xff]  }
  0x23   :  { %3604 = vmatpush2.bf16.msra.mxu0 %v5728_v34  ;;  %v5781_v5 = vld [vmem:[%s8678_s1 + $0x1204] ss:$48 sps:$4 sm:$0xff]   ;;  %v5779_v9 = vld [vmem:[%s8678_s1 + $0x1200] ss:$48 sps:$4 sm:$0xff]   ;;  %v5810_v34 = vld [vmem:[%s8678_s1 + $0x128] ss:$48 sps:$4 sm:$0xff]  }
  0x24   :  { %3645 = vmatpush2.bf16.msra.mxu1 %v5729_v35  ;;  %3605 = vmatprep.subr.bf16.mxu0 %v5730_v36  ;;  %v5784_v10 = vld [vmem:[%s8678_s1 + $0xe44] ss:$48 sps:$4 sm:$0xff]   ;;  %v5782_v12 = vld [vmem:[%s8678_s1 + $0xe40] ss:$48 sps:$4 sm:$0xff]   ;;  %v5818_v36 = vld [vmem:[%s8678_s1 + $0xcc] ss:$48 sps:$4 sm:$0xff]  }
  0x25   :  { %3646 = vmatprep.subr.bf16.mxu1 %v5732_v37  ;;  %v5790_v14 = vld [vmem:[%s8678_s1 + $0xde4] ss:$48 sps:$4 sm:$0xff]   ;;  %v5788_v16 = vld [vmem:[%s8678_s1 + $0xde0] ss:$48 sps:$4 sm:$0xff]  }
  0x26   :  { %v5797_v19 = vld [vmem:[%s8678_s1 + $0xd84] ss:$48 sps:$4 sm:$0xff]   ;;  %v5795_v21 = vld [vmem:[%s8678_s1 + $0xd80] ss:$48 sps:$4 sm:$0xff]  }
  0x27   :  { %3606 = vmatpush2.bf16.msra.mxu0 %v5734_v38  ;;  %v5803_v23 = vld [vmem:[%s8678_s1 + $0xd24] ss:$48 sps:$4 sm:$0xff]   ;;  %v5801_v25 = vld [vmem:[%s8678_s1 + $0xd20] ss:$48 sps:$4 sm:$0xff]   ;;  %v5816_v38 = vld [vmem:[%s8678_s1 + $0xc8] ss:$48 sps:$4 sm:$0xff]  }
  0x28   :  { %3647 = vmatpush2.bf16.msra.mxu1 %v5735_v39  ;;  %3607 = vmatprep.subr.bf16.mxu0 %v5736_v40  ;;  %v5809_v27 = vld [vmem:[%s8678_s1 + $0xcc4] ss:$48 sps:$4 sm:$0xff]   ;;  %v5807_v29 = vld [vmem:[%s8678_s1 + $0xcc0] ss:$48 sps:$4 sm:$0xff]   ;;  %v5824_v40 = vld [vmem:[%s8678_s1 + $0x6c] ss:$48 sps:$4 sm:$0xff]  }
  0x29   :  { %3648 = vmatprep.subr.bf16.mxu1 %v5738_v41  ;;  %v5815_v31 = vld [vmem:[%s8678_s1 + $0xc64] ss:$48 sps:$4 sm:$0xff]   ;;  %v5813_v35 = vld [vmem:[%s8678_s1 + $0xc60] ss:$48 sps:$4 sm:$0xff]  }
  0x2a   :  { %v6935_v32 = vld [vmem:[%s8679_s0 + $0x10] sm:$0xff] }
  0x2b   :  { %3608 = vmatpush2.bf16.msra.mxu0 %v5740_v42  ;;  %v6939_v33 = vcombine.high %v6935_v32, %v6935_v32  ;;  %v5821_v37 = vld [vmem:[%s8678_s1 + $0xc04] ss:$48 sps:$4 sm:$0xff]   ;;  %v5819_v39 = vld [vmem:[%s8678_s1 + $0xc00] ss:$48 sps:$4 sm:$0xff]   ;;  %v5822_v42 = vld [vmem:[%s8678_s1 + $0x68] ss:$48 sps:$4 sm:$0xff]  }
  0x2c   :  { %3649 = vmatpush2.bf16.msra.mxu1 %v5741_v43  ;;  %3609 = vmatprep.subr.bf16.mxu0 %v5742_v44  ;;  %v5827_v41 = vld [vmem:[%s8678_s1 + $0x11a4] ss:$48 sps:$4 sm:$0xff]   ;;  %v5825_v43 = vld [vmem:[%s8678_s1 + $0x11a0] ss:$48 sps:$4 sm:$0xff]   ;;  %v5830_v44 = vld [vmem:[%s8678_s1 + $0xc] ss:$48 sps:$4 sm:$0xff]  }
  0x2d   :  { %3650 = vmatprep.subr.bf16.mxu1 %v5744_v45  ;;  %v5833_v45 = vld [vmem:[%s8678_s1 + $0x1144] ss:$48 sps:$4 sm:$0xff]   ;;  %v5831_v48 = vld [vmem:[%s8678_s1 + $0x1140] ss:$48 sps:$4 sm:$0xff]  }
  0x2f   :  { %3610 = vmatpush2.bf16.msra.mxu0 %v5746_v49  ;;  %v5836_v49 = vld [vmem:[%s8678_s1 + $0x5ac] ss:$48 sps:$4 sm:$0xff]  }
  0x30   :  { %3651 = vmatpush2.bf16.msra.mxu1 %v5747_v50  ;;  %3611 = vmatprep.subr.bf16.mxu0 %v5748_v52  ;;  %v5839_v50 = vld [vmem:[%s8678_s1 + $0x10e4] ss:$48 sps:$4 sm:$0xff]   ;;  %v5834_v52 = vld [vmem:[%s8678_s1 + $0x5a8] ss:$48 sps:$4 sm:$0xff]  }
  0x31   :  { %3652 = vmatprep.subr.bf16.mxu1 %v5750_v53  ;;  %v5837_v53 = vld [vmem:[%s8678_s1 + $0x10e0] ss:$48 sps:$4 sm:$0xff]  }
  0x33   :  { %3612 = vmatpush2.bf16.msra.mxu0 %v5752_v54  ;;  %v5842_v54 = vld [vmem:[%s8678_s1 + $0x54c] ss:$48 sps:$4 sm:$0xff]  }
  0x34   :  { %3653 = vmatpush2.bf16.msra.mxu1 %v5753_v55  ;;  %3613 = vmatprep.subr.bf16.mxu0 %v5754_v56  ;;  %v5845_v55 = vld [vmem:[%s8678_s1 + $0x1084] ss:$48 sps:$4 sm:$0xff]   ;;  %v5840_v56 = vld [vmem:[%s8678_s1 + $0x548] ss:$48 sps:$4 sm:$0xff]  }
  0x35   :  { %3654 = vmatprep.subr.bf16.mxu1 %v5756_v57  ;;  %v5843_v57 = vld [vmem:[%s8678_s1 + $0x1080] ss:$48 sps:$4 sm:$0xff]  }
  0x37   :  { %3614 = vmatpush2.bf16.msra.mxu0 %v5758_v58  ;;  %v5848_v58 = vld [vmem:[%s8678_s1 + $0x4ec] ss:$48 sps:$4 sm:$0xff]  }
  0x38   :  { %3655 = vmatpush2.bf16.msra.mxu1 %v5759_v59  ;;  %3615 = vmatprep.subr.bf16.mxu0 %v5760_v60  ;;  %v5851_v59 = vld [vmem:[%s8678_s1 + $0x1024] ss:$48 sps:$4 sm:$0xff]   ;;  %v5846_v60 = vld [vmem:[%s8678_s1 + $0x4e8] ss:$48 sps:$4 sm:$0xff]  }
  0x39   :  { %3656 = vmatprep.subr.bf16.mxu1 %v5762_v61  ;;  %v5849_v61 = vld [vmem:[%s8678_s1 + $0x1020] ss:$48 sps:$4 sm:$0xff]  }
  0x3b   :  { %3616 = vmatpush2.bf16.msra.mxu0 %v5764_v62  ;;  %v5854_v62 = vld [vmem:[%s8678_s1 + $0x48c] ss:$48 sps:$4 sm:$0xff]  }
  0x3c   :  { %3657 = vmatpush2.bf16.msra.mxu1 %v5765_v63  ;;  %3617 = vmatprep.subr.bf16.mxu0 %v5766_v0  ;;  %v5857_v63 = vld [vmem:[%s8678_s1 + $0xfc4] ss:$48 sps:$4 sm:$0xff]   ;;  %v5852_v0 = vld [vmem:[%s8678_s1 + $0x488] ss:$48 sps:$4 sm:$0xff]  }
  0x3d   :  { %3658 = vmatprep.subr.bf16.mxu1 %v5768_v1  ;;  %v5855_v1 = vld [vmem:[%s8678_s1 + $0xfc0] ss:$48 sps:$4 sm:$0xff]  }
  0x3f   :  { %3618 = vmatpush2.bf16.msra.mxu0 %v5770_v2  ;;  %v5860_v2 = vld [vmem:[%s8678_s1 + $0x42c] ss:$48 sps:$4 sm:$0xff]  }
  0x40   :  { %3659 = vmatpush2.bf16.msra.mxu1 %v5771_v3  ;;  %3669 = vmatprep.subr.bf16.mxu0 %v5778_v4  ;;  %v5863_v3 = vld [vmem:[%s8678_s1 + $0xf64] ss:$48 sps:$4 sm:$0xff]   ;;  %v5858_v4 = vld [vmem:[%s8678_s1 + $0x428] ss:$48 sps:$4 sm:$0xff]  }
  0x41   :  { %3724 = vmatprep.subr.bf16.mxu1 %v5781_v5  ;;  %v5861_v5 = vld [vmem:[%s8678_s1 + $0xf60] ss:$48 sps:$4 sm:$0xff]  }
  0x42   :  { %3620 = vmatmul.mubr.bf16.vlgmr.msra.gmra.mxu0 %v6851_v6 }
  0x43   :  { %3661 = vmatmul.mubr.bf16.vlgmr.msra.gmra.mxu1 %v6853_v7  ;;  %3670 = vmatpush1.bf16.msra.mxu0 %v5776_v8  ;;  %v5866_v8 = vld [vmem:[%s8678_s1 + $0x3cc] ss:$48 sps:$4 sm:$0xff]  }
  0x44   :  { %3725 = vmatpush1.bf16.msra.mxu1 %v5779_v9  ;;  %3671 = vmatprep.subr.bf16.mxu0 %v5784_v10  ;;  %v5869_v9 = vld [vmem:[%s8678_s1 + $0xf04] ss:$48 sps:$4 sm:$0xff]   ;;  %v5864_v10 = vld [vmem:[%s8678_s1 + $0x3c8] ss:$48 sps:$4 sm:$0xff]  }
  0x45   :  { %3742 = vmatprep.mubr.bf16.mxu1 %v6598_v13  ;;  %3751 = vmatprep.subr.bf16.mxu1 %v5787_v11  ;;  %v5867_v11 = vld [vmem:[%s8678_s1 + $0xf00] ss:$48 sps:$4 sm:$0xff]  }
  0x46   :  { %3701 = vmatprep.mubr.bf16.mxu0 %v6939_v33 }
  0x47   :  { %3672 = vmatpush1.bf16.msra.mxu0 %v5782_v12  ;;  %v5873_v12 = vld [vmem:[%s8678_s1 + $0x36c] ss:$48 sps:$4 sm:$0xff]  }
  0x48   :  { %3673 = vmatprep.subr.bf16.mxu0 %v5790_v14  ;;  %v5877_v14 = vld [vmem:[%s8678_s1 + $0x8ac] ss:$48 sps:$4 sm:$0xff]  }
  0x4b   :  { %5572 = vmatmul.mubr.msk.bf16.vlgmr.msra.gmra.mxu1 %vm3583_vm0, %v6885_v17  ;;  %3674 = vmatpush1.bf16.msra.mxu0 %v5788_v16  ;;  %v7067_v16 = vcombine.low %v6935_v32, %v6935_v32  ;;  %v5901_v32 = vld [vmem:[%s8678_s1 + $0x72c] ss:$48 sps:$4 sm:$0xff]  }
  0x4c   :  { %3752 = vmatpush1.bf16.msra.mxu1 %v5785_v15  ;;  %3675 = vmatprep.subr.bf16.mxu0 %v5797_v19  ;;  %v5871_v15 = vld [vmem:[%s8678_s1 + $0x368] ss:$48 sps:$4 sm:$0xff]   ;;  %v5880_v19 = vld [vmem:[%s8678_s1 + $0x30c] ss:$48 sps:$4 sm:$0xff]  }
  0x4d   :  { %3753 = vmatprep.subr.bf16.mxu1 %v5794_v18  ;;  %3783 = vmatprep.mubr.bf16.mxu1 %v6782_v47  ;;  %v5875_v18 = vld [vmem:[%s8678_s1 + $0x8a8] ss:$48 sps:$4 sm:$0xff]  }
  0x4f   :  { %3676 = vmatpush1.bf16.msra.mxu0 %v5795_v21  ;;  %v5878_v21 = vld [vmem:[%s8678_s1 + $0x308] ss:$48 sps:$4 sm:$0xff]  }
  0x50   :  { %3754 = vmatpush1.bf16.msra.mxu1 %v5792_v20  ;;  %3677 = vmatprep.subr.bf16.mxu0 %v5803_v23  ;;  %v5883_v20 = vld [vmem:[%s8678_s1 + $0x84c] ss:$48 sps:$4 sm:$0xff]  }
  0x51   :  { %3755 = vmatprep.subr.bf16.mxu1 %v5800_v22  ;;  %v5881_v22 = vld [vmem:[%s8678_s1 + $0x848] ss:$48 sps:$4 sm:$0xff]   ;;  %v5886_v23 = vld [vmem:[%s8678_s1 + $0xeac] ss:$48 sps:$4 sm:$0xff]  }
  0x53   :  { %3678 = vmatpush1.bf16.msra.mxu0 %v5801_v25  ;;  %v5884_v25 = vld [vmem:[%s8678_s1 + $0xea8] ss:$48 sps:$4 sm:$0xff]  }
  0x54   :  { %3756 = vmatpush1.bf16.msra.mxu1 %v5798_v24  ;;  %3679 = vmatprep.subr.bf16.mxu0 %v5809_v27  ;;  %v5889_v24 = vld [vmem:[%s8678_s1 + $0x7ec] ss:$48 sps:$4 sm:$0xff]  }
  0x55   :  { %3757 = vmatprep.subr.bf16.mxu1 %v5806_v26  ;;  %v5887_v26 = vld [vmem:[%s8678_s1 + $0x7e8] ss:$48 sps:$4 sm:$0xff]   ;;  %v5892_v27 = vld [vmem:[%s8678_s1 + $0xe4c] ss:$48 sps:$4 sm:$0xff]  }
  0x57   :  { %3680 = vmatpush1.bf16.msra.mxu0 %v5807_v29  ;;  %v5890_v29 = vld [vmem:[%s8678_s1 + $0xe48] ss:$48 sps:$4 sm:$0xff]  }
  0x58   :  { %3758 = vmatpush1.bf16.msra.mxu1 %v5804_v28  ;;  %3681 = vmatprep.subr.bf16.mxu0 %v5815_v31  ;;  %v5895_v28 = vld [vmem:[%s8678_s1 + $0x78c] ss:$48 sps:$4 sm:$0xff]  }
  0x59   :  { %3759 = vmatprep.subr.bf16.mxu1 %v5812_v30  ;;  %v5893_v30 = vld [vmem:[%s8678_s1 + $0x788] ss:$48 sps:$4 sm:$0xff]   ;;  %v5898_v31 = vld [vmem:[%s8678_s1 + $0xdec] ss:$48 sps:$4 sm:$0xff]  }
  0x5b   :  { %3682 = vmatpush1.bf16.msra.mxu0 %v5813_v35  ;;  %v5899_v35 = vld [vmem:[%s8678_s1 + $0x728] ss:$48 sps:$4 sm:$0xff]  }
  0x5c   :  { %3760 = vmatpush1.bf16.msra.mxu1 %v5810_v34  ;;  %3683 = vmatprep.subr.bf16.mxu0 %v5821_v37  ;;  %v5896_v34 = vld [vmem:[%s8678_s1 + $0xde8] ss:$48 sps:$4 sm:$0xff]   ;;  %v5907_v37 = vld [vmem:[%s8678_s1 + $0x6cc] ss:$48 sps:$4 sm:$0xff]  }
  0x5d   :  { %3761 = vmatprep.subr.bf16.mxu1 %v5818_v36  ;;  %v5904_v36 = vld [vmem:[%s8678_s1 + $0xd8c] ss:$48 sps:$4 sm:$0xff]  }
  0x5f   :  { %3684 = vmatpush1.bf16.msra.mxu0 %v5819_v39  ;;  %v5905_v39 = vld [vmem:[%s8678_s1 + $0x6c8] ss:$48 sps:$4 sm:$0xff]  }
  0x60   :  { %3762 = vmatpush1.bf16.msra.mxu1 %v5816_v38  ;;  %3685 = vmatprep.subr.bf16.mxu0 %v5827_v41  ;;  %v5902_v38 = vld [vmem:[%s8678_s1 + $0xd88] ss:$48 sps:$4 sm:$0xff]   ;;  %v5913_v41 = vld [vmem:[%s8678_s1 + $0x66c] ss:$48 sps:$4 sm:$0xff]  }
  0x61   :  { %3763 = vmatprep.subr.bf16.mxu1 %v5824_v40  ;;  %v5910_v40 = vld [vmem:[%s8678_s1 + $0xd2c] ss:$48 sps:$4 sm:$0xff]  }
  0x63   :  { %3686 = vmatpush2.bf16.msra.mxu0 %v5825_v43  ;;  %v5911_v43 = vld [vmem:[%s8678_s1 + $0x668] ss:$48 sps:$4 sm:$0xff]  }
  0x64   :  { %3764 = vmatpush1.bf16.msra.mxu1 %v5822_v42  ;;  %3687 = vmatprep.subr.bf16.mxu0 %v5833_v45  ;;  %v5908_v42 = vld [vmem:[%s8678_s1 + $0xd28] ss:$48 sps:$4 sm:$0xff]   ;;  %v5919_v45 = vld [vmem:[%s8678_s1 + $0x60c] ss:$48 sps:$4 sm:$0xff]  }
  0x65   :  { %3765 = vmatprep.subr.bf16.mxu1 %v5830_v44  ;;  %v5916_v44 = vld [vmem:[%s8678_s1 + $0xccc] ss:$48 sps:$4 sm:$0xff]  }
  0x67   :  { %3688 = vmatpush2.bf16.msra.mxu0 %v5831_v48  ;;  %v5917_v48 = vld [vmem:[%s8678_s1 + $0x608] ss:$48 sps:$4 sm:$0xff]  }
  0x68   :  { %3766 = vmatpush1.bf16.msra.mxu1 %v5828_v46  ;;  %3689 = vmatprep.subr.bf16.mxu0 %v5839_v50  ;;  %v5914_v46 = vld [vmem:[%s8678_s1 + $0xcc8] ss:$48 sps:$4 sm:$0xff]   ;;  %v5925_v50 = vld [vmem:[%s8678_s1 + $0xbac] ss:$48 sps:$4 sm:$0xff]  }
  0x69   :  { %3767 = vmatprep.subr.bf16.mxu1 %v5836_v49  ;;  %v5922_v49 = vld [vmem:[%s8678_s1 + $0xc6c] ss:$48 sps:$4 sm:$0xff]  }
  0x6b   :  { %3690 = vmatpush2.bf16.msra.mxu0 %v5837_v53  ;;  %v5923_v53 = vld [vmem:[%s8678_s1 + $0xba8] ss:$48 sps:$4 sm:$0xff]  }
  0x6c   :  { %3768 = vmatpush2.bf16.msra.mxu1 %v5834_v52  ;;  %3691 = vmatprep.subr.bf16.mxu0 %v5845_v55  ;;  %v5920_v52 = vld [vmem:[%s8678_s1 + $0xc68] ss:$48 sps:$4 sm:$0xff]   ;;  %v5931_v55 = vld [vmem:[%s8678_s1 + $0xb4c] ss:$48 sps:$4 sm:$0xff]  }
  0x6d   :  { %3769 = vmatprep.subr.bf16.mxu1 %v5842_v54  ;;  %v5928_v54 = vld [vmem:[%s8678_s1 + $0xc0c] ss:$48 sps:$4 sm:$0xff]  }
  0x6f   :  { %3692 = vmatpush2.bf16.msra.mxu0 %v5843_v57  ;;  %v5929_v57 = vld [vmem:[%s8678_s1 + $0xb48] ss:$48 sps:$4 sm:$0xff]  }
  0x70   :  { %3770 = vmatpush2.bf16.msra.mxu1 %v5840_v56  ;;  %3693 = vmatprep.subr.bf16.mxu0 %v5851_v59  ;;  %v5926_v56 = vld [vmem:[%s8678_s1 + $0xc08] ss:$48 sps:$4 sm:$0xff]   ;;  %v5937_v59 = vld [vmem:[%s8678_s1 + $0xaec] ss:$48 sps:$4 sm:$0xff]  }
  0x71   :  { %3771 = vmatprep.subr.bf16.mxu1 %v5848_v58  ;;  %v5934_v58 = vld [vmem:[%s8678_s1 + $0x11ac] ss:$48 sps:$4 sm:$0xff]  }
  0x73   :  { %3694 = vmatpush2.bf16.msra.mxu0 %v5849_v61  ;;  %v5935_v61 = vld [vmem:[%s8678_s1 + $0xae8] ss:$48 sps:$4 sm:$0xff]  }
  0x74   :  { %3772 = vmatpush2.bf16.msra.mxu1 %v5846_v60  ;;  %3695 = vmatprep.subr.bf16.mxu0 %v5857_v63  ;;  %v5932_v60 = vld [vmem:[%s8678_s1 + $0x11a8] ss:$48 sps:$4 sm:$0xff]   ;;  %v5943_v63 = vld [vmem:[%s8678_s1 + $0xa8c] ss:$48 sps:$4 sm:$0xff]  }
  0x75   :  { %3773 = vmatprep.subr.bf16.mxu1 %v5854_v62  ;;  %v5940_v62 = vld [vmem:[%s8678_s1 + $0x114c] ss:$48 sps:$4 sm:$0xff]  }
  0x77   :  { %3696 = vmatpush2.bf16.msra.mxu0 %v5855_v1  ;;  %v5941_v1 = vld [vmem:[%s8678_s1 + $0xa88] ss:$48 sps:$4 sm:$0xff]  }
  0x78   :  { %3774 = vmatpush2.bf16.msra.mxu1 %v5852_v0  ;;  %3697 = vmatprep.subr.bf16.mxu0 %v5863_v3  ;;  %v5938_v0 = vld [vmem:[%s8678_s1 + $0x1148] ss:$48 sps:$4 sm:$0xff]   ;;  %v5949_v3 = vld [vmem:[%s8678_s1 + $0xa2c] ss:$48 sps:$4 sm:$0xff]  }
  0x79   :  { %3775 = vmatprep.subr.bf16.mxu1 %v5860_v2  ;;  %v5946_v2 = vld [vmem:[%s8678_s1 + $0x10ec] ss:$48 sps:$4 sm:$0xff]  }
  0x7b   :  { %3698 = vmatpush2.bf16.msra.mxu0 %v5861_v5  ;;  %v5947_v5 = vld [vmem:[%s8678_s1 + $0xa28] ss:$48 sps:$4 sm:$0xff]  }
  0x7c   :  { %3776 = vmatpush2.bf16.msra.mxu1 %v5858_v4  ;;  %3699 = vmatprep.subr.bf16.mxu0 %v5869_v9  ;;  %v5944_v4 = vld [vmem:[%s8678_s1 + $0x10e8] ss:$48 sps:$4 sm:$0xff]   ;;  %v5955_v9 = vld [vmem:[%s8678_s1 + $0x9cc] ss:$48 sps:$4 sm:$0xff]  }
  0x7d   :  { %3777 = vmatprep.subr.bf16.mxu1 %v5866_v8  ;;  %v5952_v8 = vld [vmem:[%s8678_s1 + $0x108c] ss:$48 sps:$4 sm:$0xff]  }
  0x7f   :  { %3700 = vmatpush2.bf16.msra.mxu0 %v5867_v11  ;;  %v5953_v11 = vld [vmem:[%s8678_s1 + $0x9c8] ss:$48 sps:$4 sm:$0xff]  }
  0x80   :  { %3778 = vmatpush2.bf16.msra.mxu1 %v5864_v10  ;;  %3792 = vmatprep.subr.bf16.mxu0 %v5877_v14  ;;  %v5950_v10 = vld [vmem:[%s8678_s1 + $0x1088] ss:$48 sps:$4 sm:$0xff]   ;;  %v5961_v14 = vld [vmem:[%s8678_s1 + $0x96c] ss:$48 sps:$4 sm:$0xff]  }
  0x81   :  { %3779 = vmatprep.subr.bf16.mxu1 %v5873_v12  ;;  %v5958_v12 = vld [vmem:[%s8678_s1 + $0x102c] ss:$48 sps:$4 sm:$0xff]  }
  0x82   :  { %3702 = vmatmul.mubr.bf16.vlgmr.msra.gmra.mxu0 %v7067_v16 }
  0x83   :  { %3793 = vmatpush1.bf16.msra.mxu0 %v5875_v18  ;;  %3824 = vmatprep.mubr.bf16.mxu0 %v6793_v51  ;;  %v5959_v18 = vld [vmem:[%s8678_s1 + $0x968] ss:$48 sps:$4 sm:$0xff]  }
  0x84   :  { %3780 = vmatpush2.bf16.msra.mxu1 %v5871_v15  ;;  %3794 = vmatprep.subr.bf16.mxu0 %v5883_v20  ;;  %v5956_v15 = vld [vmem:[%s8678_s1 + $0x1028] ss:$48 sps:$4 sm:$0xff]   ;;  %v5967_v20 = vld [vmem:[%s8678_s1 + $0x90c] ss:$48 sps:$4 sm:$0xff]  }
  0x85   :  { %3781 = vmatprep.subr.bf16.mxu1 %v5880_v19  ;;  %v5964_v19 = vld [vmem:[%s8678_s1 + $0xfcc] ss:$48 sps:$4 sm:$0xff]  }
  0x87   :  { %3795 = vmatpush1.bf16.msra.mxu0 %v5881_v22  ;;  %v5965_v22 = vld [vmem:[%s8678_s1 + $0x908] ss:$48 sps:$4 sm:$0xff]  }
  0x88   :  { %3782 = vmatpush2.bf16.msra.mxu1 %v5878_v21  ;;  %3796 = vmatprep.subr.bf16.mxu0 %v5889_v24  ;;  %v5962_v21 = vld [vmem:[%s8678_s1 + $0xfc8] ss:$48 sps:$4 sm:$0xff]   ;;  %v5973_v24 = vld [vmem:[%s8678_s1 + $0x2b4] ss:$48 sps:$4 sm:$0xff]  }
  0x89   :  { %3833 = vmatprep.subr.bf16.mxu1 %v5886_v23  ;;  %v5970_v23 = vld [vmem:[%s8678_s1 + $0xf6c] ss:$48 sps:$4 sm:$0xff]  }
  0x8b   :  { %3784 = vmatmul.mubr.bf16.vlgmr.msra.gmra.mxu1 %v6851_v6  ;;  %3797 = vmatpush1.bf16.msra.mxu0 %v5887_v26  ;;  %v5971_v26 = vld [vmem:[%s8678_s1 + $0x2b0] ss:$48 sps:$4 sm:$0xff]  }
  0x8c   :  { %3834 = vmatpush1.bf16.msra.mxu1 %v5884_v25  ;;  %3798 = vmatprep.subr.bf16.mxu0 %v5895_v28  ;;  %v5968_v25 = vld [vmem:[%s8678_s1 + $0xf68] ss:$48 sps:$4 sm:$0xff]   ;;  %v5979_v28 = vld [vmem:[%s8678_s1 + $0x254] ss:$48 sps:$4 sm:$0xff]  }
  0x8d   :  { %3835 = vmatprep.subr.bf16.mxu1 %v5892_v27  ;;  %3865 = vmatprep.mubr.bf16.mxu1 %v6939_v33  ;;  %v5976_v27 = vld [vmem:[%s8678_s1 + $0xf0c] ss:$48 sps:$4 sm:$0xff]  }
  0x8f   :  { %3799 = vmatpush1.bf16.msra.mxu0 %v5893_v30  ;;  %v5977_v30 = vld [vmem:[%s8678_s1 + $0x250] ss:$48 sps:$4 sm:$0xff]  }
  0x90   :  { %3836 = vmatpush1.bf16.msra.mxu1 %v5890_v29  ;;  %3800 = vmatprep.subr.bf16.mxu0 %v5901_v32  ;;  %v5974_v29 = vld [vmem:[%s8678_s1 + $0xf08] ss:$48 sps:$4 sm:$0xff]   ;;  %v5985_v32 = vld [vmem:[%s8678_s1 + $0x1f4] ss:$48 sps:$4 sm:$0xff]  }
  0x91   :  { %3837 = vmatprep.subr.bf16.mxu1 %v5898_v31  ;;  %v5982_v31 = vld [vmem:[%s8678_s1 + $0x120c] ss:$48 sps:$4 sm:$0xff]  }
  0x93   :  { %3801 = vmatpush1.bf16.msra.mxu0 %v5899_v35  ;;  %v5983_v35 = vld [vmem:[%s8678_s1 + $0x1f0] ss:$48 sps:$4 sm:$0xff]  }
  0x94   :  { %3838 = vmatpush1.bf16.msra.mxu1 %v5896_v34  ;;  %3802 = vmatprep.subr.bf16.mxu0 %v5907_v37  ;;  %v5980_v34 = vld [vmem:[%s8678_s1 + $0x1208] ss:$48 sps:$4 sm:$0xff]   ;;  %v5991_v37 = vld [vmem:[%s8678_s1 + $0x8b4] ss:$48 sps:$4 sm:$0xff]  }
  0x95   :  { %3839 = vmatprep.subr.bf16.mxu1 %v5904_v36  ;;  %v5988_v36 = vld [vmem:[%s8678_s1 + $0x194] ss:$48 sps:$4 sm:$0xff]  }
  0x97   :  { %3803 = vmatpush1.bf16.msra.mxu0 %v5905_v39  ;;  %v5994_v39 = vld [vmem:[%s8678_s1 + $0x134] ss:$48 sps:$4 sm:$0xff]  }
  0x98   :  { %3840 = vmatpush1.bf16.msra.mxu1 %v5902_v38  ;;  %3804 = vmatprep.subr.bf16.mxu0 %v5913_v41  ;;  %v5986_v38 = vld [vmem:[%s8678_s1 + $0x190] ss:$48 sps:$4 sm:$0xff]  }
  0x99   :  { %3841 = vmatprep.subr.bf16.mxu1 %v5910_v40  ;;  %v5989_v40 = vld [vmem:[%s8678_s1 + $0x8b0] ss:$48 sps:$4 sm:$0xff]  }
  0x9a   :  { %v5992_v41 = vld [vmem:[%s8678_s1 + $0x130] ss:$48 sps:$4 sm:$0xff]  }
  0x9b   :  { %3805 = vmatpush1.bf16.msra.mxu0 %v5911_v43  ;;  %v6000_v43 = vld [vmem:[%s8678_s1 + $0xd4] ss:$48 sps:$4 sm:$0xff]  }
  0x9c   :  { %3842 = vmatpush1.bf16.msra.mxu1 %v5908_v42  ;;  %3806 = vmatprep.subr.bf16.mxu0 %v5919_v45  ;;  %v5997_v42 = vld [vmem:[%s8678_s1 + $0x854] ss:$48 sps:$4 sm:$0xff]   ;;  %v5998_v45 = vld [vmem:[%s8678_s1 + $0xd0] ss:$48 sps:$4 sm:$0xff]  }
  0x9d   :  { %3843 = vmatprep.subr.bf16.mxu1 %v5916_v44  ;;  %v5995_v44 = vld [vmem:[%s8678_s1 + $0x850] ss:$48 sps:$4 sm:$0xff]  }
  0x9f   :  { %3807 = vmatpush1.bf16.msra.mxu0 %v5917_v48  ;;  %v6001_v48 = vld [vmem:[%s8678_s1 + $0x7f0] ss:$48 sps:$4 sm:$0xff]  }
  0xa0   :  { %3844 = vmatpush1.bf16.msra.mxu1 %v5914_v46  ;;  %3808 = vmatprep.subr.bf16.mxu0 %v5925_v50  ;;  %v6003_v46 = vld [vmem:[%s8678_s1 + $0x7f4] ss:$48 sps:$4 sm:$0xff]  }
  0xa1   :  { %3845 = vmatprep.subr.bf16.mxu1 %v5922_v49  ;;  %v6004_v49 = vld [vmem:[%s8678_s1 + $0x70] ss:$48 sps:$4 sm:$0xff]   ;;  %v6009_v50 = vld [vmem:[%s8678_s1 + $0x794] ss:$48 sps:$4 sm:$0xff]  }
  0xa3   :  { %3809 = vmatpush2.bf16.msra.mxu0 %v5923_v53  ;;  %v6007_v53 = vld [vmem:[%s8678_s1 + $0x790] ss:$48 sps:$4 sm:$0xff]  }
  0xa4   :  { %3846 = vmatpush1.bf16.msra.mxu1 %v5920_v52  ;;  %3810 = vmatprep.subr.bf16.mxu0 %v5931_v55  ;;  %v6012_v52 = vld [vmem:[%s8678_s1 + $0x14] ss:$48 sps:$4 sm:$0xff]  }
  0xa5   :  { %3847 = vmatprep.subr.bf16.mxu1 %v5928_v54  ;;  %v6010_v54 = vld [vmem:[%s8678_s1 + $0x10] ss:$48 sps:$4 sm:$0xff]   ;;  %v6015_v55 = vld [vmem:[%s8678_s1 + $0x734] ss:$48 sps:$4 sm:$0xff]  }
  0xa7   :  { %3811 = vmatpush2.bf16.msra.mxu0 %v5929_v57  ;;  %v6013_v57 = vld [vmem:[%s8678_s1 + $0x730] ss:$48 sps:$4 sm:$0xff]  }
  0xa8   :  { %3848 = vmatpush1.bf16.msra.mxu1 %v5926_v56  ;;  %3812 = vmatprep.subr.bf16.mxu0 %v5937_v59  ;;  %v6018_v56 = vld [vmem:[%s8678_s1 + $0x5b4] ss:$48 sps:$4 sm:$0xff]  }
  0xa9   :  { %3849 = vmatprep.subr.bf16.mxu1 %v5934_v58  ;;  %v6016_v58 = vld [vmem:[%s8678_s1 + $0x5b0] ss:$48 sps:$4 sm:$0xff]   ;;  %v6021_v59 = vld [vmem:[%s8678_s1 + $0x6d4] ss:$48 sps:$4 sm:$0xff]  }
  0xab   :  { %3813 = vmatpush2.bf16.msra.mxu0 %v5935_v61  ;;  %v6019_v61 = vld [vmem:[%s8678_s1 + $0x6d0] ss:$48 sps:$4 sm:$0xff]  }
  0xac   :  { %3850 = vmatpush2.bf16.msra.mxu1 %v5932_v60  ;;  %3814 = vmatprep.subr.bf16.mxu0 %v5943_v63  ;;  %v6024_v60 = vld [vmem:[%s8678_s1 + $0x554] ss:$48 sps:$4 sm:$0xff]  }
  0xad   :  { %3851 = vmatprep.subr.bf16.mxu1 %v5940_v62  ;;  %v6022_v62 = vld [vmem:[%s8678_s1 + $0x550] ss:$48 sps:$4 sm:$0xff]   ;;  %v6027_v63 = vld [vmem:[%s8678_s1 + $0x674] ss:$48 sps:$4 sm:$0xff]  }
  0xaf   :  { %3815 = vmatpush2.bf16.msra.mxu0 %v5941_v1  ;;  %v6025_v1 = vld [vmem:[%s8678_s1 + $0x670] ss:$48 sps:$4 sm:$0xff]  }
  0xb0   :  { %3852 = vmatpush2.bf16.msra.mxu1 %v5938_v0  ;;  %3816 = vmatprep.subr.bf16.mxu0 %v5949_v3  ;;  %v6030_v0 = vld [vmem:[%s8678_s1 + $0x4f4] ss:$48 sps:$4 sm:$0xff]  }
  0xb1   :  { %3853 = vmatprep.subr.bf16.mxu1 %v5946_v2  ;;  %v6028_v2 = vld [vmem:[%s8678_s1 + $0x4f0] ss:$48 sps:$4 sm:$0xff]   ;;  %v6033_v3 = vld [vmem:[%s8678_s1 + $0x614] ss:$48 sps:$4 sm:$0xff]  }
  0xb3   :  { %3817 = vmatpush2.bf16.msra.mxu0 %v5947_v5  ;;  %v6031_v5 = vld [vmem:[%s8678_s1 + $0x610] ss:$48 sps:$4 sm:$0xff]  }
  0xb4   :  { %3854 = vmatpush2.bf16.msra.mxu1 %v5944_v4  ;;  %3818 = vmatprep.subr.bf16.mxu0 %v5955_v9  ;;  %v6036_v4 = vld [vmem:[%s8678_s1 + $0x494] ss:$48 sps:$4 sm:$0xff]  }
  0xb5   :  { %3855 = vmatprep.subr.bf16.mxu1 %v5952_v8  ;;  %v6034_v8 = vld [vmem:[%s8678_s1 + $0x490] ss:$48 sps:$4 sm:$0xff]   ;;  %v6039_v9 = vld [vmem:[%s8678_s1 + $0xbb4] ss:$48 sps:$4 sm:$0xff]  }
  0xb7   :  { %3819 = vmatpush2.bf16.msra.mxu0 %v5953_v11  ;;  %v6037_v11 = vld [vmem:[%s8678_s1 + $0xbb0] ss:$48 sps:$4 sm:$0xff]  }
  0xb8   :  { %3856 = vmatpush2.bf16.msra.mxu1 %v5950_v10  ;;  %3820 = vmatprep.subr.bf16.mxu0 %v5961_v14  ;;  %v6042_v10 = vld [vmem:[%s8678_s1 + $0x434] ss:$48 sps:$4 sm:$0xff]  }
  0xb9   :  { %3857 = vmatprep.subr.bf16.mxu1 %v5958_v12  ;;  %v6040_v12 = vld [vmem:[%s8678_s1 + $0x430] ss:$48 sps:$4 sm:$0xff]   ;;  %v6045_v14 = vld [vmem:[%s8678_s1 + $0xb54] ss:$48 sps:$4 sm:$0xff]  }
  0xbb   :  { %3821 = vmatpush2.bf16.msra.mxu0 %v5959_v18  ;;  %v6043_v18 = vld [vmem:[%s8678_s1 + $0xb50] ss:$48 sps:$4 sm:$0xff]  }
  0xbc   :  { %3858 = vmatpush2.bf16.msra.mxu1 %v5956_v15  ;;  %3822 = vmatprep.subr.bf16.mxu0 %v5967_v20  ;;  %v6048_v15 = vld [vmem:[%s8678_s1 + $0x3d4] ss:$48 sps:$4 sm:$0xff]  }
  0xbd   :  { %3859 = vmatprep.subr.bf16.mxu1 %v5964_v19  ;;  %v6046_v19 = vld [vmem:[%s8678_s1 + $0x3d0] ss:$48 sps:$4 sm:$0xff]   ;;  %v6051_v20 = vld [vmem:[%s8678_s1 + $0xaf4] ss:$48 sps:$4 sm:$0xff]  }
  0xbf   :  { %3823 = vmatpush2.bf16.msra.mxu0 %v5965_v22  ;;  %v6049_v22 = vld [vmem:[%s8678_s1 + $0xaf0] ss:$48 sps:$4 sm:$0xff]  }
  0xc0   :  { %3860 = vmatpush2.bf16.msra.mxu1 %v5962_v21  ;;  %3915 = vmatprep.subr.bf16.mxu0 %v5973_v24  ;;  %v6054_v21 = vld [vmem:[%s8678_s1 + $0x374] ss:$48 sps:$4 sm:$0xff]  }
  0xc1   :  { %3861 = vmatprep.subr.bf16.mxu1 %v5970_v23  ;;  %v6052_v23 = vld [vmem:[%s8678_s1 + $0x370] ss:$48 sps:$4 sm:$0xff]   ;;  %v6057_v24 = vld [vmem:[%s8678_s1 + $0xa94] ss:$48 sps:$4 sm:$0xff]  }
  0xc2   :  { %3825 = vmatmul.mubr.bf16.vlgmr.msra.gmra.mxu0 %v6853_v7 }
  0xc3   :  { %3916 = vmatpush1.bf16.msra.mxu0 %v5971_v26  ;;  %3947 = vmatprep.mubr.bf16.mxu0 %v6782_v47  ;;  %v6055_v26 = vld [vmem:[%s8678_s1 + $0xa90] ss:$48 sps:$4 sm:$0xff]  }
  0xc4   :  { %3862 = vmatpush2.bf16.msra.mxu1 %v5968_v25  ;;  %3917 = vmatprep.subr.bf16.mxu0 %v5979_v28  ;;  %v6060_v25 = vld [vmem:[%s8678_s1 + $0x314] ss:$48 sps:$4 sm:$0xff]  }
  0xc5   :  { %3863 = vmatprep.subr.bf16.mxu1 %v5976_v27  ;;  %v6058_v27 = vld [vmem:[%s8678_s1 + $0x310] ss:$48 sps:$4 sm:$0xff]   ;;  %v6063_v28 = vld [vmem:[%s8678_s1 + $0xa34] ss:$48 sps:$4 sm:$0xff]  }
  0xc7   :  { %3918 = vmatpush1.bf16.msra.mxu0 %v5977_v30  ;;  %v6061_v30 = vld [vmem:[%s8678_s1 + $0xa30] ss:$48 sps:$4 sm:$0xff]  }
  0xc8   :  { %3864 = vmatpush2.bf16.msra.mxu1 %v5974_v29  ;;  %3919 = vmatprep.subr.bf16.mxu0 %v5985_v32  ;;  %v6066_v29 = vld [vmem:[%s8678_s1 + $0xeb4] ss:$48 sps:$4 sm:$0xff]  }
  0xc9   :  { %3888 = vmatprep.subr.bf16.mxu1 %v5982_v31  ;;  %v6064_v31 = vld [vmem:[%s8678_s1 + $0xeb0] ss:$48 sps:$4 sm:$0xff]   ;;  %v6069_v32 = vld [vmem:[%s8678_s1 + $0x9d4] ss:$48 sps:$4 sm:$0xff]  }
  0xcb   :  { %3866 = vmatmul.mubr.bf16.vlgmr.msra.gmra.mxu1 %v7067_v16  ;;  %3920 = vmatpush1.bf16.msra.mxu0 %v5983_v35  ;;  %v6067_v35 = vld [vmem:[%s8678_s1 + $0x9d0] ss:$48 sps:$4 sm:$0xff]  }
  0xcc   :  { %3889 = vmatpush1.bf16.msra.mxu1 %v5980_v34  ;;  %3921 = vmatprep.subr.bf16.mxu0 %v5988_v36  ;;  %v6072_v34 = vld [vmem:[%s8678_s1 + $0xe54] ss:$48 sps:$4 sm:$0xff]   ;;  %v6070_v36 = vld [vmem:[%s8678_s1 + $0xe50] ss:$48 sps:$4 sm:$0xff]  }
  0xcd   :  { %3906 = vmatprep.mubr.bf16.mxu1 %v6598_v13  ;;  %3956 = vmatprep.subr.bf16.mxu1 %v5991_v37 }
  0xcf   :  { %3922 = vmatpush1.bf16.msra.mxu0 %v5986_v38 }
  0xd0   :  { %3923 = vmatprep.subr.bf16.mxu0 %v5994_v39 }
  0xd3   :  { %5573 = vmatmul.mubr.msk.bf16.vlgmr.msra.gmra.mxu1 %vm3583_vm0, %v6885_v17  ;;  %3924 = vmatpush1.bf16.msra.mxu0 %v5992_v41  ;;  %v6006_v17 = vld [vmem:[%s8678_s1 + $0x74] ss:$48 sps:$4 sm:$0xff]  }
  0xd4   :  { %3957 = vmatpush1.bf16.msra.mxu1 %v5989_v40  ;;  %3925 = vmatprep.subr.bf16.mxu0 %v6000_v43  ;;  %v6075_v40 = vld [vmem:[%s8678_s1 + $0x974] ss:$48 sps:$4 sm:$0xff]  }
  0xd5   :  { %3958 = vmatprep.subr.bf16.mxu1 %v5997_v42  ;;  %3988 = vmatprep.mubr.bf16.mxu1 %v6793_v51  ;;  %v6078_v41 = vld [vmem:[%s8678_s1 + $0xdf4] ss:$48 sps:$4 sm:$0xff]  }
  0xd7   :  { %3926 = vmatpush1.bf16.msra.mxu0 %v5998_v45 }
  0xd8   :  { %3959 = vmatpush1.bf16.msra.mxu1 %v5995_v44  ;;  %3927 = vmatprep.subr.bf16.mxu0 %v6006_v17 }
  0xd9   :  { %3960 = vmatprep.subr.bf16.mxu1 %v6003_v46  ;;  %v6073_v46 = vld [vmem:[%s8678_s1 + $0x970] ss:$48 sps:$4 sm:$0xff]  }
  0xdb   :  { %3928 = vmatpush1.bf16.msra.mxu0 %v6004_v49  ;;  %v6081_v49 = vld [vmem:[%s8678_s1 + $0x914] ss:$48 sps:$4 sm:$0xff]  }
  0xdc   :  { %3961 = vmatpush1.bf16.msra.mxu1 %v6001_v48  ;;  %3929 = vmatprep.subr.bf16.mxu0 %v6012_v52  ;;  %v6076_v48 = vld [vmem:[%s8678_s1 + $0xdf0] ss:$48 sps:$4 sm:$0xff]  }
  0xdd   :  { %3962 = vmatprep.subr.bf16.mxu1 %v6009_v50  ;;  %v6084_v50 = vld [vmem:[%s8678_s1 + $0xd94] ss:$48 sps:$4 sm:$0xff]  }
  0xdf   :  { %3930 = vmatpush1.bf16.msra.mxu0 %v6010_v54  ;;  %v6079_v54 = vld [vmem:[%s8678_s1 + $0x910] ss:$48 sps:$4 sm:$0xff]  }
  0xe0   :  { %3963 = vmatpush1.bf16.msra.mxu1 %v6007_v53  ;;  %3931 = vmatprep.subr.bf16.mxu0 %v6018_v56  ;;  %v6082_v56 = vld [vmem:[%s8678_s1 + $0xd90] ss:$48 sps:$4 sm:$0xff]  }
  0xe1   :  { %3964 = vmatprep.subr.bf16.mxu1 %v6015_v55 }
  0xe3   :  { %3932 = vmatpush2.bf16.msra.mxu0 %v6016_v58 }
  0xe4   :  { %3965 = vmatpush1.bf16.msra.mxu1 %v6013_v57  ;;  %3933 = vmatprep.subr.bf16.mxu0 %v6024_v60  ;;  %v6087_v57 = vld [vmem:[%s8678_s1 + $0x1214] ss:$48 sps:$4 sm:$0xff]  }
  0xe5   :  { %3966 = vmatprep.subr.bf16.mxu1 %v6021_v59  ;;  %v6090_v59 = vld [vmem:[%s8678_s1 + $0xd34] ss:$48 sps:$4 sm:$0xff]  }
  0xe7   :  { %3934 = vmatpush2.bf16.msra.mxu0 %v6022_v62  ;;  %v6088_v62 = vld [vmem:[%s8678_s1 + $0xd30] ss:$48 sps:$4 sm:$0xff]  }
  0xe8   :  { %3967 = vmatpush1.bf16.msra.mxu1 %v6019_v61  ;;  %3935 = vmatprep.subr.bf16.mxu0 %v6030_v0  ;;  %v6085_v61 = vld [vmem:[%s8678_s1 + $0x1210] ss:$48 sps:$4 sm:$0xff]   ;;  %v6093_v0 = vld [vmem:[%s8678_s1 + $0xcd4] ss:$48 sps:$4 sm:$0xff]  }
  0xe9   :  { %3968 = vmatprep.subr.bf16.mxu1 %v6027_v63 }
  0xeb   :  { %3936 = vmatpush2.bf16.msra.mxu0 %v6028_v2  ;;  %v6091_v2 = vld [vmem:[%s8678_s1 + $0xcd0] ss:$48 sps:$4 sm:$0xff]  }
  0xec   :  { %3969 = vmatpush1.bf16.msra.mxu1 %v6025_v1  ;;  %3937 = vmatprep.subr.bf16.mxu0 %v6036_v4  ;;  %v6096_v1 = vld [vmem:[%s8678_s1 + $0x2bc] ss:$48 sps:$4 sm:$0xff]   ;;  %v6094_v4 = vld [vmem:[%s8678_s1 + $0x2b8] ss:$48 sps:$4 sm:$0xff]  }
  0xed   :  { %3970 = vmatprep.subr.bf16.mxu1 %v6033_v3  ;;  %v6099_v3 = vld [vmem:[%s8678_s1 + $0xc74] ss:$48 sps:$4 sm:$0xff]  }
  0xef   :  { %3938 = vmatpush2.bf16.msra.mxu0 %v6034_v8  ;;  %v6102_v8 = vld [vmem:[%s8678_s1 + $0x25c] ss:$48 sps:$4 sm:$0xff]  }
  0xf0   :  { %3971 = vmatpush1.bf16.msra.mxu1 %v6031_v5  ;;  %3939 = vmatprep.subr.bf16.mxu0 %v6042_v10  ;;  %v6097_v5 = vld [vmem:[%s8678_s1 + $0xc70] ss:$48 sps:$4 sm:$0xff]   ;;  %v7548_v10 = vld [vmem:[%s8679_s0 + $0x18] ss:$0 sps:$4 sm:$0xff]  }
  0xf1   :  { %3972 = vmatprep.subr.bf16.mxu1 %v6039_v9  ;;  %v6105_v9 = vld [vmem:[%s8678_s1 + $0xc14] ss:$48 sps:$4 sm:$0xff]  }
  0xf3   :  { %3940 = vmatpush2.bf16.msra.mxu0 %v6040_v12  ;;  %v6103_v12 = vld [vmem:[%s8678_s1 + $0xc10] ss:$48 sps:$4 sm:$0xff]  }
  0xf4   :  { %3973 = vmatpush2.bf16.msra.mxu1 %v6037_v11  ;;  %3941 = vmatprep.subr.bf16.mxu0 %v6048_v15  ;;  %v6100_v11 = vld [vmem:[%s8678_s1 + $0x258] ss:$48 sps:$4 sm:$0xff]   ;;  %v6111_v15 = vld [vmem:[%s8678_s1 + $0x11b4] ss:$48 sps:$4 sm:$0xff]  }
  0xf5   :  { %3974 = vmatprep.subr.bf16.mxu1 %v6045_v14  ;;  %v6108_v14 = vld [vmem:[%s8678_s1 + $0x1fc] ss:$48 sps:$4 sm:$0xff]  }
  0xf7   :  { %3942 = vmatpush2.bf16.msra.mxu0 %v6046_v19  ;;  %v6109_v19 = vld [vmem:[%s8678_s1 + $0x11b0] ss:$48 sps:$4 sm:$0xff]  }
  0xf8   :  { %3975 = vmatpush2.bf16.msra.mxu1 %v6043_v18  ;;  %3943 = vmatprep.subr.bf16.mxu0 %v6054_v21  ;;  %v6106_v18 = vld [vmem:[%s8678_s1 + $0x1f8] ss:$48 sps:$4 sm:$0xff]   ;;  %v6117_v21 = vld [vmem:[%s8678_s1 + $0x1154] ss:$48 sps:$4 sm:$0xff]  }
  0xf9   :  { %3976 = vmatprep.subr.bf16.mxu1 %v6051_v20  ;;  %v6114_v20 = vld [vmem:[%s8678_s1 + $0x19c] ss:$48 sps:$4 sm:$0xff]  }
  0xfb   :  { %3944 = vmatpush2.bf16.msra.mxu0 %v6052_v23  ;;  %v6115_v23 = vld [vmem:[%s8678_s1 + $0x1150] ss:$48 sps:$4 sm:$0xff]  }
  0xfc   :  { %3977 = vmatpush2.bf16.msra.mxu1 %v6049_v22  ;;  %3945 = vmatprep.subr.bf16.mxu0 %v6060_v25  ;;  %v6112_v22 = vld [vmem:[%s8678_s1 + $0x198] ss:$48 sps:$4 sm:$0xff]   ;;  %v6123_v25 = vld [vmem:[%s8678_s1 + $0x10f4] ss:$48 sps:$4 sm:$0xff]  }
  0xfd   :  { %3978 = vmatprep.subr.bf16.mxu1 %v6057_v24  ;;  %v6120_v24 = vld [vmem:[%s8678_s1 + $0x13c] ss:$48 sps:$4 sm:$0xff]  }
  0xff   :  { %3946 = vmatpush2.bf16.msra.mxu0 %v6058_v27  ;;  %v6121_v27 = vld [vmem:[%s8678_s1 + $0x10f0] ss:$48 sps:$4 sm:$0xff]  }
 0x100   :  { %3979 = vmatpush2.bf16.msra.mxu1 %v6055_v26  ;;  %3997 = vmatprep.subr.bf16.mxu0 %v6066_v29  ;;  %v6118_v26 = vld [vmem:[%s8678_s1 + $0x138] ss:$48 sps:$4 sm:$0xff]   ;;  %v6129_v29 = vld [vmem:[%s8678_s1 + $0x1094] ss:$48 sps:$4 sm:$0xff]  }
 0x101   :  { %3980 = vmatprep.subr.bf16.mxu1 %v6063_v28  ;;  %v6126_v28 = vld [vmem:[%s8678_s1 + $0xdc] ss:$48 sps:$4 sm:$0xff]  }
 0x102   :  { %v3621_v37 = vpop.f32.mrf.mxu0  ;;  %3948 = vmatmul.mubr.bf16.vlgmr.msra.gmra.mxu0 %v6851_v6 }
 0x103   :  { %v3662_v38 = vpop.f32.mrf.mxu1  ;;  %3998 = vmatpush1.bf16.msra.mxu0 %v6064_v31  ;;  %4029 = vmatprep.mubr.bf16.mxu0 %v6939_v33  ;;  %v6127_v31 = vld [vmem:[%s8678_s1 + $0x1090] ss:$48 sps:$4 sm:$0xff]  }
 0x104   :  { %3981 = vmatpush2.bf16.msra.mxu1 %v6061_v30  ;;  %v7474_v39 = vadd.f32 %v3662_v38, %v3621_v37  ;;  %v3623_v42 = vpop.f32.mrf.mxu0  ;;  %3999 = vmatprep.subr.bf16.mxu0 %v6072_v34  ;;  %v6124_v30 = vld [vmem:[%s8678_s1 + $0xd8] ss:$48 sps:$4 sm:$0xff]   ;;  %v6135_v34 = vld [vmem:[%s8678_s1 + $0x1034] ss:$48 sps:$4 sm:$0xff]   ;;  %v6138_v37 = vld [vmem:[%s8678_s1 + $0x1c] ss:$48 sps:$4 sm:$0xff]  }
 0x105   :  { %v3664_v43 = vpop.f32.mrf.mxu1  ;;  %3982 = vmatprep.subr.bf16.mxu1 %v6069_v32  ;;  %v6132_v32 = vld [vmem:[%s8678_s1 + $0x7c] ss:$48 sps:$4 sm:$0xff]   ;;  %v6141_v38 = vld [vmem:[%s8678_s1 + $0xfd4] ss:$48 sps:$4 sm:$0xff]  }
 0x106   :  { %v7482_v44 = vadd.f32 %v3664_v43, %v3623_v42  ;;  %v3625_v17 = vpop.f32.mrf.mxu0  ;;  %v6144_v42 = vld [vmem:[%s8678_s1 + $0x5bc] ss:$48 sps:$4 sm:$0xff]   ;;  %v6147_v43 = vld [vmem:[%s8678_s1 + $0xf74] ss:$48 sps:$4 sm:$0xff]  }
 0x107   :  { %v3666_v45 = vpop.f32.mrf.mxu1  ;;  %4000 = vmatpush1.bf16.msra.mxu0 %v6070_v36  ;;  %v6133_v36 = vld [vmem:[%s8678_s1 + $0x1030] ss:$48 sps:$4 sm:$0xff]   ;;  %v6150_v17 = vld [vmem:[%s8678_s1 + $0x55c] ss:$48 sps:$4 sm:$0xff]  }
 0x108   :  { %3983 = vmatpush2.bf16.msra.mxu1 %v6067_v35  ;;  %4001 = vmatprep.subr.bf16.mxu0 %v6078_v41  ;;  %v3626_v53 = vpop.f32.mrf.mxu0  ;;  %v6130_v35 = vld [vmem:[%s8678_s1 + $0x78] ss:$48 sps:$4 sm:$0xff]   ;;  %v6139_v41 = vld [vmem:[%s8678_s1 + $0xfd0] ss:$48 sps:$4 sm:$0xff]  }
 0x109   :  { %v3667_v52 = vpop.f32.mrf.mxu1  ;;  %3984 = vmatprep.subr.bf16.mxu1 %v6075_v40  ;;  %v6136_v40 = vld [vmem:[%s8678_s1 + $0x18] ss:$48 sps:$4 sm:$0xff]   ;;  %v6159_v53 = vld [vmem:[%s8678_s1 + $0x8bc] ss:$48 sps:$4 sm:$0xff]  }
 0x10a   :  { %v6142_v45 = vld [vmem:[%s8678_s1 + $0x5b8] ss:$48 sps:$4 sm:$0xff]   ;;  %v6156_v52 = vld [vmem:[%s8678_s1 + $0x4fc] ss:$48 sps:$4 sm:$0xff]  }
 0x10b   :  { %v7500_v55 = vpop.f32.mrf.mxu1  ;;  %4002 = vmatpush1.bf16.msra.mxu0 %v6076_v48  ;;  %v6153_v48 = vld [vmem:[%s8678_s1 + $0xf14] ss:$48 sps:$4 sm:$0xff]  }
 0x10c   :  { %3985 = vmatpush2.bf16.msra.mxu1 %v6073_v46  ;;  %4003 = vmatprep.subr.bf16.mxu0 %v6084_v50  ;;  %v6145_v46 = vld [vmem:[%s8678_s1 + $0xf70] ss:$48 sps:$4 sm:$0xff]  }
 0x10d   :  { %v7508_v58 = vpop.f32.mrf.mxu1  ;;  %3986 = vmatprep.subr.bf16.mxu1 %v6081_v49  ;;  %v6148_v49 = vld [vmem:[%s8678_s1 + $0x558] ss:$48 sps:$4 sm:$0xff]   ;;  %v6151_v50 = vld [vmem:[%s8678_s1 + $0xf10] ss:$48 sps:$4 sm:$0xff]  }
 0x10f   :  { %v3748_v60 = vpop.f32.mrf.mxu1  ;;  %4004 = vmatpush1.bf16.msra.mxu0 %v6082_v56  ;;  %v6157_v56 = vld [vmem:[%s8678_s1 + $0x8b8] ss:$48 sps:$4 sm:$0xff]  }
 0x110   :  { %3987 = vmatpush2.bf16.msra.mxu1 %v6079_v54  ;;  %4005 = vmatprep.subr.bf16.mxu0 %v6090_v59  ;;  %v6154_v54 = vld [vmem:[%s8678_s1 + $0x4f8] ss:$48 sps:$4 sm:$0xff]   ;;  %v6165_v59 = vld [vmem:[%s8678_s1 + $0x85c] ss:$48 sps:$4 sm:$0xff]  }
 0x111   :  { %v3749_v63 = vpop.f32.mrf.mxu1  ;;  %4052 = vmatprep.subr.bf16.mxu1 %v6087_v57  ;;  %v6162_v57 = vld [vmem:[%s8678_s1 + $0x49c] ss:$48 sps:$4 sm:$0xff]  }
 0x112   :  { %v6163_v63 = vld [vmem:[%s8678_s1 + $0x858] ss:$48 sps:$4 sm:$0xff]  }
 0x113   :  { %3989 = vmatmul.mubr.bf16.vlgmr.msra.gmra.mxu1 %v6853_v7  ;;  %4006 = vmatpush1.bf16.msra.mxu0 %v6088_v62 }
 0x114   :  { %4053 = vmatpush1.bf16.msra.mxu1 %v6085_v61  ;;  %4007 = vmatprep.subr.bf16.mxu0 %v6093_v0  ;;  %v6160_v61 = vld [vmem:[%s8678_s1 + $0x498] ss:$48 sps:$4 sm:$0xff]   ;;  %v6168_v0 = vld [vmem:[%s8678_s1 + $0x43c] ss:$48 sps:$4 sm:$0xff]  }
 0x115   :  { %4070 = vmatprep.mubr.bf16.mxu1 %v6598_v13  ;;  %4079 = vmatprep.subr.bf16.mxu1 %v6096_v1  ;;  %v6171_v1 = vld [vmem:[%s8678_s1 + $0x7fc] ss:$48 sps:$4 sm:$0xff]  }
 0x117   :  { %4008 = vmatpush1.bf16.msra.mxu0 %v6091_v2 }
 0x118   :  { %4009 = vmatprep.subr.bf16.mxu0 %v6099_v3 }
 0x11b   :  { %5574 = vmatmul.mubr.msk.bf16.vlgmr.msra.gmra.mxu1 %vm3583_vm0, %v7548_v10  ;;  %4010 = vmatpush1.bf16.msra.mxu0 %v6097_v5 }
 0x11c   :  { %4080 = vmatpush1.bf16.msra.mxu1 %v6094_v4  ;;  %4011 = vmatprep.subr.bf16.mxu0 %v6105_v9  ;;  %v6166_v4 = vld [vmem:[%s8678_s1 + $0x438] ss:$48 sps:$4 sm:$0xff]  }
 0x11d   :  { %4081 = vmatprep.subr.bf16.mxu1 %v6102_v8  ;;  %4111 = vmatprep.mubr.bf16.mxu1 %v6782_v47  ;;  %v6169_v9 = vld [vmem:[%s8678_s1 + $0x7f8] ss:$48 sps:$4 sm:$0xff]  }
 0x11f   :  { %4012 = vmatpush1.bf16.msra.mxu0 %v6103_v12 }
 0x120   :  { %4082 = vmatpush1.bf16.msra.mxu1 %v6100_v11  ;;  %4013 = vmatprep.subr.bf16.mxu0 %v6111_v15  ;;  %v6180_v15 = vld [vmem:[%s8678_s1 + $0x37c] ss:$48 sps:$4 sm:$0xff]  }
 0x121   :  { %4083 = vmatprep.subr.bf16.mxu1 %v6108_v14  ;;  %v6175_v14 = vld [vmem:[%s8678_s1 + $0x798] ss:$48 sps:$4 sm:$0xff]  }
 0x123   :  { %4014 = vmatpush2.bf16.msra.mxu0 %v6109_v19 }
 0x124   :  { %4084 = vmatpush1.bf16.msra.mxu1 %v6106_v18  ;;  %4015 = vmatprep.subr.bf16.mxu0 %v6117_v21  ;;  %v6183_v18 = vld [vmem:[%s8678_s1 + $0x73c] ss:$48 sps:$4 sm:$0xff]   ;;  %v6178_v21 = vld [vmem:[%s8678_s1 + $0x378] ss:$48 sps:$4 sm:$0xff]  }
 0x125   :  { %4085 = vmatprep.subr.bf16.mxu1 %v6114_v20 }
 0x127   :  { %4016 = vmatpush2.bf16.msra.mxu0 %v6115_v23  ;;  %v6186_v23 = vld [vmem:[%s8678_s1 + $0x31c] ss:$48 sps:$4 sm:$0xff]  }
 0x128   :  { %4086 = vmatpush1.bf16.msra.mxu1 %v6112_v22  ;;  %4017 = vmatprep.subr.bf16.mxu0 %v6123_v25  ;;  %v6181_v22 = vld [vmem:[%s8678_s1 + $0x738] ss:$48 sps:$4 sm:$0xff]  }
 0x129   :  { %4087 = vmatprep.subr.bf16.mxu1 %v6120_v24  ;;  %v6189_v24 = vld [vmem:[%s8678_s1 + $0x6dc] ss:$48 sps:$4 sm:$0xff]  }
 0x12b   :  { %4018 = vmatpush2.bf16.msra.mxu0 %v6121_v27  ;;  %v6187_v27 = vld [vmem:[%s8678_s1 + $0x6d8] ss:$48 sps:$4 sm:$0xff]  }
 0x12c   :  { %4088 = vmatpush1.bf16.msra.mxu1 %v6118_v26  ;;  %4019 = vmatprep.subr.bf16.mxu0 %v6129_v29  ;;  %v6184_v26 = vld [vmem:[%s8678_s1 + $0x318] ss:$48 sps:$4 sm:$0xff]   ;;  %v6195_v29 = vld [vmem:[%s8678_s1 + $0x67c] ss:$48 sps:$4 sm:$0xff]  }
 0x12d   :  { %4089 = vmatprep.subr.bf16.mxu1 %v6126_v28  ;;  %v6192_v28 = vld [vmem:[%s8678_s1 + $0xebc] ss:$48 sps:$4 sm:$0xff]  }
 0x12f   :  { %4020 = vmatpush2.bf16.msra.mxu0 %v6127_v31  ;;  %v6193_v31 = vld [vmem:[%s8678_s1 + $0x678] ss:$48 sps:$4 sm:$0xff]  }
 0x130   :  { %4090 = vmatpush1.bf16.msra.mxu1 %v6124_v30  ;;  %4021 = vmatprep.subr.bf16.mxu0 %v6135_v34  ;;  %v6190_v30 = vld [vmem:[%s8678_s1 + $0xeb8] ss:$48 sps:$4 sm:$0xff]   ;;  %v6201_v34 = vld [vmem:[%s8678_s1 + $0x61c] ss:$48 sps:$4 sm:$0xff]  }
 0x131   :  { %4091 = vmatprep.subr.bf16.mxu1 %v6132_v32  ;;  %v6198_v32 = vld [vmem:[%s8678_s1 + $0xe5c] ss:$48 sps:$4 sm:$0xff]  }
 0x133   :  { %4022 = vmatpush2.bf16.msra.mxu0 %v6133_v36  ;;  %v6199_v36 = vld [vmem:[%s8678_s1 + $0x618] ss:$48 sps:$4 sm:$0xff]  }
 0x134   :  { %4092 = vmatpush1.bf16.msra.mxu1 %v6130_v35  ;;  %4023 = vmatprep.subr.bf16.mxu0 %v6141_v38  ;;  %v6196_v35 = vld [vmem:[%s8678_s1 + $0xe58] ss:$48 sps:$4 sm:$0xff]   ;;  %v6207_v38 = vld [vmem:[%s8678_s1 + $0xbbc] ss:$48 sps:$4 sm:$0xff]  }
 0x135   :  { %4093 = vmatprep.subr.bf16.mxu1 %v6138_v37  ;;  %v6204_v37 = vld [vmem:[%s8678_s1 + $0xdfc] ss:$48 sps:$4 sm:$0xff]  }
 0x137   :  { %4024 = vmatpush2.bf16.msra.mxu0 %v6139_v41  ;;  %v6205_v41 = vld [vmem:[%s8678_s1 + $0xbb8] ss:$48 sps:$4 sm:$0xff]  }
 0x138   :  { %4094 = vmatpush1.bf16.msra.mxu1 %v6136_v40  ;;  %4025 = vmatprep.subr.bf16.mxu0 %v6147_v43  ;;  %v6202_v40 = vld [vmem:[%s8678_s1 + $0xdf8] ss:$48 sps:$4 sm:$0xff]   ;;  %v6213_v43 = vld [vmem:[%s8678_s1 + $0xb5c] ss:$48 sps:$4 sm:$0xff]  }
 0x139   :  { %4095 = vmatprep.subr.bf16.mxu1 %v6144_v42  ;;  %v6210_v42 = vld [vmem:[%s8678_s1 + $0xd9c] ss:$48 sps:$4 sm:$0xff]  }
 0x13b   :  { %4026 = vmatpush2.bf16.msra.mxu0 %v6145_v46  ;;  %v6211_v46 = vld [vmem:[%s8678_s1 + $0xb58] ss:$48 sps:$4 sm:$0xff]  }
 0x13c   :  { %4096 = vmatpush2.bf16.msra.mxu1 %v6142_v45  ;;  %4027 = vmatprep.subr.bf16.mxu0 %v6153_v48  ;;  %v6208_v45 = vld [vmem:[%s8678_s1 + $0xd98] ss:$48 sps:$4 sm:$0xff]   ;;  %v6219_v48 = vld [vmem:[%s8678_s1 + $0xafc] ss:$48 sps:$4 sm:$0xff]  }
 0x13d   :  { %4097 = vmatprep.subr.bf16.mxu1 %v6150_v17  ;;  %v6216_v17 = vld [vmem:[%s8678_s1 + $0xd3c] ss:$48 sps:$4 sm:$0xff]  }
 0x13f   :  { %4028 = vmatpush2.bf16.msra.mxu0 %v6151_v50  ;;  %v6217_v50 = vld [vmem:[%s8678_s1 + $0xaf8] ss:$48 sps:$4 sm:$0xff]  }
 0x140   :  { %4098 = vmatpush2.bf16.msra.mxu1 %v6148_v49  ;;  %4120 = vmatprep.subr.bf16.mxu0 %v6159_v53  ;;  %v6214_v49 = vld [vmem:[%s8678_s1 + $0xd38] ss:$48 sps:$4 sm:$0xff]   ;;  %v6225_v53 = vld [vmem:[%s8678_s1 + $0xa9c] ss:$48 sps:$4 sm:$0xff]  }
 0x141   :  { %4099 = vmatprep.subr.bf16.mxu1 %v6156_v52  ;;  %v6222_v52 = vld [vmem:[%s8678_s1 + $0xcdc] ss:$48 sps:$4 sm:$0xff]  }
 0x142   :  { %v3703_v60 = vpop.f32.mrf.mxu0  ;;  %4030 = vmatmul.mubr.bf16.vlgmr.msra.gmra.mxu0 %v7067_v16 }
 0x143   :  { %v3704_v62 = vadd.f32 %v3703_v60, %v7474_v39  ;;  %4121 = vmatpush1.bf16.msra.mxu0 %v6157_v56  ;;  %4152 = vmatprep.mubr.bf16.mxu0 %v6793_v51  ;;  %v6223_v56 = vld [vmem:[%s8678_s1 + $0xa98] ss:$48 sps:$4 sm:$0xff]  }
 0x144   :  { %4100 = vmatpush2.bf16.msra.mxu1 %v6154_v54  ;;  %v3705_v2 = vpop.f32.mrf.mxu0  ;;  %4122 = vmatprep.subr.bf16.mxu0 %v6165_v59  ;;  %v6220_v54 = vld [vmem:[%s8678_s1 + $0xcd8] ss:$48 sps:$4 sm:$0xff]   ;;  %v6231_v59 = vld [vmem:[%s8678_s1 + $0xa3c] ss:$48 sps:$4 sm:$0xff]  }
 0x145   :  { %4101 = vmatprep.subr.bf16.mxu1 %v6162_v57  ;;  %v7688_v3 = vadd.f32 %v7500_v55, %v3704_v62  ;;  %v3706_v39 = vadd.f32 %v3705_v2, %v7482_v44  ;;  %v6174_v44 = vld [vmem:[%s8678_s1 + $0x3dc] ss:$48 sps:$4 sm:$0xff]   ;;  %v6226_v60 = vld [vmem:[%s8678_s1 + $0xc78] ss:$48 sps:$4 sm:$0xff]  }
 0x146   :  { %v3707_v5 = vpop.f32.mrf.mxu0  ;;  %v6177_v55 = vld [vmem:[%s8678_s1 + $0x79c] ss:$48 sps:$4 sm:$0xff]  }
 0x147   :  { %v7696_v8 = vadd.f32 %v7508_v58, %v3706_v39  ;;  %4123 = vmatpush1.bf16.msra.mxu0 %v6163_v63  ;;  %v6172_v58 = vld [vmem:[%s8678_s1 + $0x3d8] ss:$48 sps:$4 sm:$0xff]   ;;  %v6228_v57 = vld [vmem:[%s8678_s1 + $0xc7c] ss:$48 sps:$4 sm:$0xff]  }
 0x148   :  { %4102 = vmatpush2.bf16.msra.mxu1 %v6160_v61  ;;  %4124 = vmatprep.subr.bf16.mxu0 %v6171_v1  ;;  %v3708_v11 = vpop.f32.mrf.mxu0  ;;  %v6229_v61 = vld [vmem:[%s8678_s1 + $0xa38] ss:$48 sps:$4 sm:$0xff]   ;;  %v6234_v62 = vld [vmem:[%s8678_s1 + $0xc1c] ss:$48 sps:$4 sm:$0xff]  }
 0x149   :  { %4103 = vmatprep.subr.bf16.mxu1 %v6168_v0  ;;  %v6237_v63 = vld [vmem:[%s8678_s1 + $0x9dc] ss:$48 sps:$4 sm:$0xff]   ;;  %v6232_v0 = vld [vmem:[%s8678_s1 + $0xc18] ss:$48 sps:$4 sm:$0xff]  }
 0x14a   :  { %v6235_v1 = vld [vmem:[%s8678_s1 + $0x9d8] ss:$48 sps:$4 sm:$0xff]   ;;  %v6240_v2 = vld [vmem:[%s8678_s1 + $0x11bc] ss:$48 sps:$4 sm:$0xff]  }
 0x14b   :  { %v7707_v12 = vpop.f32.mrf.mxu1  ;;  %4125 = vmatpush1.bf16.msra.mxu0 %v6169_v9  ;;  %v6243_v39 = vld [vmem:[%s8678_s1 + $0x97c] ss:$48 sps:$4 sm:$0xff]   ;;  %v6241_v5 = vld [vmem:[%s8678_s1 + $0x978] ss:$48 sps:$4 sm:$0xff]  }
 0x14c   :  { %4104 = vmatpush2.bf16.msra.mxu1 %v6166_v4  ;;  %4126 = vmatprep.subr.bf16.mxu0 %v6177_v55  ;;  %v6238_v4 = vld [vmem:[%s8678_s1 + $0x11b8] ss:$48 sps:$4 sm:$0xff]   ;;  %v6246_v9 = vld [vmem:[%s8678_s1 + $0x115c] ss:$48 sps:$4 sm:$0xff]  }
 0x14d   :  { %v7721_v19 = vpop.f32.mrf.mxu1  ;;  %4105 = vmatprep.subr.bf16.mxu1 %v6174_v44  ;;  %v6249_v44 = vld [vmem:[%s8678_s1 + $0x91c] ss:$48 sps:$4 sm:$0xff]   ;;  %v6244_v55 = vld [vmem:[%s8678_s1 + $0x1158] ss:$48 sps:$4 sm:$0xff]  }
 0x14e   :  { %v6247_v11 = vld [vmem:[%s8678_s1 + $0x918] ss:$48 sps:$4 sm:$0xff]  }
 0x14f   :  { %v3789_v20 = vpop.f32.mrf.mxu1  ;;  %4127 = vmatpush1.bf16.msra.mxu0 %v6175_v14  ;;  %v6258_v14 = vld [vmem:[%s8678_s1 + $0x121c] ss:$48 sps:$4 sm:$0xff]  }
 0x150   :  { %4106 = vmatpush2.bf16.msra.mxu1 %v6172_v58  ;;  %4128 = vmatprep.subr.bf16.mxu0 %v6183_v18  ;;  %v6252_v58 = vld [vmem:[%s8678_s1 + $0x10fc] ss:$48 sps:$4 sm:$0xff]   ;;  %v6256_v18 = vld [vmem:[%s8678_s1 + $0x1218] ss:$48 sps:$4 sm:$0xff]  }
 0x151   :  { %v3790_v25 = vpop.f32.mrf.mxu1  ;;  %4107 = vmatprep.subr.bf16.mxu1 %v6180_v15  ;;  %v6250_v15 = vld [vmem:[%s8678_s1 + $0x10f8] ss:$48 sps:$4 sm:$0xff]   ;;  %v6255_v20 = vld [vmem:[%s8678_s1 + $0x109c] ss:$48 sps:$4 sm:$0xff]  }
 0x153   :  { %4129 = vmatpush1.bf16.msra.mxu0 %v6181_v22 }
 0x154   :  { %4108 = vmatpush2.bf16.msra.mxu1 %v6178_v21  ;;  %4130 = vmatprep.subr.bf16.mxu0 %v6189_v24  ;;  %v6264_v21 = vld [vmem:[%s8678_s1 + $0x2c4] ss:$48 sps:$4 sm:$0xff]   ;;  %v6253_v24 = vld [vmem:[%s8678_s1 + $0x1098] ss:$48 sps:$4 sm:$0xff]  }
 0x155   :  { %4109 = vmatprep.subr.bf16.mxu1 %v6186_v23 }
 0x157   :  { %4131 = vmatpush1.bf16.msra.mxu0 %v6187_v27 }
 0x158   :  { %4110 = vmatpush2.bf16.msra.mxu1 %v6184_v26  ;;  %4132 = vmatprep.subr.bf16.mxu0 %v6195_v29  ;;  %v6261_v26 = vld [vmem:[%s8678_s1 + $0x103c] ss:$48 sps:$4 sm:$0xff]   ;;  %v6262_v29 = vld [vmem:[%s8678_s1 + $0x2c0] ss:$48 sps:$4 sm:$0xff]  }
 0x159   :  { %4161 = vmatprep.subr.bf16.mxu1 %v6192_v28 }
 0x15b   :  { %4112 = vmatmul.mubr.bf16.vlgmr.msra.gmra.mxu1 %v6851_v6  ;;  %4133 = vmatpush1.bf16.msra.mxu0 %v6193_v31 }
 0x15c   :  { %4162 = vmatpush1.bf16.msra.mxu1 %v6190_v30  ;;  %4134 = vmatprep.subr.bf16.mxu0 %v6201_v34  ;;  %v6267_v30 = vld [vmem:[%s8678_s1 + $0xfdc] ss:$48 sps:$4 sm:$0xff]  }
 0x15d   :  { %4163 = vmatprep.subr.bf16.mxu1 %v6198_v32  ;;  %4193 = vmatprep.mubr.bf16.mxu1 %v6939_v33 }
 0x15f   :  { %4135 = vmatpush1.bf16.msra.mxu0 %v6199_v36  ;;  %v6268_v36 = vld [vmem:[%s8678_s1 + $0x260] ss:$48 sps:$4 sm:$0xff]  }
 0x160   :  { %4164 = vmatpush1.bf16.msra.mxu1 %v6196_v35  ;;  %4136 = vmatprep.subr.bf16.mxu0 %v6207_v38  ;;  %v6265_v35 = vld [vmem:[%s8678_s1 + $0xfd8] ss:$48 sps:$4 sm:$0xff]   ;;  %v6273_v38 = vld [vmem:[%s8678_s1 + $0xf7c] ss:$48 sps:$4 sm:$0xff]  }
 0x161   :  { %4165 = vmatprep.subr.bf16.mxu1 %v6204_v37 }
 0x163   :  { %4137 = vmatpush2.bf16.msra.mxu0 %v6205_v41 }
 0x164   :  { %4166 = vmatpush1.bf16.msra.mxu1 %v6202_v40  ;;  %4138 = vmatprep.subr.bf16.mxu0 %v6213_v43  ;;  %v6274_v43 = vld [vmem:[%s8678_s1 + $0x200] ss:$48 sps:$4 sm:$0xff]  }
 0x165   :  { %4167 = vmatprep.subr.bf16.mxu1 %v6210_v42  ;;  %v6271_v42 = vld [vmem:[%s8678_s1 + $0xf78] ss:$48 sps:$4 sm:$0xff]  }
 0x167   :  { %4139 = vmatpush2.bf16.msra.mxu0 %v6211_v46  ;;  %v6279_v46 = vld [vmem:[%s8678_s1 + $0xf1c] ss:$48 sps:$4 sm:$0xff]  }
 0x168   :  { %4168 = vmatpush1.bf16.msra.mxu1 %v6208_v45  ;;  %4140 = vmatprep.subr.bf16.mxu0 %v6219_v48 }
 0x169   :  { %4169 = vmatprep.subr.bf16.mxu1 %v6216_v17  ;;  %v6282_v17 = vld [vmem:[%s8678_s1 + $0x1a4] ss:$48 sps:$4 sm:$0xff]  }
 0x16b   :  { %4141 = vmatpush2.bf16.msra.mxu0 %v6217_v50  ;;  %v6277_v50 = vld [vmem:[%s8678_s1 + $0xf18] ss:$48 sps:$4 sm:$0xff]  }
 0x16c   :  { %4170 = vmatpush1.bf16.msra.mxu1 %v6214_v49  ;;  %4142 = vmatprep.subr.bf16.mxu0 %v6225_v53 }
 0x16d   :  { %4171 = vmatprep.subr.bf16.mxu1 %v6222_v52  ;;  %v6280_v52 = vld [vmem:[%s8678_s1 + $0x1a0] ss:$48 sps:$4 sm:$0xff]  }
 0x16f   :  { %4143 = vmatpush2.bf16.msra.mxu0 %v6223_v56  ;;  %v6288_v56 = vld [vmem:[%s8678_s1 + $0x144] ss:$48 sps:$4 sm:$0xff]  }
 0x170   :  { %4172 = vmatpush1.bf16.msra.mxu1 %v6220_v54  ;;  %4144 = vmatprep.subr.bf16.mxu0 %v6231_v59  ;;  %v6285_v54 = vld [vmem:[%s8678_s1 + $0x8c4] ss:$48 sps:$4 sm:$0xff]  }
 0x171   :  { %4173 = vmatprep.subr.bf16.mxu1 %v6228_v57 }
 0x173   :  { %4145 = vmatpush2.bf16.msra.mxu0 %v6229_v61  ;;  %v6283_v61 = vld [vmem:[%s8678_s1 + $0x8c0] ss:$48 sps:$4 sm:$0xff]  }
 0x174   :  { %4174 = vmatpush1.bf16.msra.mxu1 %v6226_v60  ;;  %4146 = vmatprep.subr.bf16.mxu0 %v6237_v63 }
 0x175   :  { %4175 = vmatprep.subr.bf16.mxu1 %v6234_v62  ;;  %v6286_v62 = vld [vmem:[%s8678_s1 + $0x140] ss:$48 sps:$4 sm:$0xff]  }
 0x177   :  { %4147 = vmatpush2.bf16.msra.mxu0 %v6235_v1  ;;  %v6294_v1 = vld [vmem:[%s8678_s1 + $0xe4] ss:$48 sps:$4 sm:$0xff]  }
 0x178   :  { %4176 = vmatpush1.bf16.msra.mxu1 %v6232_v0  ;;  %4148 = vmatprep.subr.bf16.mxu0 %v6243_v39  ;;  %v6291_v0 = vld [vmem:[%s8678_s1 + $0x864] ss:$48 sps:$4 sm:$0xff]   ;;  %v6292_v39 = vld [vmem:[%s8678_s1 + $0xe0] ss:$48 sps:$4 sm:$0xff]  }
 0x179   :  { %4177 = vmatprep.subr.bf16.mxu1 %v6240_v2  ;;  %v6289_v2 = vld [vmem:[%s8678_s1 + $0x860] ss:$48 sps:$4 sm:$0xff]  }
 0x17b   :  { %4149 = vmatpush2.bf16.msra.mxu0 %v6241_v5  ;;  %v6300_v5 = vld [vmem:[%s8678_s1 + $0x84] ss:$48 sps:$4 sm:$0xff]  }
 0x17c   :  { %4178 = vmatpush2.bf16.msra.mxu1 %v6238_v4  ;;  %4150 = vmatprep.subr.bf16.mxu0 %v6249_v44  ;;  %v6297_v4 = vld [vmem:[%s8678_s1 + $0x804] ss:$48 sps:$4 sm:$0xff]   ;;  %v6298_v44 = vld [vmem:[%s8678_s1 + $0x80] ss:$48 sps:$4 sm:$0xff]  }
 0x17d   :  { %4179 = vmatprep.subr.bf16.mxu1 %v6246_v9  ;;  %v6295_v9 = vld [vmem:[%s8678_s1 + $0x800] ss:$48 sps:$4 sm:$0xff]  }
 0x17f   :  { %4151 = vmatpush2.bf16.msra.mxu0 %v6247_v11  ;;  %v6306_v11 = vld [vmem:[%s8678_s1 + $0x24] ss:$48 sps:$4 sm:$0xff]  }
 0x180   :  { %4180 = vmatpush2.bf16.msra.mxu1 %v6244_v55  ;;  %4216 = vmatprep.subr.bf16.mxu0 %v6258_v14  ;;  %v6303_v55 = vld [vmem:[%s8678_s1 + $0x7a4] ss:$48 sps:$4 sm:$0xff]   ;;  %v6304_v14 = vld [vmem:[%s8678_s1 + $0x20] ss:$48 sps:$4 sm:$0xff]  }
 0x181   :  { %4181 = vmatprep.subr.bf16.mxu1 %v6252_v58  ;;  %v6301_v58 = vld [vmem:[%s8678_s1 + $0x7a0] ss:$48 sps:$4 sm:$0xff]  }
 0x182   :  { %v3826_v22 = vpop.f32.mrf.mxu0  ;;  %4153 = vmatmul.mubr.bf16.vlgmr.msra.gmra.mxu0 %v6853_v7 }
 0x183   :  { %v3827_v23 = vadd.f32 %v3826_v22, %v7707_v12  ;;  %4217 = vmatpush1.bf16.msra.mxu0 %v6256_v18  ;;  %4234 = vmatprep.mubr.bf16.mxu0 %v6598_v13  ;;  %v6259_v12 = vld [vmem:[%s8678_s1 + $0x1038] ss:$48 sps:$4 sm:$0xff]   ;;  %v6312_v18 = vld [vmem:[%s8678_s1 + $0x5c4] ss:$48 sps:$4 sm:$0xff]  }
 0x184   :  { %4182 = vmatpush2.bf16.msra.mxu1 %v6250_v15  ;;  %v3828_v25 = vpop.f32.mrf.mxu0  ;;  %4243 = vmatprep.subr.bf16.mxu0 %v6264_v21  ;;  %v6309_v15 = vld [vmem:[%s8678_s1 + $0x744] ss:$48 sps:$4 sm:$0xff]   ;;  %v6310_v21 = vld [vmem:[%s8678_s1 + $0x5c0] ss:$48 sps:$4 sm:$0xff]  }
 0x185   :  { %4183 = vmatprep.subr.bf16.mxu1 %v6255_v20  ;;  %v3829_v27 = vadd.f32 %v3828_v25, %v7721_v19  ;;  %v6270_v19 = vld [vmem:[%s8678_s1 + $0x264] ss:$48 sps:$4 sm:$0xff]   ;;  %v6307_v20 = vld [vmem:[%s8678_s1 + $0x740] ss:$48 sps:$4 sm:$0xff]  }
 0x186   :  { %v3830_v28 = vpop.f32.mrf.mxu0  ;;  %v6315_v22 = vld [vmem:[%s8678_s1 + $0x6e4] ss:$48 sps:$4 sm:$0xff]   ;;  %v6316_v25 = vld [vmem:[%s8678_s1 + $0x560] ss:$48 sps:$4 sm:$0xff]  }
 0x187   :  { %v6319_v28 = vld [vmem:[%s8678_s1 + $0x680] ss:$48 sps:$4 sm:$0xff]  }
 0x188   :  { %4184 = vmatpush2.bf16.msra.mxu1 %v6253_v24  ;;  %v3831_v31 = vpop.f32.mrf.mxu0  ;;  %v6313_v24 = vld [vmem:[%s8678_s1 + $0x6e0] ss:$48 sps:$4 sm:$0xff]  }
 0x189   :  { %4185 = vmatprep.subr.bf16.mxu1 %v6261_v26  ;;  %v6321_v26 = vld [vmem:[%s8678_s1 + $0x684] ss:$48 sps:$4 sm:$0xff]   ;;  %v6328_v31 = vld [vmem:[%s8678_s1 + $0x4a0] ss:$48 sps:$4 sm:$0xff]  }
 0x18a   :  { %5575 = vmatmul.mubr.msk.bf16.vlgmr.msra.gmra.mxu0 %vm3583_vm0, %v7548_v10  ;;  %v6276_v10 = vld [vmem:[%s8678_s1 + $0x204] ss:$48 sps:$4 sm:$0xff]  }
 0x18b   :  { %v3867_v32 = vpop.f32.mrf.mxu1  ;;  %4244 = vmatpush1.bf16.msra.mxu0 %v6262_v29  ;;  %4275 = vmatprep.mubr.bf16.mxu0 %v6782_v47  ;;  %v6327_v29 = vld [vmem:[%s8678_s1 + $0x624] ss:$48 sps:$4 sm:$0xff]  }
 0x18c   :  { %4186 = vmatpush2.bf16.msra.mxu1 %v6259_v12  ;;  %v3868_v34 = vadd.f32 %v3867_v32, %v3827_v23  ;;  %4245 = vmatprep.subr.bf16.mxu0 %v6270_v19  ;;  %v6318_v23 = vld [vmem:[%s8678_s1 + $0x564] ss:$48 sps:$4 sm:$0xff]   ;;  %v6322_v12 = vld [vmem:[%s8678_s1 + $0x500] ss:$48 sps:$4 sm:$0xff]  }
 0x18d   :  { %v3869_v37 = vpop.f32.mrf.mxu1  ;;  %4187 = vmatprep.subr.bf16.mxu1 %v6267_v30  ;;  %v6330_v30 = vld [vmem:[%s8678_s1 + $0x4a4] ss:$48 sps:$4 sm:$0xff]   ;;  %v6325_v19 = vld [vmem:[%s8678_s1 + $0x620] ss:$48 sps:$4 sm:$0xff]  }
 0x18e   :  { %v3870_v40 = vadd.f32 %v3869_v37, %v3829_v27  ;;  %v6324_v27 = vld [vmem:[%s8678_s1 + $0x504] ss:$48 sps:$4 sm:$0xff]  }
 0x18f   :  { %v3871_v41 = vpop.f32.mrf.mxu1  ;;  %4246 = vmatpush1.bf16.msra.mxu0 %v6268_v36  ;;  %v6333_v32 = vld [vmem:[%s8678_s1 + $0xbc4] ss:$48 sps:$4 sm:$0xff]   ;;  %v6334_v36 = vld [vmem:[%s8678_s1 + $0x440] ss:$48 sps:$4 sm:$0xff]  }
 0x190   :  { %4188 = vmatpush2.bf16.msra.mxu1 %v6265_v35  ;;  %4247 = vmatprep.subr.bf16.mxu0 %v6276_v10  ;;  %v6331_v35 = vld [vmem:[%s8678_s1 + $0xbc0] ss:$48 sps:$4 sm:$0xff]   ;;  %v6339_v37 = vld [vmem:[%s8678_s1 + $0xb64] ss:$48 sps:$4 sm:$0xff]  }
 0x191   :  { %v3872_v45 = vpop.f32.mrf.mxu1  ;;  %4189 = vmatprep.subr.bf16.mxu1 %v6273_v38  ;;  %v6342_v38 = vld [vmem:[%s8678_s1 + $0x3e4] ss:$48 sps:$4 sm:$0xff]   ;;  %v6337_v10 = vld [vmem:[%s8678_s1 + $0xb60] ss:$48 sps:$4 sm:$0xff]  }
 0x192   :  { %v6345_v41 = vld [vmem:[%s8678_s1 + $0xb04] ss:$48 sps:$4 sm:$0xff]   ;;  %v6346_v45 = vld [vmem:[%s8678_s1 + $0x380] ss:$48 sps:$4 sm:$0xff]  }
 0x193   :  { %v3908_v48 = vpop.f32.mrf.mxu1  ;;  %4248 = vmatpush1.bf16.msra.mxu0 %v6274_v43  ;;  %v6343_v43 = vld [vmem:[%s8678_s1 + $0xb00] ss:$48 sps:$4 sm:$0xff]  }
 0x194   :  { %4190 = vmatpush2.bf16.msra.mxu1 %v6271_v42  ;;  %v7930_v49 = vadd.f32 %v3908_v48, %v3868_v34  ;;  %4249 = vmatprep.subr.bf16.mxu0 %v6282_v17  ;;  %v6336_v34 = vld [vmem:[%s8678_s1 + $0x444] ss:$48 sps:$4 sm:$0xff]  }
 0x195   :  { %v3910_v53 = vpop.f32.mrf.mxu1  ;;  %4191 = vmatprep.subr.bf16.mxu1 %v6279_v46  ;;  %v6348_v42 = vld [vmem:[%s8678_s1 + $0x384] ss:$48 sps:$4 sm:$0xff]  }
 0x196   :  { %v7944_v57 = vadd.f32 %v3910_v53, %v3870_v40  ;;  %v6340_v40 = vld [vmem:[%s8678_s1 + $0x3e0] ss:$48 sps:$4 sm:$0xff]   ;;  %v6351_v46 = vld [vmem:[%s8678_s1 + $0xaa4] ss:$48 sps:$4 sm:$0xff]  }
 0x197   :  { %v3912_v59 = vpop.f32.mrf.mxu1  ;;  %4250 = vmatpush1.bf16.msra.mxu0 %v6280_v52  ;;  %v6354_v17 = vld [vmem:[%s8678_s1 + $0x324] ss:$48 sps:$4 sm:$0xff]   ;;  %v6352_v52 = vld [vmem:[%s8678_s1 + $0x320] ss:$48 sps:$4 sm:$0xff]  }
 0x198   :  { %v4571_v60 = vmax.f32 %v7688_v3, %v7944_v57  ;;  %4192 = vmatpush2.bf16.msra.mxu1 %v6277_v50  ;;  %4251 = vmatprep.subr.bf16.mxu0 %v6288_v56  ;;  %v6349_v50 = vld [vmem:[%s8678_s1 + $0xaa0] ss:$48 sps:$4 sm:$0xff]   ;;  %v6357_v53 = vld [vmem:[%s8678_s1 + $0xa44] ss:$48 sps:$4 sm:$0xff]  }
 0x199   :  { %v3913_v63 = vpop.f32.mrf.mxu1  ;;  %4284 = vmatprep.subr.bf16.mxu1 %v6285_v54  ;;  %v6360_v54 = vld [vmem:[%s8678_s1 + $0xec4] ss:$48 sps:$4 sm:$0xff]   ;;  %v4580_v3 = vld [vmem:[%s8681_s2] sm:$0x7] }
 0x19a   :  { %v6363_v63 = vld [vmem:[%s8678_s1 + $0x9e4] ss:$48 sps:$4 sm:$0xff]  }
 0x19b   :  { %4194 = vmatmul.mubr.bf16.vlgmr.msra.gmra.mxu1 %v7067_v16  ;;  %4252 = vmatpush1.bf16.msra.mxu0 %v6286_v62  ;;  %v6358_v62 = vld [vmem:[%s8678_s1 + $0xec0] ss:$48 sps:$4 sm:$0xff]  }
 0x19c   :  { %4285 = vmatpush1.bf16.msra.mxu1 %v6283_v61  ;;  %4253 = vmatprep.subr.bf16.mxu0 %v6294_v1  ;;  %v6355_v61 = vld [vmem:[%s8678_s1 + $0xa40] ss:$48 sps:$4 sm:$0xff]  }
 0x19d   :  { %4286 = vmatprep.subr.bf16.mxu1 %v6291_v0  ;;  %4316 = vmatprep.mubr.bf16.mxu1 %v6793_v51  ;;  %v6366_v0 = vld [vmem:[%s8678_s1 + $0xe64] ss:$48 sps:$4 sm:$0xff]  }
 0x19f   :  { %4254 = vmatpush1.bf16.msra.mxu0 %v6292_v39  ;;  %v6364_v39 = vld [vmem:[%s8678_s1 + $0xe60] ss:$48 sps:$4 sm:$0xff]  }
 0x1a0   :  { %4287 = vmatpush1.bf16.msra.mxu1 %v6289_v2  ;;  %4255 = vmatprep.subr.bf16.mxu0 %v6300_v5  ;;  %v6361_v2 = vld [vmem:[%s8678_s1 + $0x9e0] ss:$48 sps:$4 sm:$0xff]   ;;  %v6372_v5 = vld [vmem:[%s8678_s1 + $0xe04] ss:$48 sps:$4 sm:$0xff]  }
 0x1a1   :  { %4288 = vmatprep.subr.bf16.mxu1 %v6297_v4  ;;  %v6369_v4 = vld [vmem:[%s8678_s1 + $0x984] ss:$48 sps:$4 sm:$0xff]  }
 0x1a3   :  { %4256 = vmatpush1.bf16.msra.mxu0 %v6298_v44  ;;  %v6370_v44 = vld [vmem:[%s8678_s1 + $0xe00] ss:$48 sps:$4 sm:$0xff]  }
 0x1a4   :  { %4289 = vmatpush1.bf16.msra.mxu1 %v6295_v9  ;;  %4257 = vmatprep.subr.bf16.mxu0 %v6306_v11  ;;  %v6367_v9 = vld [vmem:[%s8678_s1 + $0x980] ss:$48 sps:$4 sm:$0xff]   ;;  %v6378_v11 = vld [vmem:[%s8678_s1 + $0xda4] ss:$48 sps:$4 sm:$0xff]  }
 0x1a5   :  { %4290 = vmatprep.subr.bf16.mxu1 %v6303_v55  ;;  %v6375_v55 = vld [vmem:[%s8678_s1 + $0x924] ss:$48 sps:$4 sm:$0xff]  }
 0x1a7   :  { %4258 = vmatpush1.bf16.msra.mxu0 %v6304_v14 }
 0x1a8   :  { %4291 = vmatpush1.bf16.msra.mxu1 %v6301_v58  ;;  %4259 = vmatprep.subr.bf16.mxu0 %v6312_v18  ;;  %v6376_v18 = vld [vmem:[%s8678_s1 + $0xda0] ss:$48 sps:$4 sm:$0xff]  }
 0x1a9   :  { %4292 = vmatprep.subr.bf16.mxu1 %v6309_v15  ;;  %v6373_v15 = vld [vmem:[%s8678_s1 + $0x920] ss:$48 sps:$4 sm:$0xff]  }
 0x1ab   :  { %4260 = vmatpush2.bf16.msra.mxu0 %v6310_v21  ;;  %v6381_v21 = vld [vmem:[%s8678_s1 + $0x1224] ss:$48 sps:$4 sm:$0xff]  }
 0x1ac   :  { %4293 = vmatpush1.bf16.msra.mxu1 %v6307_v20  ;;  %4261 = vmatprep.subr.bf16.mxu0 %v6318_v23 }
 0x1ad   :  { %4294 = vmatprep.subr.bf16.mxu1 %v6315_v22  ;;  %v6384_v22 = vld [vmem:[%s8678_s1 + $0xd44] ss:$48 sps:$4 sm:$0xff]  }
 0x1af   :  { %4262 = vmatpush2.bf16.msra.mxu0 %v6316_v25  ;;  %v6379_v25 = vld [vmem:[%s8678_s1 + $0x1220] ss:$48 sps:$4 sm:$0xff]  }
 0x1b0   :  { %4295 = vmatpush1.bf16.msra.mxu1 %v6313_v24  ;;  %4263 = vmatprep.subr.bf16.mxu0 %v6324_v27 }
 0x1b1   :  { %4296 = vmatprep.subr.bf16.mxu1 %v6321_v26  ;;  %v6382_v26 = vld [vmem:[%s8678_s1 + $0xd40] ss:$48 sps:$4 sm:$0xff]  }
 0x1b3   :  { %4264 = vmatpush2.bf16.msra.mxu0 %v6322_v12  ;;  %v6390_v12 = vld [vmem:[%s8678_s1 + $0x2cc] ss:$48 sps:$4 sm:$0xff]  }
 0x1b4   :  { %4297 = vmatpush1.bf16.msra.mxu1 %v6319_v28  ;;  %4265 = vmatprep.subr.bf16.mxu0 %v6330_v30  ;;  %v6387_v28 = vld [vmem:[%s8678_s1 + $0xce4] ss:$48 sps:$4 sm:$0xff]   ;;  %v6385_v30 = vld [vmem:[%s8678_s1 + $0xce0] ss:$48 sps:$4 sm:$0xff]  }
 0x1b5   :  { %4298 = vmatprep.subr.bf16.mxu1 %v6327_v29 }
 0x1b7   :  { %4266 = vmatpush2.bf16.msra.mxu0 %v6328_v31  ;;  %v6393_v31 = vld [vmem:[%s8678_s1 + $0xc84] ss:$48 sps:$4 sm:$0xff]  }
 0x1b8   :  { %4299 = vmatpush1.bf16.msra.mxu1 %v6325_v19  ;;  %4267 = vmatprep.subr.bf16.mxu0 %v6336_v34  ;;  %v6388_v34 = vld [vmem:[%s8678_s1 + $0x2c8] ss:$48 sps:$4 sm:$0xff]  }
 0x1b9   :  { %4300 = vmatprep.subr.bf16.mxu1 %v6333_v32 }
 0x1bb   :  { %4268 = vmatpush2.bf16.msra.mxu0 %v6334_v36 }
 0x1bc   :  { %4301 = vmatpush2.bf16.msra.mxu1 %v6331_v35  ;;  %4269 = vmatprep.subr.bf16.mxu0 %v6342_v38  ;;  %v6391_v35 = vld [vmem:[%s8678_s1 + $0xc80] ss:$48 sps:$4 sm:$0xff]   ;;  %v6399_v38 = vld [vmem:[%s8678_s1 + $0xc24] ss:$48 sps:$4 sm:$0xff]  }
 0x1bd   :  { %4302 = vmatprep.subr.bf16.mxu1 %v6339_v37  ;;  %v6396_v37 = vld [vmem:[%s8678_s1 + $0x26c] ss:$48 sps:$4 sm:$0xff]  }
 0x1bf   :  { %4270 = vmatpush2.bf16.msra.mxu0 %v6340_v40  ;;  %v6394_v40 = vld [vmem:[%s8678_s1 + $0x268] ss:$48 sps:$4 sm:$0xff]  }
 0x1c0   :  { %4303 = vmatpush2.bf16.msra.mxu1 %v6337_v10  ;;  %4271 = vmatprep.subr.bf16.mxu0 %v6348_v42  ;;  %v8187_v10 = vld [vmem:[%s8679_s0 + $0x18] ss:$0 sps:$4 sm:$0xff]   ;;  %v6402_v42 = vld [vmem:[%s8678_s1 + $0x20c] ss:$48 sps:$4 sm:$0xff]  }
 0x1c1   :  { %4304 = vmatprep.subr.bf16.mxu1 %v6345_v41  ;;  %v6397_v41 = vld [vmem:[%s8678_s1 + $0xc20] ss:$48 sps:$4 sm:$0xff]  }
 0x1c2   :  { %v3949_v48 = vpop.f32.mrf.mxu0 }
 0x1c3   :  { %4272 = vmatpush2.bf16.msra.mxu0 %v6346_v45  ;;  %v6400_v45 = vld [vmem:[%s8678_s1 + $0x208] ss:$48 sps:$4 sm:$0xff]  }
 0x1c4   :  { %4305 = vmatpush2.bf16.msra.mxu1 %v6343_v43  ;;  %4273 = vmatprep.subr.bf16.mxu0 %v6354_v17  ;;  %v3951_v56 = vpop.f32.mrf.mxu0  ;;  %v6405_v43 = vld [vmem:[%s8678_s1 + $0x11c4] ss:$48 sps:$4 sm:$0xff]   ;;  %v6408_v17 = vld [vmem:[%s8678_s1 + $0x1ac] ss:$48 sps:$4 sm:$0xff]  }
 0x1c5   :  { %4306 = vmatprep.subr.bf16.mxu1 %v6351_v46  ;;  %v6403_v46 = vld [vmem:[%s8678_s1 + $0x11c0] ss:$48 sps:$4 sm:$0xff]  }
 0x1c6   :  { %v3953_v59 = vpop.f32.mrf.mxu0 }
 0x1c7   :  { %4274 = vmatpush2.bf16.msra.mxu0 %v6352_v52  ;;  %v6414_v52 = vld [vmem:[%s8678_s1 + $0x14c] ss:$48 sps:$4 sm:$0xff]  }
 0x1c8   :  { %4307 = vmatpush2.bf16.msra.mxu1 %v6349_v50  ;;  %4325 = vmatprep.subr.bf16.mxu0 %v6360_v54  ;;  %v3954_v1 = vpop.f32.mrf.mxu0  ;;  %v6409_v50 = vld [vmem:[%s8678_s1 + $0x1160] ss:$48 sps:$4 sm:$0xff]   ;;  %v6412_v54 = vld [vmem:[%s8678_s1 + $0x148] ss:$48 sps:$4 sm:$0xff]   ;;  %v6420_v59 = vld [vmem:[%s8678_s1 + $0xec] ss:$48 sps:$4 sm:$0xff]  }
 0x1c9   :  { %4308 = vmatprep.subr.bf16.mxu1 %v6357_v53  ;;  %v6417_v53 = vld [vmem:[%s8678_s1 + $0x1104] ss:$48 sps:$4 sm:$0xff]  }
 0x1ca   :  { %4276 = vmatmul.mubr.bf16.vlgmr.msra.gmra.mxu0 %v6851_v6  ;;  %v6429_v1 = vld [vmem:[%s8678_s1 + $0x1044] ss:$48 sps:$4 sm:$0xff]  }
 0x1cb   :  { %4326 = vmatpush1.bf16.msra.mxu0 %v6358_v62  ;;  %4357 = vmatprep.mubr.bf16.mxu0 %v6939_v33  ;;  %v6418_v62 = vld [vmem:[%s8678_s1 + $0xe8] ss:$48 sps:$4 sm:$0xff]  }
 0x1cc   :  { %4309 = vmatpush2.bf16.msra.mxu1 %v6355_v61  ;;  %4327 = vmatprep.subr.bf16.mxu0 %v6366_v0  ;;  %v6423_v61 = vld [vmem:[%s8678_s1 + $0x10a4] ss:$48 sps:$4 sm:$0xff]   ;;  %v6426_v0 = vld [vmem:[%s8678_s1 + $0x8c] ss:$48 sps:$4 sm:$0xff]  }
 0x1cd   :  { %4310 = vmatprep.subr.bf16.mxu1 %v6363_v63  ;;  %v6421_v63 = vld [vmem:[%s8678_s1 + $0x10a0] ss:$48 sps:$4 sm:$0xff]  }
 0x1cf   :  { %4328 = vmatpush1.bf16.msra.mxu0 %v6364_v39  ;;  %v6427_v39 = vld [vmem:[%s8678_s1 + $0x1040] ss:$48 sps:$4 sm:$0xff]  }
 0x1d0   :  { %4311 = vmatpush2.bf16.msra.mxu1 %v6361_v2  ;;  %4329 = vmatprep.subr.bf16.mxu0 %v6372_v5  ;;  %v6424_v2 = vld [vmem:[%s8678_s1 + $0x88] ss:$48 sps:$4 sm:$0xff]   ;;  %v6435_v5 = vld [vmem:[%s8678_s1 + $0xfe4] ss:$48 sps:$4 sm:$0xff]  }
 0x1d1   :  { %4312 = vmatprep.subr.bf16.mxu1 %v6369_v4  ;;  %v6432_v4 = vld [vmem:[%s8678_s1 + $0x2c] ss:$48 sps:$4 sm:$0xff]  }
 0x1d3   :  { %v3990_v58 = vpop.f32.mrf.mxu1  ;;  %4330 = vmatpush1.bf16.msra.mxu0 %v6370_v44  ;;  %v6433_v44 = vld [vmem:[%s8678_s1 + $0xfe0] ss:$48 sps:$4 sm:$0xff]  }
 0x1d4   :  { %v8132_v14 = vadd.f32 %v3990_v58, %v3949_v48  ;;  %4313 = vmatpush2.bf16.msra.mxu1 %v6367_v9  ;;  %4331 = vmatprep.subr.bf16.mxu0 %v6378_v11  ;;  %v6406_v48 = vld [vmem:[%s8678_s1 + $0x1a8] ss:$48 sps:$4 sm:$0xff]   ;;  %v6441_v11 = vld [vmem:[%s8678_s1 + $0xf84] ss:$48 sps:$4 sm:$0xff]  }
 0x1d5   :  { %v3992_v20 = vpop.f32.mrf.mxu1  ;;  %4314 = vmatprep.subr.bf16.mxu1 %v6375_v55  ;;  %v6430_v9 = vld [vmem:[%s8678_s1 + $0x28] ss:$48 sps:$4 sm:$0xff]   ;;  %v6438_v55 = vld [vmem:[%s8678_s1 + $0x5cc] ss:$48 sps:$4 sm:$0xff]  }
 0x1d6   :  { %v8146_v23 = vadd.f32 %v3992_v20, %v3951_v56  ;;  %v6415_v56 = vld [vmem:[%s8678_s1 + $0x1100] ss:$48 sps:$4 sm:$0xff]   ;;  %v6436_v58 = vld [vmem:[%s8678_s1 + $0x5c8] ss:$48 sps:$4 sm:$0xff]   ;;  %v6447_v20 = vld [vmem:[%s8678_s1 + $0xf24] ss:$48 sps:$4 sm:$0xff]  }
 0x1d7   :  { %v3994_v24 = vpop.f32.mrf.mxu1  ;;  %4332 = vmatpush1.bf16.msra.mxu0 %v6376_v18  ;;  %v6444_v18 = vld [vmem:[%s8678_s1 + $0x56c] ss:$48 sps:$4 sm:$0xff]  }
 0x1d8   :  { %4315 = vmatpush2.bf16.msra.mxu1 %v6373_v15  ;;  %4333 = vmatprep.subr.bf16.mxu0 %v6384_v22  ;;  %v6439_v15 = vld [vmem:[%s8678_s1 + $0xf80] ss:$48 sps:$4 sm:$0xff]   ;;  %v6442_v24 = vld [vmem:[%s8678_s1 + $0x568] ss:$48 sps:$4 sm:$0xff]  }
 0x1d9   :  { %v3995_v27 = vpop.f32.mrf.mxu1  ;;  %4380 = vmatprep.subr.bf16.mxu1 %v6381_v21 }
 0x1da   :  { %v6450_v27 = vld [vmem:[%s8678_s1 + $0x50c] ss:$48 sps:$4 sm:$0xff]  }
 0x1db   :  { %4317 = vmatmul.mubr.bf16.vlgmr.msra.gmra.mxu1 %v6853_v7  ;;  %v8161_v29 = vpop.f32.mrf.mxu1  ;;  %4334 = vmatpush1.bf16.msra.mxu0 %v6382_v26 }
 0x1dc   :  { %4381 = vmatpush1.bf16.msra.mxu1 %v6379_v25  ;;  %4335 = vmatprep.subr.bf16.mxu0 %v6387_v28  ;;  %v6445_v25 = vld [vmem:[%s8678_s1 + $0xf20] ss:$48 sps:$4 sm:$0xff]  }
 0x1dd   :  { %v8166_v19 = vpop.f32.mrf.mxu1  ;;  %4398 = vmatprep.mubr.bf16.mxu1 %v6598_v13  ;;  %4407 = vmatprep.subr.bf16.mxu1 %v6390_v12 }
 0x1df   :  { %v4076_v32 = vpop.f32.mrf.mxu1  ;;  %4336 = vmatpush1.bf16.msra.mxu0 %v6385_v30 }
 0x1e0   :  { %4337 = vmatprep.subr.bf16.mxu0 %v6393_v31 }
 0x1e1   :  { %v4077_v36 = vpop.f32.mrf.mxu1 }
 0x1e3   :  { %5576 = vmatmul.mubr.msk.bf16.vlgmr.msra.gmra.mxu1 %vm3583_vm0, %v8187_v10  ;;  %4338 = vmatpush1.bf16.msra.mxu0 %v6391_v35 }
 0x1e4   :  { %4408 = vmatpush1.bf16.msra.mxu1 %v6388_v34  ;;  %4339 = vmatprep.subr.bf16.mxu0 %v6399_v38  ;;  %v6448_v34 = vld [vmem:[%s8678_s1 + $0x508] ss:$48 sps:$4 sm:$0xff]  }
 0x1e5   :  { %4409 = vmatprep.subr.bf16.mxu1 %v6396_v37  ;;  %4439 = vmatprep.mubr.bf16.mxu1 %v6782_v47  ;;  %v6411_v47 = vld [vmem:[%s8678_s1 + $0x1164] ss:$48 sps:$4 sm:$0xff]   ;;  %v6454_v37 = vld [vmem:[%s8678_s1 + $0x4a8] ss:$48 sps:$4 sm:$0xff]  }
 0x1e6   :  { %v6457_v38 = vld [vmem:[%s8678_s1 + $0x868] ss:$48 sps:$4 sm:$0xff]  }
 0x1e7   :  { %4340 = vmatpush1.bf16.msra.mxu0 %v6397_v41  ;;  %v6465_v41 = vld [vmem:[%s8678_s1 + $0x80c] ss:$48 sps:$4 sm:$0xff]  }
 0x1e8   :  { %4410 = vmatpush1.bf16.msra.mxu1 %v6394_v40  ;;  %4341 = vmatprep.subr.bf16.mxu0 %v6405_v43  ;;  %v6462_v40 = vld [vmem:[%s8678_s1 + $0x44c] ss:$48 sps:$4 sm:$0xff]   ;;  %v6463_v43 = vld [vmem:[%s8678_s1 + $0x808] ss:$48 sps:$4 sm:$0xff]  }
 0x1e9   :  { %4411 = vmatprep.subr.bf16.mxu1 %v6402_v42  ;;  %v6460_v42 = vld [vmem:[%s8678_s1 + $0x448] ss:$48 sps:$4 sm:$0xff]  }
 0x1eb   :  { %4342 = vmatpush2.bf16.msra.mxu0 %v6403_v46  ;;  %v6466_v46 = vld [vmem:[%s8678_s1 + $0x3e8] ss:$48 sps:$4 sm:$0xff]  }
 0x1ec   :  { %4412 = vmatpush1.bf16.msra.mxu1 %v6400_v45  ;;  %4343 = vmatprep.subr.bf16.mxu0 %v6411_v47  ;;  %v6468_v45 = vld [vmem:[%s8678_s1 + $0x3ec] ss:$48 sps:$4 sm:$0xff]  }
 0x1ed   :  { %4413 = vmatprep.subr.bf16.mxu1 %v6408_v17  ;;  %v6469_v17 = vld [vmem:[%s8678_s1 + $0x7a8] ss:$48 sps:$4 sm:$0xff]   ;;  %v6474_v47 = vld [vmem:[%s8678_s1 + $0x38c] ss:$48 sps:$4 sm:$0xff]  }
 0x1ef   :  { %4344 = vmatpush2.bf16.msra.mxu0 %v6409_v50  ;;  %v6472_v50 = vld [vmem:[%s8678_s1 + $0x388] ss:$48 sps:$4 sm:$0xff]  }
 0x1f0   :  { %4414 = vmatpush1.bf16.msra.mxu1 %v6406_v48  ;;  %4345 = vmatprep.subr.bf16.mxu0 %v6417_v53  ;;  %v6477_v48 = vld [vmem:[%s8678_s1 + $0x74c] ss:$48 sps:$4 sm:$0xff]  }
 0x1f1   :  { %4415 = vmatprep.subr.bf16.mxu1 %v6414_v52  ;;  %v6475_v52 = vld [vmem:[%s8678_s1 + $0x748] ss:$48 sps:$4 sm:$0xff]   ;;  %v6480_v53 = vld [vmem:[%s8678_s1 + $0x32c] ss:$48 sps:$4 sm:$0xff]  }
 0x1f3   :  { %4346 = vmatpush2.bf16.msra.mxu0 %v6415_v56 }
 0x1f4   :  { %4416 = vmatpush1.bf16.msra.mxu1 %v6412_v54  ;;  %4347 = vmatprep.subr.bf16.mxu0 %v6423_v61  ;;  %v6483_v54 = vld [vmem:[%s8678_s1 + $0x6ec] ss:$48 sps:$4 sm:$0xff]   ;;  %v6481_v61 = vld [vmem:[%s8678_s1 + $0x6e8] ss:$48 sps:$4 sm:$0xff]  }
 0x1f5   :  { %4417 = vmatprep.subr.bf16.mxu1 %v6420_v59  ;;  %v6478_v59 = vld [vmem:[%s8678_s1 + $0x328] ss:$48 sps:$4 sm:$0xff]  }
 0x1f7   :  { %4348 = vmatpush2.bf16.msra.mxu0 %v6421_v63  ;;  %v6486_v63 = vld [vmem:[%s8678_s1 + $0xecc] ss:$48 sps:$4 sm:$0xff]  }
 0x1f8   :  { %4418 = vmatpush1.bf16.msra.mxu1 %v6418_v62  ;;  %4349 = vmatprep.subr.bf16.mxu0 %v6429_v1 }
 0x1f9   :  { %4419 = vmatprep.subr.bf16.mxu1 %v6426_v0  ;;  %v6489_v0 = vld [vmem:[%s8678_s1 + $0x68c] ss:$48 sps:$4 sm:$0xff]  }
 0x1fb   :  { %4350 = vmatpush2.bf16.msra.mxu0 %v6427_v39  ;;  %v6487_v39 = vld [vmem:[%s8678_s1 + $0x688] ss:$48 sps:$4 sm:$0xff]  }
 0x1fc   :  { %4420 = vmatpush1.bf16.msra.mxu1 %v6424_v2  ;;  %4351 = vmatprep.subr.bf16.mxu0 %v6435_v5  ;;  %v6484_v2 = vld [vmem:[%s8678_s1 + $0xec8] ss:$48 sps:$4 sm:$0xff]   ;;  %v6492_v5 = vld [vmem:[%s8678_s1 + $0xe6c] ss:$48 sps:$4 sm:$0xff]  }
 0x1fd   :  { %4421 = vmatprep.subr.bf16.mxu1 %v6432_v4 }
 0x1ff   :  { %4352 = vmatpush2.bf16.msra.mxu0 %v6433_v44  ;;  %v6490_v44 = vld [vmem:[%s8678_s1 + $0xe68] ss:$48 sps:$4 sm:$0xff]  }
 0x200   :  { %4422 = vmatpush1.bf16.msra.mxu1 %v6430_v9  ;;  %4353 = vmatprep.subr.bf16.mxu0 %v6441_v11  ;;  %v6495_v9 = vld [vmem:[%s8678_s1 + $0x62c] ss:$48 sps:$4 sm:$0xff]  }
 0x201   :  { %4423 = vmatprep.subr.bf16.mxu1 %v6438_v55  ;;  %v6493_v55 = vld [vmem:[%s8678_s1 + $0x628] ss:$48 sps:$4 sm:$0xff]   ;;  %v6498_v11 = vld [vmem:[%s8678_s1 + $0xe0c] ss:$48 sps:$4 sm:$0xff]  }
 0x202   :  { %v4031_v21 = vpop.f32.mrf.mxu0 }
 0x203   :  { %v4032_v22 = vadd.f32 %v4031_v21, %v8132_v14  ;;  %4354 = vmatpush2.bf16.msra.mxu0 %v6439_v15  ;;  %v6453_v14 = vld [vmem:[%s8678_s1 + $0x8cc] ss:$48 sps:$4 sm:$0xff]   ;;  %v6499_v15 = vld [vmem:[%s8678_s1 + $0xbc8] ss:$48 sps:$4 sm:$0xff]  }
 0x204   :  { %4424 = vmatpush2.bf16.msra.mxu1 %v6436_v58  ;;  %v4033_v26 = vpop.f32.mrf.mxu0  ;;  %4355 = vmatprep.subr.bf16.mxu0 %v6447_v20  ;;  %v6496_v58 = vld [vmem:[%s8678_s1 + $0xe08] ss:$48 sps:$4 sm:$0xff]  }
 0x205   :  { %4425 = vmatprep.subr.bf16.mxu1 %v6444_v18  ;;  %v8302_v28 = vadd.f32 %v8161_v29, %v4032_v22  ;;  %v4034_v12 = vadd.f32 %v4033_v26, %v8146_v23  ;;  %v6451_v29 = vld [vmem:[%s8678_s1 + $0x8c8] ss:$48 sps:$4 sm:$0xff]   ;;  %v6456_v23 = vld [vmem:[%s8678_s1 + $0x4ac] ss:$48 sps:$4 sm:$0xff]  }
 0x206   :  { %v4035_v30 = vpop.f32.mrf.mxu0  ;;  %v6504_v18 = vld [vmem:[%s8678_s1 + $0xdac] ss:$48 sps:$4 sm:$0xff]   ;;  %v6502_v20 = vld [vmem:[%s8678_s1 + $0xda8] ss:$48 sps:$4 sm:$0xff]  }
 0x207   :  { %v4572_v31 = vmax.f32 %v7696_v8, %v8302_v28  ;;  %v8308_v32 = vadd.f32 %v8166_v19, %v4034_v12  ;;  %4356 = vmatpush2.bf16.msra.mxu0 %v6445_v25  ;;  %v6459_v19 = vld [vmem:[%s8678_s1 + $0x86c] ss:$48 sps:$4 sm:$0xff]   ;;  %v6505_v21 = vld [vmem:[%s8678_s1 + $0xb68] ss:$48 sps:$4 sm:$0xff]   ;;  %v6589_v8 = vld [vmem:[%s8682_s5 + $0x10] ss:$0 sps:$4 sm:$0xff]  }
 0x208   :  { %4426 = vmatpush2.bf16.msra.mxu1 %v6442_v24  ;;  %4448 = vmatprep.subr.bf16.mxu0 %v6453_v14  ;;  %v4036_v35 = vpop.f32.mrf.mxu0  ;;  %v6510_v22 = vld [vmem:[%s8678_s1 + $0xd4c] ss:$48 sps:$4 sm:$0xff]   ;;  %v6508_v25 = vld [vmem:[%s8678_s1 + $0xd48] ss:$48 sps:$4 sm:$0xff]  }
 0x209   :  { %4427 = vmatprep.subr.bf16.mxu1 %v6450_v27  ;;  %v4573_v36 = vmax.f32 %v7930_v49, %v8308_v32  ;;  %v6513_v24 = vld [vmem:[%s8678_s1 + $0xb0c] ss:$48 sps:$4 sm:$0xff]   ;;  %v6511_v26 = vld [vmem:[%s8678_s1 + $0xb08] ss:$48 sps:$4 sm:$0xff]   ;;  %v4920_v49 = vsel %vm4918_vm2, %v6589_v8, 0 }
 0x20a   :  { %4358 = vmatmul.mubr.bf16.vlgmr.msra.gmra.mxu0 %v7067_v16  ;;  %v6516_v27 = vld [vmem:[%s8678_s1 + $0xcec] ss:$48 sps:$4 sm:$0xff]   ;;  %v6514_v12 = vld [vmem:[%s8678_s1 + $0xce8] ss:$48 sps:$4 sm:$0xff]  }
 0x20b   :  { %4449 = vmatpush1.bf16.msra.mxu0 %v6451_v29  ;;  %4480 = vmatprep.mubr.bf16.mxu0 %v6793_v51  ;;  %v6471_v51 = vld [vmem:[%s8678_s1 + $0x7ac] ss:$48 sps:$4 sm:$0xff]   ;;  %v6517_v30 = vld [vmem:[%s8678_s1 + $0xaa8] ss:$48 sps:$4 sm:$0xff]  }
 0x20c   :  { %4428 = vmatpush2.bf16.msra.mxu1 %v6448_v34  ;;  %4450 = vmatprep.subr.bf16.mxu0 %v6459_v19  ;;  %v6519_v14 = vld [vmem:[%s8678_s1 + $0xaac] ss:$48 sps:$4 sm:$0xff]   ;;  %v6523_v19 = vld [vmem:[%s8678_s1 + $0xa48] ss:$48 sps:$4 sm:$0xff]  }
 0x20d   :  { %4429 = vmatprep.subr.bf16.mxu1 %v6456_v23  ;;  %v6522_v34 = vld [vmem:[%s8678_s1 + $0xc8c] ss:$48 sps:$4 sm:$0xff]   ;;  %v6520_v23 = vld [vmem:[%s8678_s1 + $0xc88] ss:$48 sps:$4 sm:$0xff]  }
 0x20e   :  { %v6525_v29 = vld [vmem:[%s8678_s1 + $0xa4c] ss:$48 sps:$4 sm:$0xff]  }
 0x20f   :  { %4451 = vmatpush1.bf16.msra.mxu0 %v6457_v38  ;;  %v6528_v35 = vld [vmem:[%s8678_s1 + $0xc2c] ss:$48 sps:$4 sm:$0xff]   ;;  %v6526_v38 = vld [vmem:[%s8678_s1 + $0xc28] ss:$48 sps:$4 sm:$0xff]  }
 0x210   :  { %4430 = vmatpush2.bf16.msra.mxu1 %v6454_v37  ;;  %4452 = vmatprep.subr.bf16.mxu0 %v6465_v41  ;;  %v6531_v37 = vld [vmem:[%s8678_s1 + $0x9ec] ss:$48 sps:$4 sm:$0xff]  }
 0x211   :  { %4431 = vmatprep.subr.bf16.mxu1 %v6462_v40  ;;  %v6529_v40 = vld [vmem:[%s8678_s1 + $0x9e8] ss:$48 sps:$4 sm:$0xff]   ;;  %v6534_v41 = vld [vmem:[%s8678_s1 + $0x11cc] ss:$48 sps:$4 sm:$0xff]  }
 0x212   :  { %v6590_v28 = vld [vmem:[%s8682_s5 + $0x8] sm:$0xff]  }
 0x213   :  { %4453 = vmatpush1.bf16.msra.mxu0 %v6463_v43  ;;  %v6532_v43 = vld [vmem:[%s8678_s1 + $0x11c8] ss:$48 sps:$4 sm:$0xff]  }
 0x214   :  { %4432 = vmatpush2.bf16.msra.mxu1 %v6460_v42  ;;  %4454 = vmatprep.subr.bf16.mxu0 %v6471_v51  ;;  %v6537_v42 = vld [vmem:[%s8678_s1 + $0x98c] ss:$48 sps:$4 sm:$0xff]  }
 0x215   :  { %4433 = vmatprep.subr.bf16.mxu1 %v6468_v45  ;;  %v6535_v45 = vld [vmem:[%s8678_s1 + $0x988] ss:$48 sps:$4 sm:$0xff]   ;;  %v6540_v51 = vld [vmem:[%s8678_s1 + $0x116c] ss:$48 sps:$4 sm:$0xff]  }
 0x217   :  { %4455 = vmatpush1.bf16.msra.mxu0 %v6469_v17 }
 0x218   :  { %4434 = vmatpush2.bf16.msra.mxu1 %v6466_v46  ;;  %4456 = vmatprep.subr.bf16.mxu0 %v6477_v48  ;;  %v6543_v46 = vld [vmem:[%s8678_s1 + $0x92c] ss:$48 sps:$4 sm:$0xff]   ;;  %v6538_v48 = vld [vmem:[%s8678_s1 + $0x1168] ss:$48 sps:$4 sm:$0xff]  }
 0x219   :  { %4435 = vmatprep.subr.bf16.mxu1 %v6474_v47 }
 0x21b   :  { %v8374_v56 = vpop.f32.mrf.mxu1  ;;  %4457 = vmatpush1.bf16.msra.mxu0 %v6475_v52 }
 0x21c   :  { %4436 = vmatpush2.bf16.msra.mxu1 %v6472_v50  ;;  %4458 = vmatprep.subr.bf16.mxu0 %v6483_v54  ;;  %v6541_v50 = vld [vmem:[%s8678_s1 + $0x928] ss:$48 sps:$4 sm:$0xff]   ;;  %v6561_v54 = vld [vmem:[%s8678_s1 + $0x122c] ss:$48 sps:$4 sm:$0xff]  }
 0x21d   :  { %v8382_v62 = vpop.f32.mrf.mxu1  ;;  %4437 = vmatprep.subr.bf16.mxu1 %v6480_v53  ;;  %v6546_v53 = vld [vmem:[%s8678_s1 + $0x110c] ss:$48 sps:$4 sm:$0xff]  }
 0x21f   :  { %v4117_v1 = vpop.f32.mrf.mxu1  ;;  %4459 = vmatpush1.bf16.msra.mxu0 %v6481_v61  ;;  %v6544_v61 = vld [vmem:[%s8678_s1 + $0x1108] ss:$48 sps:$4 sm:$0xff]  }
 0x220   :  { %4438 = vmatpush2.bf16.msra.mxu1 %v6478_v59  ;;  %4460 = vmatprep.subr.bf16.mxu0 %v6489_v0  ;;  %v6549_v0 = vld [vmem:[%s8678_s1 + $0x10ac] ss:$48 sps:$4 sm:$0xff]  }
 0x221   :  { %v4118_v4 = vpop.f32.mrf.mxu1  ;;  %4489 = vmatprep.subr.bf16.mxu1 %v6486_v63  ;;  %v6559_v63 = vld [vmem:[%s8678_s1 + $0x1228] ss:$48 sps:$4 sm:$0xff]  }
 0x223   :  { %4440 = vmatmul.mubr.bf16.vlgmr.msra.gmra.mxu1 %v6851_v6  ;;  %4461 = vmatpush1.bf16.msra.mxu0 %v6487_v39  ;;  %v6501_v6 = vld [vmem:[%s8678_s1 + $0xbcc] ss:$48 sps:$4 sm:$0xff]  }
 0x224   :  { %4490 = vmatpush1.bf16.msra.mxu1 %v6484_v2  ;;  %4462 = vmatprep.subr.bf16.mxu0 %v6495_v9  ;;  %v6547_v2 = vld [vmem:[%s8678_s1 + $0x10a8] ss:$48 sps:$4 sm:$0xff]   ;;  %v6552_v39 = vld [vmem:[%s8678_s1 + $0x104c] ss:$48 sps:$4 sm:$0xff]  }
 0x225   :  { %4491 = vmatprep.subr.bf16.mxu1 %v6492_v5  ;;  %4521 = vmatprep.mubr.bf16.mxu1 %v6939_v33  ;;  %v6507_v33 = vld [vmem:[%s8678_s1 + $0xb6c] ss:$48 sps:$4 sm:$0xff]  }
 0x226   :  { %v6555_v9 = vld [vmem:[%s8678_s1 + $0xfec] ss:$48 sps:$4 sm:$0xff]  }
 0x227   :  { %4463 = vmatpush1.bf16.msra.mxu0 %v6493_v55  ;;  %v6558_v55 = vld [vmem:[%s8678_s1 + $0xf8c] ss:$48 sps:$4 sm:$0xff]  }
 0x228   :  { %4492 = vmatpush1.bf16.msra.mxu1 %v6490_v44  ;;  %4464 = vmatprep.subr.bf16.mxu0 %v6501_v6 }
 0x229   :  { %4493 = vmatprep.subr.bf16.mxu1 %v6498_v11  ;;  %v6556_v11 = vld [vmem:[%s8678_s1 + $0xf88] ss:$48 sps:$4 sm:$0xff]  }
 0x22b   :  { %4465 = vmatpush2.bf16.msra.mxu0 %v6499_v15  ;;  %v6562_v15 = vld [vmem:[%s8678_s1 + $0xf28] ss:$48 sps:$4 sm:$0xff]  }
 0x22c   :  { %4494 = vmatpush1.bf16.msra.mxu1 %v6496_v58  ;;  %4466 = vmatprep.subr.bf16.mxu0 %v6507_v33 }
 0x22d   :  { %4495 = vmatprep.subr.bf16.mxu1 %v6504_v18 }
 0x22f   :  { %4467 = vmatpush2.bf16.msra.mxu0 %v6505_v21 }
 0x230   :  { %4496 = vmatpush1.bf16.msra.mxu1 %v6502_v20  ;;  %4468 = vmatprep.subr.bf16.mxu0 %v6513_v24 }
 0x231   :  { %4497 = vmatprep.subr.bf16.mxu1 %v6510_v22 }
 0x233   :  { %4469 = vmatpush2.bf16.msra.mxu0 %v6511_v26 }
 0x234   :  { %4498 = vmatpush1.bf16.msra.mxu1 %v6508_v25  ;;  %4470 = vmatprep.subr.bf16.mxu0 %v6519_v14  ;;  %v6565_v14 = vld [vmem:[%s8680_s3 + $0x78] sm:$0xff]  }
 0x235   :  { %4499 = vmatprep.subr.bf16.mxu1 %v6516_v27 }
 0x237   :  { %4471 = vmatpush2.bf16.msra.mxu0 %v6517_v30  ;;  %v6566_v30 = vld [vmem:[%s8680_s3 + $0x38] sm:$0xff]  }
 0x238   :  { %4500 = vmatpush1.bf16.msra.mxu1 %v6514_v12  ;;  %4472 = vmatprep.subr.bf16.mxu0 %v6525_v29  ;;  %v6599_v12 = vmov 0.0   ;;  %v6568_v29 = vld [vmem:[%s8680_s3 + $0x70] sm:$0xff]  }
 0x239   :  { %4501 = vmatprep.subr.bf16.mxu1 %v6522_v34 }
 0x23b   :  { %4473 = vmatpush2.bf16.msra.mxu0 %v6523_v19  ;;  %v6570_v19 = vld [vmem:[%s8680_s3 + $0xb0] sm:$0xff]  }
 0x23c   :  { %4502 = vmatpush1.bf16.msra.mxu1 %v6520_v23  ;;  %4474 = vmatprep.subr.bf16.mxu0 %v6531_v37  ;;  %v6569_v23 = vld [vmem:[%s8680_s3 + $0x30] sm:$0xff]   ;;  %v6572_v37 = vld [vmem:[%s8680_s3 + $0x28] sm:$0xff]  }
 0x23d   :  { %4503 = vmatprep.subr.bf16.mxu1 %v6528_v35  ;;  %v6571_v35 = vld [vmem:[%s8680_s3 + $0x68] sm:$0xff]  }
 0x23f   :  { %4475 = vmatpush2.bf16.msra.mxu0 %v6529_v40  ;;  %v6574_v40 = vld [vmem:[%s8680_s3 + $0x60] sm:$0xff]  }
 0x240   :  { %4504 = vmatpush1.bf16.msra.mxu1 %v6526_v38  ;;  %4476 = vmatprep.subr.bf16.mxu0 %v6537_v42  ;;  %v6573_v38 = vld [vmem:[%s8680_s3 + $0xa8] sm:$0xff]   ;;  %v6576_v42 = vld [vmem:[%s8680_s3 + $0xa0] sm:$0xff]  }
 0x241   :  { %4505 = vmatprep.subr.bf16.mxu1 %v6534_v41  ;;  %v6575_v41 = vld [vmem:[%s8680_s3 + $0x20] sm:$0xff]  }
 0x242   :  { %v4154_v17 = vpop.f32.mrf.mxu0 }
 0x243   :  { %v4155_v47 = vadd.f32 %v4154_v17, %v8374_v56  ;;  %4477 = vmatpush2.bf16.msra.mxu0 %v6535_v45 }
 0x244   :  { %4506 = vmatpush2.bf16.msra.mxu1 %v6532_v43  ;;  %v4156_v52 = vpop.f32.mrf.mxu0  ;;  %4478 = vmatprep.subr.bf16.mxu0 %v6543_v46 }
 0x245   :  { %4507 = vmatprep.subr.bf16.mxu1 %v6540_v51  ;;  %v4157_v56 = vadd.f32 %v4156_v52, %v8382_v62 }
 0x246   :  { %v4158_v59 = vpop.f32.mrf.mxu0 }
 0x247   :  { %4479 = vmatpush2.bf16.msra.mxu0 %v6541_v50  ;;  %v6578_v50 = vld [vmem:[%s8680_s3 + $0x18] sm:$0xff]   ;;  %v6581_v59 = vld [vmem:[%s8680_s3 + $0x10] sm:$0xff]  }
 0x248   :  { %4508 = vmatpush2.bf16.msra.mxu1 %v6538_v48  ;;  %v4159_v1 = vpop.f32.mrf.mxu0  ;;  %4544 = vmatprep.subr.bf16.mxu0 %v6561_v54  ;;  %v6577_v48 = vld [vmem:[%s8680_s3 + $0x58] sm:$0xff]  }
 0x249   :  { %4509 = vmatprep.subr.bf16.mxu1 %v6546_v53  ;;  %v6579_v53 = vld [vmem:[%s8680_s3 + $0x98] sm:$0xff]   ;;  %v6583_v1 = vld [vmem:[%s8680_s3 + $0x48] sm:$0xff]  }
 0x24a   :  { %4481 = vmatmul.mubr.bf16.vlgmr.msra.gmra.mxu0 %v6853_v7  ;;  %v4236_v62 = vpop.f32.mrf.mxu0  ;;  %v6550_v7 = vld [vmem:[%s8678_s1 + $0x1048] ss:$48 sps:$4 sm:$0xff]  }
 0x24b   :  { %4545 = vmatpush1.bf16.msra.mxu0 %v6559_v63  ;;  %4562 = vmatprep.mubr.bf16.mxu0 %v6598_v13  ;;  %v6553_v13 = vld [vmem:[%s8678_s1 + $0xfe8] ss:$48 sps:$4 sm:$0xff]   ;;  %v6582_v63 = vld [vmem:[%s8680_s3 + $0x90] sm:$0xff]  }
 0x24c   :  { %4510 = vmatpush2.bf16.msra.mxu1 %v6544_v61  ;;  %v4238_v4 = vpop.f32.mrf.mxu0  ;;  %5608 = vmatprep.subr.bf16.mxu0 %v6565_v14 }
 0x24d   :  { %4511 = vmatprep.subr.bf16.mxu1 %v6549_v0 }
 0x24e   :  { %v4240_v5 = vpop.f32.mrf.mxu0 }
 0x24f   :  { %v6588_v5 = vld [vmem:[%s8680_s3 + $0x80] sm:$0xff]  }
 0x250   :  { %4512 = vmatpush2.bf16.msra.mxu1 %v6547_v2  ;;  %v4241_v44 = vpop.f32.mrf.mxu0  ;;  %v6585_v2 = vld [vmem:[%s8680_s3 + $0x88] sm:$0xff]  }
 0x251   :  { %4513 = vmatprep.subr.bf16.mxu1 %v6552_v39  ;;  %v6586_v39 = vld [vmem:[%s8680_s3 + $0x40] sm:$0xff]  }
 0x252   :  { %5577 = vmatmul.mubr.msk.bf16.vlgmr.msra.gmra.mxu0 %vm3583_vm0, %v8187_v10  ;;  %v6564_v10 = vld [vmem:[%s8678_s1 + $0xf2c] ss:$48 sps:$4 sm:$0xff]  }
 0x253   :  { %5609 = vmatpush3.bf16.msra.mxu0 %v6566_v30 }
 0x254   :  { %4514 = vmatpush2.bf16.msra.mxu1 %v6550_v7  ;;  %5610 = vmatprep.subr.bf16.mxu0 %v6568_v29 }
 0x255   :  { %4515 = vmatprep.subr.bf16.mxu1 %v6555_v9 }
 0x257   :  { %5611 = vmatpush3.bf16.msra.mxu0 %v6569_v23  ;;  %v4582_v23 = vlaneseq }
 0x258   :  { %4516 = vmatpush2.bf16.msra.mxu1 %v6553_v13  ;;  %5612 = vmatprep.subr.bf16.mxu0 %v6571_v35 }
 0x259   :  { %4517 = vmatprep.subr.bf16.mxu1 %v6558_v55 }
 0x25b   :  { %v4195_v6 = vpop.f32.mrf.mxu1  ;;  %5613 = vmatpush3.bf16.msra.mxu0 %v6572_v37 }
 0x25c   :  { %v4196_v58 = vadd.f32 %v4195_v6, %v4155_v47  ;;  %4518 = vmatpush2.bf16.msra.mxu1 %v6556_v11  ;;  %5614 = vmatprep.subr.bf16.mxu0 %v6574_v40 }
 0x25d   :  { %v4197_v18 = vpop.f32.mrf.mxu1  ;;  %4519 = vmatprep.subr.bf16.mxu1 %v6564_v10 }
 0x25e   :  { %v8554_v33 = vadd.f32 %v4236_v62, %v4196_v58  ;;  %v4198_v20 = vadd.f32 %v4197_v18, %v4157_v56  ;;  %v6580_v56 = vld [vmem:[%s8680_s3 + $0x50] sm:$0xff]   ;;  %v6584_v62 = vld [vmem:[%s8680_s3 + $0x8] sm:$0xff]  }
 0x25f   :  { %v4199_v21 = vpop.f32.mrf.mxu1  ;;  %5615 = vmatpush3.bf16.msra.mxu0 %v6575_v41 }
 0x260   :  { %v8556_v22 = vadd.f32 %v4238_v4, %v4198_v20  ;;  %4520 = vmatpush2.bf16.msra.mxu1 %v6562_v15  ;;  %5616 = vmatprep.subr.bf16.mxu0 %v6577_v48  ;;  %v6587_v4 = vld [vmem:[%s8680_s3] sm:$0xff]  }
 0x261   :  { %v4200_v24 = vpop.f32.mrf.mxu1  ;;  %5643 = vmatprep.subr.bf16.mxu1 %v6599_v12 }
 0x263   :  { %4522 = vmatmul.mubr.bf16.vlgmr.msra.gmra.mxu1 %v7067_v16  ;;  %v6567_v16 = vld [vmem:[%s8680_s3 + $0xb8] sm:$0xff]   ;;  %5617 = vmatpush3.bf16.msra.mxu0 %v6578_v50 }
 0x264   :  { %5644 = vmatpush3.bf16.msra.mxu1 %v6567_v16  ;;  %5618 = vmatprep.subr.bf16.mxu0 %v6580_v56 }
 0x265   :  { %5645 = vmatprep.subr.bf16.mxu1 %v6599_v12  ;;  %5659 = vmatprep.mubr.msk.bf16.mxu1 %vm6600_vm1, %v6599_v12 }
 0x267   :  { %5619 = vmatpush3.bf16.msra.mxu0 %v6581_v59 }
 0x268   :  { %5646 = vmatpush3.bf16.msra.mxu1 %v6570_v19  ;;  %5620 = vmatprep.subr.bf16.mxu0 %v6583_v1  ;;  %v4583_v19 = vshrl.u32 %v4582_v23, 7 }
 0x269   :  { %5647 = vmatprep.subr.bf16.mxu1 %v6599_v12 }
 0x26a   :  { %v4584_v35 = vsub.s32 0, %v4583_v19 }
 0x26b   :  { %5621 = vmatpush3.bf16.msra.mxu0 %v6584_v62 }
 0x26c   :  { %5648 = vmatpush3.bf16.msra.mxu1 %v6573_v38  ;;  %5622 = vmatprep.subr.bf16.mxu0 %v6586_v39  ;;  %v4588_v38 = vsub.s32 1, %v4583_v19  ;;  %v4585_v41 = vrot.slane %v4580_v3, %v4584_v35  ;;  %v5578_v39 = vld [vmem:[%s8683_s4] ss:$0 sm:$0xff] }
 0x26d   :  { %5649 = vmatprep.subr.bf16.mxu1 %v6599_v12 }
 0x26f   :  { %5623 = vmatpush3.bf16.msra.mxu0 %v6587_v4 }
 0x270   :  { %5650 = vmatpush3.bf16.msra.mxu1 %v6576_v42  ;;  %5663 = vmatprep.subr.bf16.mxu0 %v6599_v12 }
 0x271   :  { %5651 = vmatprep.subr.bf16.mxu1 %v6599_v12 }
 0x274   :  { %5652 = vmatpush3.bf16.msra.mxu1 %v6579_v53 }
 0x275   :  { %5653 = vmatprep.subr.bf16.mxu1 %v6599_v12 }
 0x278   :  { %5654 = vmatpush3.bf16.msra.mxu1 %v6582_v63 }
 0x279   :  { %5655 = vmatprep.subr.bf16.mxu1 %v6599_v12 }
 0x27c   :  { %5656 = vmatpush3.bf16.msra.mxu1 %v6585_v2 }
 0x27d   :  { %5657 = vmatprep.subr.bf16.mxu1 %v6599_v12 }
 0x280   :  { %5658 = vmatpush3.bf16.msra.mxu1 %v6588_v5 }
 0x28a   :  { %v4277_v25 = vpop.f32.mrf.mxu0 }
 0x28c   :  { %v4279_v26 = vpop.f32.mrf.mxu0 }
 0x28e   :  { %v4281_v27 = vpop.f32.mrf.mxu0 }
 0x290   :  { %v4282_v34 = vpop.f32.mrf.mxu0 }
 0x29b   :  { %v4318_v43 = vpop.f32.mrf.mxu1 }
 0x29c   :  { %v4319_v45 = vadd.f32 %v4318_v43, %v4277_v25 }
 0x29d   :  { %v4320_v51 = vpop.f32.mrf.mxu1 }
 0x29e   :  { %v4321_v46 = vadd.f32 %v4320_v51, %v4279_v26 }
 0x29f   :  { %v4322_v17 = vpop.f32.mrf.mxu1 }
 0x2a1   :  { %v4323_v47 = vpop.f32.mrf.mxu1 }
 0x2a2   :  { %v4589_v47 = vrot.slane %v4580_v3, %v4588_v38 }
 0x2a3   :  { %v4400_v52 = vpop.f32.mrf.mxu1 }
 0x2a5   :  { %v4402_v54 = vpop.f32.mrf.mxu1 }
 0x2a7   :  { %v4404_v61 = vpop.f32.mrf.mxu1 }
 0x2a9   :  { %v4405_v0 = vpop.f32.mrf.mxu1 }
 0x2ca   :  { %v4359_v7 = vpop.f32.mrf.mxu0 }
 0x2cb   :  { %v4360_v9 = vadd.f32 %v4359_v7, %v4319_v45  ;;  %v4592_v45 = vsub.s32 2, %v4583_v19 }
 0x2cc   :  { %v4361_v44 = vpop.f32.mrf.mxu0 }
 0x2cd   :  { %v4401_v13 = vadd.f32 %v4400_v52, %v4360_v9  ;;  %v4362_v55 = vadd.f32 %v4361_v44, %v4321_v46 }
 0x2ce   :  { %v4363_v11 = vpop.f32.mrf.mxu0 }
 0x2cf   :  { %v4403_v10 = vadd.f32 %v4402_v54, %v4362_v55  ;;  %v4593_v54 = vrot.slane %v4580_v3, %v4592_v45 }
 0x2d0   :  { %v4364_v6 = vpop.f32.mrf.mxu0 }
 0x2d1   :  { %v4574_v58 = vmax.f32 %v8554_v33, %v4403_v10 }
 0x2d3   :  { %v4577_v15 = vmax.f32 %v4571_v60, %v4574_v58  ;;  %v5603_v58 = vld [vmem:[%s8684_s6] ss:$0 sm:$0xff] }
 0x2d5   :  { %v4597_v50 = vadd.f32 %v4585_v41, %v4577_v15 }
 0x2d7   :  { %v4600_v61 = vmax.f32 %v4597_v50, 0.0 }
 0x2d9   :  { %v4603_v62 = vpack.c.bf16 %v4600_v61, %v4600_v61 }
 0x2e3   :  { %v4441_v18 = vpop.f32.mrf.mxu1 }
 0x2e5   :  { %v4443_v20 = vpop.f32.mrf.mxu1 }
 0x2e7   :  { %v4445_v21 = vpop.f32.mrf.mxu1 }
 0x2e9   :  { %v4446_v24 = vpop.f32.mrf.mxu1 }
 0x30a   :  { %v4482_v25 = vpop.f32.mrf.mxu0 }
 0x30b   :  { %v4483_v33 = vadd.f32 %v4482_v25, %v4441_v18 }
 0x30c   :  { %v4484_v26 = vpop.f32.mrf.mxu0 }
 0x30d   :  { %v4485_v60 = vadd.f32 %v4484_v26, %v4443_v20 }
 0x30e   :  { %v4486_v27 = vpop.f32.mrf.mxu0 }
 0x310   :  { %v4487_v14 = vpop.f32.mrf.mxu0 }
 0x312   :  { %v4564_v30 = vpop.f32.mrf.mxu0 }
 0x314   :  { %v4566_v34 = vpop.f32.mrf.mxu0 }
 0x316   :  { %v4568_v16 = vpop.f32.mrf.mxu0 }
 0x318   :  { %v4569_v29 = vpop.f32.mrf.mxu0 }
 0x323   :  { %v4523_v57 = vpop.f32.mrf.mxu1 }
 0x324   :  { %v4524_v37 = vadd.f32 %v4523_v57, %v4483_v33 }
 0x325   :  { %v4525_v40 = vpop.f32.mrf.mxu1 }
 0x326   :  { %v4565_v42 = vadd.f32 %v4564_v30, %v4524_v37  ;;  %v4526_v43 = vadd.f32 %v4525_v40, %v4485_v60 }
 0x327   :  { %v4527_v51 = vpop.f32.mrf.mxu1 }
 0x328   :  { %v4575_v46 = vmax.f32 %v8556_v22, %v4565_v42  ;;  %v4567_v17 = vadd.f32 %v4566_v34, %v4526_v43 }
 0x329   :  { %v4528_v48 = vpop.f32.mrf.mxu1 }
 0x32a   :  { %v4578_v52 = vmax.f32 %v4572_v31, %v4575_v46  ;;  %v4576_v53 = vmax.f32 %v4401_v13, %v4567_v17  ;;  %v6591_v31 = vld [vmem:[%s8682_s5] sm:$0xff]  }
 0x32c   :  { %v4579_v56 = vmax.f32 %v4573_v36, %v4576_v53  ;;  %v4598_v59 = vadd.f32 %v4589_v47, %v4578_v52 }
 0x32e   :  { %v4601_v63 = vmax.f32 %v4598_v59, 0.0  ;;  %v4599_v0 = vadd.f32 %v4593_v54, %v4579_v56 }
 0x330   :  { %v4604_v1 = vpack.c.bf16 %v4601_v63, %v4601_v63  ;;  %v4602_v22 = vmax.f32 %v4599_v0, 0.0 }
 0x332   :  { %4837 = vmatprep.mubr.bf16.mxu0 %v4604_v1  ;;  %v4605_v2 = vpack.c.bf16 %v4602_v22, %v4602_v22 }
 0x333   :  { %4838 = vmatmul.mubr.bf16.vlgmr.msra.gmra.mxu0 %v4603_v62 }
 0x334   :  { %5660 = vmatmul.mubr.bf16.vlgmr.msra.gmra.mxu1 %v4605_v2  ;;  %5669 = vmatprep.mubr.msk.bf16.mxu0 %vm6600_vm1, %v6599_v12 }
 0x335   :  { %5664 = vmatpush3.bf16.msra.mxu0 %v4920_v49 }
 0x336   :  { %5665 = vmatprep.subr.bf16.mxu0 %v6599_v12 }
 0x339   :  { %5666 = vmatpush3.bf16.msra.mxu0 %v6590_v28 }
 0x33a   :  { %5667 = vmatprep.subr.bf16.mxu0 %v6599_v12 }
 0x33d   :  { %5668 = vmatpush3.bf16.msra.mxu0 %v6591_v31 }
 0x3f3   :  { %v5624_v32 = vpop.f32.mrf.mxu0 }
 0x3f4   :  { %v4879_v36 = vpop.f32.mrf.mxu1 }
 0x3f5   :  { %v5625_v4 = vpop.f32.mrf.mxu0 }
 0x3f6   :  { %v5626_v5 = vadd.f32 %v5625_v4, %v5624_v32  ;;  %v5661_v7 = vpop.f32.mrf.mxu1 }
 0x3f7   :  { %v5627_v9 = vpop.f32.mrf.mxu0 }
 0x3f8   :  { %v4840_v44 = vadd.f32 %v5626_v5, %v5578_v39  ;;  %v4882_v13 = vpop.f32.mrf.mxu1 }
 0x3f9   :  { %v5628_v55 = vpop.f32.mrf.mxu0 }
 0x3fa   :  { %v4880_v11 = vadd.f32 %v4879_v36, %v4840_v44  ;;  %v5662_v12 = vpop.f32.mrf.mxu1 }
 0x3fc   :  { %v4885_v10 = vmax.f32 %v4880_v11, 0.0 }
 0x3fe   :  { %v4886_v6 = vpack.c.bf16 %v4885_v10, %v4885_v10 }
 0x400   :  { %5670 = vmatmul.mubr.msk.bf16.vlgmr.msra.gmra.mxu0 %vm4914_vm3, %v4886_v6 }
 0x4c0   :  { %v4956_v15 = vpop.f32.mrf.mxu0 }
 0x4c1   :  { %v4957_v18 = vadd.f32 %v5603_v58, %v4956_v15 }
 0x4c2   :  { %v5671_v20 = vpop.f32.mrf.mxu0 }
 0x4c3   :  { %4962 = vmax.xlane.f32.xlu0 %v4957_v18 }
 0x4c4   :  { %v4959_v21 = vpop.f32.mrf.mxu0 }
 0x4c6   :  { %v5672_v24 = vpop.f32.mrf.mxu0 }
 0x54c   :  { %v4963_v25 = vpop.xlane.xlu0 %4962 }
 0x54d   :  { %v4964_v26 = vsub.f32 %v4957_v18, %v4963_v25 }
 0x54f   :  { %v4965_v27 = vmul.f32 1.442695, %v4964_v26 }
 0x551   :  { %6592 = vpow2.f32 %v4965_v27 }
 0x55e   :  { %v6593_v14 = vpop.eup %6592 }
 0x55f   :  { %4967 = vadd.xlane.f32.xlu0 %v6593_v14 }
 0x5e8   :  { %v4968_v30 = vpop.xlane.xlu0 %4967 }
 0x5e9   :  { %6594 = vlog2.f32 %v4968_v30 }
 0x5f6   :  { %v6595_v34 = vpop.eup %6594 }
 0x5f7   :  { %v4970_v16 = vmul.f32 0.6931472, %v6595_v34 }
 0x5f9   :  { %v4971_v29 = vsub.f32 %v4964_v26, %v4970_v16 }
 0x5fb   :  { %4972 = vst [vmem:[%s8685_s7] sm:$0xff] %v4971_v29 }

</bundles_post_ra>
